<compile_context>
chip_gen: v7x
topology: tpu7x:2x2x1
jax: 0.10.0
libtpu: 0.0.40
codegen_flags: <defaults>
</compile_context>

<pallas_src>
import math

import numpy as np

import jax
import jax.numpy as jnp
from jax import lax
from jax.experimental import pallas as pl
from jax.experimental.pallas import tpu as pltpu

# ---- small config consistent with the module ----
VOCAB = 64
HIDDEN = 32
NUM_LAYERS = 2
NUM_HEADS = 4
INTERMEDIATE = 64
MAX_POS = 16
HEAD_DIM = HIDDEN // NUM_HEADS            # 8
HELIX_DIM = HEAD_DIM // 2 * 2             # 8
HELIX_PAIRS = HELIX_DIM // 2              # 4
BATCH = 2
SEQ = 8

LN_EPS = 1e-5
NORM_EPS = 1e-12
TWO_PI = 2.0 * math.pi
SCALE_DOT = 0.5 / math.sqrt(HEAD_DIM)     # alpha / sqrt(head_dim)
SCALE_HEL = 0.5 / HELIX_PAIRS             # (1 - alpha) / (helix_dim // 2)


# ---------------- in-kernel helpers (pure jnp, traced inside the kernel) ----

def _dot(a, b):
    return jnp.dot(a, b, preferred_element_type=jnp.float32)


def _layernorm(x, g, b):
    mu = jnp.mean(x, axis=-1, keepdims=True)
    var = jnp.mean(jnp.square(x - mu), axis=-1, keepdims=True)
    return (x - mu) / jnp.sqrt(var + LN_EPS) * g + b


def _pair_normalize(x, pair_sum):
    # F.normalize(p=2, dim=-1, eps=1e-12) applied to each adjacent (2k, 2k+1)
    # column pair; pair sum-of-squares via a constant 0/1 matmul.
    ss = _dot(x * x, pair_sum)
    return x / jnp.maximum(jnp.sqrt(ss), NORM_EPS)


# float32-accurate erf (Abramowitz & Stegun 7.1.26, |err| <= 1.5e-7)
_ERF_A1 = 0.254829592
_ERF_A2 = -0.284496736
_ERF_A3 = 1.421413741
_ERF_A4 = -1.453152027
_ERF_A5 = 1.061405429
_ERF_P = 0.3275911


def _erf(x):
    sign = jnp.where(x < 0.0, -1.0, 1.0)
    ax = jnp.abs(x)
    t = 1.0 / (1.0 + _ERF_P * ax)
    poly = t * (_ERF_A1 + t * (_ERF_A2 + t * (_ERF_A3 + t * (_ERF_A4 + t * _ERF_A5))))
    return sign * (1.0 - poly * jnp.exp(-ax * ax))


def _gelu_exact(x):
    # matches F.gelu (erf form) to ~1e-7
    return 0.5 * x * (1.0 + _erf(x * (1.0 / math.sqrt(2.0))))


def _sincos(theta):
    # range-reduced Taylor sin/cos, accurate to ~2.5e-8 on any float32 input
    half_pi = 0.5 * math.pi
    q = jnp.floor(theta / half_pi + 0.5)
    r = theta - q * half_pi                       # r in [-pi/4, pi/4]
    r2 = r * r
    sin_r = r * (1.0 + r2 * (-1.0 / 6.0 + r2 * (1.0 / 120.0
                 + r2 * (-1.0 / 5040.0 + r2 * (1.0 / 362880.0)))))
    cos_r = 1.0 + r2 * (-0.5 + r2 * (1.0 / 24.0
                 + r2 * (-1.0 / 720.0 + r2 * (1.0 / 40320.0))))
    qm = q - 4.0 * jnp.floor(q * 0.25)            # q mod 4
    sin_t = jnp.where(qm == 0.0, sin_r,
            jnp.where(qm == 1.0, cos_r,
            jnp.where(qm == 2.0, -sin_r, -cos_r)))
    cos_t = jnp.where(qm == 0.0, cos_r,
            jnp.where(qm == 1.0, -sin_r,
            jnp.where(qm == 2.0, -cos_r, sin_r)))
    return sin_t, cos_t


# ---------------- the single fused Pallas kernel ----------------

def _fused_forward_kernel(
    tok_ref, pos_ref, helpos_ref,
    tor_in_w_ref, tor_in_b_ref, tor_periods_ref,
    tor_out_w_cos_ref, tor_out_w_sin_ref, tor_out_b_ref,
    ln0_g_ref, ln0_b_ref,
    wqkv_ref, bqkv_ref, whel_ref, bhel_ref, wo_ref, bo_ref,
    ln1_g_ref, ln1_b_ref, wi_ref, bi_ref, wout_ref, bout_ref,
    ln2_g_ref, ln2_b_ref,
    out_w_ref, out_b_ref,
    pair_sum_ref, scr_l_ref, scr_r_ref,
    logits_ref,
):
    # --- hyperspherical token normalize + embedding sum ---
    tok = tok_ref[...]
    tok = tok / jnp.maximum(
        jnp.sqrt(jnp.sum(tok * tok, axis=-1, keepdims=True)), NORM_EPS)
    hs = tok + pos_ref[...] + helpos_ref[...]                       # (B*S, H)

    # --- toroidal layer (cos/sin interleave folded into split output weight) ---
    tv = _dot(hs, tor_in_w_ref[...]) + tor_in_b_ref[...]            # (B*S, 4)
    sin_p, cos_p = _sincos(TWO_PI * tv / tor_periods_ref[...])
    tor_out = (_dot(cos_p, tor_out_w_cos_ref[...])
               + _dot(sin_p, tor_out_w_sin_ref[...])
               + tor_out_b_ref[...])
    hs = _layernorm(hs + 0.1 * tor_out, ln0_g_ref[...], ln0_b_ref[...])
    # dropout: eval mode -> identity

    pair_sum = pair_sum_ref[...]

    # --- transformer layers (weights stacked along a leading layer axis) ---
    for li in range(NUM_LAYERS):
        qkv = _dot(hs, wqkv_ref[li]) + bqkv_ref[li]                 # (B*S, 3H)
        q = qkv[:, 0:HIDDEN]
        k = qkv[:, HIDDEN:2 * HIDDEN]
        v = qkv[:, 2 * HIDDEN:3 * HIDDEN]

        # per-head helical projections via one block-diagonal (H, H) matmul
        hq = _dot(q, whel_ref[li]) + bhel_ref[li]                   # (B*S, nh*hx)
        hk = _dot(k, whel_ref[li]) + bhel_ref[li]
        nq = _pair_normalize(hq, pair_sum)
        nk = _pair_normalize(hk, pair_sum)

        # reference transpose(1,2).reshape "scramble" == sum of 4 separable
        # constant permutation matmuls:  Qf = sum_t L_t @ N @ R_t
        qf = jnp.zeros_like(nq)
        kf = jnp.zeros_like(nk)
        for t in range(4):
            l_t = scr_l_ref[t]
            r_t = scr_r_ref[t]
            qf = qf + _dot(_dot(l_t, nq), r_t)
            kf = kf + _dot(_dot(l_t, nk), r_t)

        qd = q * SCALE_DOT
        qf = qf * SCALE_HEL

        # per-(batch, head) combined-score attention, fully in VMEM/registers
        row_blocks = []
        for b in range(BATCH):
            r0 = b * SEQ
            head_blocks = []
            for hh in range(NUM_HEADS):
                c0 = hh * HEAD_DIM
                ch = hh * HELIX_DIM
                q_bh = qd[r0:r0 + SEQ, c0:c0 + HEAD_DIM]
                k_bh = k[r0:r0 + SEQ, c0:c0 + HEAD_DIM]
                v_bh = v[r0:r0 + SEQ, c0:c0 + HEAD_DIM]
                qf_bh = qf[r0:r0 + SEQ, ch:ch + HELIX_DIM]
                kf_bh = kf[r0:r0 + SEQ, ch:ch + HELIX_DIM]
                scores = (
                    lax.dot_general(q_bh, k_bh, (((1,), (1,)), ((), ())),
                                    preferred_element_type=jnp.float32)
                    + lax.dot_general(qf_bh, kf_bh, (((1,), (1,)), ((), ())),
                                      preferred_element_type=jnp.float32))
                scores = scores - jnp.max(scores, axis=-1, keepdims=True)
                probs = jnp.exp(scores)
                probs = probs / jnp.sum(probs, axis=-1, keepdims=True)
                head_blocks.append(_dot(probs, v_bh))               # (S, hd)
            row_blocks.append(jnp.concatenate(head_blocks, axis=1))  # (S, H)
        attn = jnp.concatenate(row_blocks, axis=0)                   # (B*S, H)

        attn = _dot(attn, wo_ref[li]) + bo_ref[li]
        h1 = _layernorm(hs + attn, ln1_g_ref[li], ln1_b_ref[li])
        inter = _gelu_exact(_dot(h1, wi_ref[li]) + bi_ref[li])
        ffn = _dot(inter, wout_ref[li]) + bout_ref[li]
        hs = _layernorm(h1 + ffn, ln2_g_ref[li], ln2_b_ref[li])

    logits_ref[...] = _dot(hs, out_w_ref[...]) + out_b_ref[...]


# ---------------- parameter packing (runs once, outside jit) ----------------

def _block_diag(blocks):
    n = len(blocks)
    r, c = blocks[0].shape
    out = jnp.zeros((n * r, n * c), jnp.float32)
    for i, blk in enumerate(blocks):
        out = out.at[i * r:(i + 1) * r, i * c:(i + 1) * c].set(blk)
    return out


def _build_scramble_constants():
    """Constant matrices so that sum_t L_t @ N @ R_t reproduces the reference
    per-pair transpose(1,2).reshape(B,1,S,2) 'scramble' of normalized pairs,
    batched over (batch, head) via Kronecker block structure."""
    s, hx, j, half = SEQ, HELIX_DIM, HELIX_PAIRS, SEQ // 2
    ls, rs = [], []
    for c in (0, 1):
        for e in (0, 1):
            l_m = np.zeros((s, s), np.float32)
            for row in range(s):
                if row // half == e:
                    l_m[row, 2 * (row % half) + c] = 1.0
            r_m = np.zeros((hx, hx), np.float32)
            for col in range(hx):
                if col // j == c:
                    r_m[2 * (col % j) + e, col] = 1.0
            ls.append(np.kron(np.eye(BATCH, dtype=np.float32), l_m))
            rs.append(np.kron(np.eye(NUM_HEADS, dtype=np.float32), r_m))
    return jnp.asarray(np.stack(ls)), jnp.asarray(np.stack(rs))


def pack_params(params):
    layers = params["layers"]

    def stack(fn):
        return jnp.stack([fn(lp) for lp in layers])

    pk = {
        "tok_emb": params["tok_emb"],
        "pos_emb": params["pos_emb"],
        "hel_periods": params["hel_periods"],
        "tor_in_w": params["tor_in_w"],
        "tor_in_b": params["tor_in_b"],
        "tor_periods": params["tor_periods"].reshape(1, -1),
        # split output weight so cos/sin never need interleaving in-kernel
        "tor_out_w_cos": params["tor_out_w"][0::2, :],
        "tor_out_w_sin": params["tor_out_w"][1::2, :],
        "tor_out_b": params["tor_out_b"],
        "ln0_g": params["ln_g"].reshape(1, HIDDEN),
        "ln0_b": params["ln_b"].reshape(1, HIDDEN),
        # fused QKV projection
        "wqkv": stack(lambda lp: jnp.concatenate([lp["wq"], lp["wk"], lp["wv"]], axis=1)),
        "bqkv": stack(lambda lp: jnp.concatenate([lp["bq"], lp["bk"], lp["bv"]], axis=1)),
        # per-head helical projections -> one block-diagonal matmul
        "whel": stack(lambda lp: _block_diag([lp["hel_w"][h] for h in range(NUM_HEADS)])),
        "bhel": stack(lambda lp: jnp.concatenate([lp["hel_b"][h] for h in range(NUM_HEADS)], axis=1)),
        "wo": stack(lambda lp: lp["wo"]),
        "bo": stack(lambda lp: lp["bo"]),
        "ln1_g": stack(lambda lp: lp["ln1_g"].reshape(1, HIDDEN)),
        "ln1_b": stack(lambda lp: lp["ln1_b"].reshape(1, HIDDEN)),
        "wi": stack(lambda lp: lp["wi"]),
        "bi": stack(lambda lp: lp["bi"]),
        "wout": stack(lambda lp: lp["wout"]),
        "bout": stack(lambda lp: lp["bout"]),
        "ln2_g": stack(lambda lp: lp["ln2_g"].reshape(1, HIDDEN)),
        "ln2_b": stack(lambda lp: lp["ln2_b"].reshape(1, HIDDEN)),
        "out_w": params["out_w"],
        "out_b": params["out_b"],
        "pair_sum": jnp.asarray(
            np.kron(np.eye(NUM_HEADS * HELIX_PAIRS, dtype=np.float32),
                    np.ones((2, 2), np.float32))),
    }
    pk["scr_l"], pk["scr_r"] = _build_scramble_constants()
    return pk


# ---------------- forward (1 pallas_call + a handful of XLA glue ops) -------

def forward_fn(pk, input_ids):
    b, s = input_ids.shape
    hid = HIDDEN

    # data-dependent embedding gather + position-only helical encoding (XLA)
    tok = jnp.take(pk["tok_emb"], input_ids.reshape(-1), axis=0)            # (B*S, H)
    pos = jnp.tile(pk["pos_emb"][:s], (b, 1))                                # (B*S, H)
    positions = jnp.tile(jnp.arange(s, dtype=jnp.float32), (b,))[:, None]    # (B*S, 1)
    phases = TWO_PI * positions / pk["hel_periods"][None, :]                 # (B*S, 4)
    hel_dim = hid // 4
    helpos = jnp.zeros((b * s, hid), jnp.float32)
    helpos = helpos.at[:, 0:hel_dim:2].set(jnp.cos(phases))
    helpos = helpos.at[:, 1:hel_dim:2].set(jnp.sin(phases))

    operands = (
        tok, pos, helpos,
        pk["tor_in_w"], pk["tor_in_b"], pk["tor_periods"],
        pk["tor_out_w_cos"], pk["tor_out_w_sin"], pk["tor_out_b"],
        pk["ln0_g"], pk["ln0_b"],
        pk["wqkv"], pk["bqkv"], pk["whel"], pk["bhel"], pk["wo"], pk["bo"],
        pk["ln1_g"], pk["ln1_b"], pk["wi"], pk["bi"], pk["wout"], pk["bout"],
        pk["ln2_g"], pk["ln2_b"],
        pk["out_w"], pk["out_b"],
        pk["pair_sum"], pk["scr_l"], pk["scr_r"],
    )

    logits = pl.pallas_call(
        _fused_forward_kernel,
        out_shape=jax.ShapeDtypeStruct((b * s, VOCAB), jnp.float32),
        in_specs=[pl.BlockSpec(memory_space=pltpu.MemorySpace.VMEM)] * len(operands),
        out_specs=pl.BlockSpec(memory_space=pltpu.MemorySpace.VMEM),
    )(*operands)
    return logits.reshape(b, s, VOCAB)


forward = jax.jit(forward_fn)


# ---------------- deterministic parameter init (same as reference layout) ---

def _init_linear(key, fan_in, fan_out):
    kw, kb = jax.random.split(key)
    w = jax.random.normal(kw, (fan_in, fan_out), jnp.float32) * (1.0 / math.sqrt(fan_in))
    b = jax.random.normal(kb, (1, fan_out), jnp.float32) * 0.02
    return w, b


def init_params(key):
    keys = list(jax.random.split(key, 6 + NUM_LAYERS))
    base = [10.0, 100.0, 24.0, 60.0, 7.0, 365.0, 12.0, 1000.0]
    p = {}

    emb = jax.random.normal(keys[0], (VOCAB, HIDDEN), jnp.float32)
    emb = emb / jnp.maximum(jnp.linalg.norm(emb, axis=1, keepdims=True), 1e-12)
    p["tok_emb"] = emb
    p["pos_emb"] = jax.random.normal(keys[1], (MAX_POS, HIDDEN), jnp.float32) * 0.02

    n_hel = (HIDDEN // 4) // 2
    hel_periods = base[:n_hel] + [1000.0] * max(0, n_hel - len(base))
    p["hel_periods"] = jnp.array(hel_periods, jnp.float32)

    num_tori = 4
    p["tor_periods"] = jnp.array(
        base[:num_tori] + [1000.0] * max(0, num_tori - len(base)), jnp.float32)
    p["tor_in_w"], p["tor_in_b"] = _init_linear(keys[2], HIDDEN, num_tori)
    p["tor_out_w"], p["tor_out_b"] = _init_linear(keys[3], 2 * num_tori, HIDDEN)

    p["ln_g"] = jnp.ones((HIDDEN,), jnp.float32)
    p["ln_b"] = jnp.zeros((HIDDEN,), jnp.float32)
    p["out_w"], p["out_b"] = _init_linear(keys[4], HIDDEN, VOCAB)

    layers = []
    for li in range(NUM_LAYERS):
        lk = jax.random.split(keys[5 + li], 8)
        lp = {}
        lp["wq"], lp["bq"] = _init_linear(lk[0], HIDDEN, HIDDEN)
        lp["wk"], lp["bk"] = _init_linear(lk[1], HIDDEN, HIDDEN)
        lp["wv"], lp["bv"] = _init_linear(lk[2], HIDDEN, HIDDEN)
        lp["wo"], lp["bo"] = _init_linear(lk[3], HIDDEN, HIDDEN)
        lp["hel_w"] = jax.random.normal(
            lk[4], (NUM_HEADS, HEAD_DIM, HELIX_DIM), jnp.float32) * (1.0 / math.sqrt(HEAD_DIM))
        lp["hel_b"] = jax.random.normal(
            lk[5], (NUM_HEADS, 1, HELIX_DIM), jnp.float32) * 0.02
        lp["wi"], lp["bi"] = _init_linear(lk[6], HIDDEN, INTERMEDIATE)
        lp["wout"], lp["bout"] = _init_linear(lk[7], INTERMEDIATE, HIDDEN)
        lp["ln1_g"] = jnp.ones((HIDDEN,), jnp.float32)
        lp["ln1_b"] = jnp.zeros((HIDDEN,), jnp.float32)
        lp["ln2_g"] = jnp.ones((HIDDEN,), jnp.float32)
        lp["ln2_b"] = jnp.zeros((HIDDEN,), jnp.float32)
        layers.append(lp)
    p["layers"] = layers
    return p


if __name__ == "__main__":
    key = jax.random.PRNGKey(0)
    kp, kin = jax.random.split(key)
    params = init_params(kp)
    packed = pack_params(params)          # one-time weight packing (outside jit)
    input_ids = jax.random.randint(kin, (BATCH, SEQ), 0, VOCAB, dtype=jnp.int32)

    logits = forward(packed, input_ids)
    jax.block_until_ready(logits)
    assert logits.shape == (BATCH, SEQ, VOCAB)
    assert bool(jnp.all(jnp.isfinite(logits)))
    print("KERNEL_OK")
</pallas_src>

<mosaic_0001>
module attributes {stable_mosaic.version = 11 : i64} {
  func.func @_fused_forward_kernel(%arg0: memref<16x32xf32, #tpu.memory_space<vmem>>, %arg1: memref<16x32xf32, #tpu.memory_space<vmem>>, %arg2: memref<16x32xf32, #tpu.memory_space<vmem>>, %arg3: memref<32x4xf32, #tpu.memory_space<vmem>>, %arg4: memref<1x4xf32, #tpu.memory_space<vmem>>, %arg5: memref<1x4xf32, #tpu.memory_space<vmem>>, %arg6: memref<4x32xf32, #tpu.memory_space<vmem>>, %arg7: memref<4x32xf32, #tpu.memory_space<vmem>>, %arg8: memref<1x32xf32, #tpu.memory_space<vmem>>, %arg9: memref<1x32xf32, #tpu.memory_space<vmem>>, %arg10: memref<1x32xf32, #tpu.memory_space<vmem>>, %arg11: memref<2x32x96xf32, #tpu.memory_space<vmem>>, %arg12: memref<2x1x96xf32, #tpu.memory_space<vmem>>, %arg13: memref<2x32x32xf32, #tpu.memory_space<vmem>>, %arg14: memref<2x1x32xf32, #tpu.memory_space<vmem>>, %arg15: memref<2x32x32xf32, #tpu.memory_space<vmem>>, %arg16: memref<2x1x32xf32, #tpu.memory_space<vmem>>, %arg17: memref<2x1x32xf32, #tpu.memory_space<vmem>>, %arg18: memref<2x1x32xf32, #tpu.memory_space<vmem>>, %arg19: memref<2x32x64xf32, #tpu.memory_space<vmem>>, %arg20: memref<2x1x64xf32, #tpu.memory_space<vmem>>, %arg21: memref<2x64x32xf32, #tpu.memory_space<vmem>>, %arg22: memref<2x1x32xf32, #tpu.memory_space<vmem>>, %arg23: memref<2x1x32xf32, #tpu.memory_space<vmem>>, %arg24: memref<2x1x32xf32, #tpu.memory_space<vmem>>, %arg25: memref<32x64xf32, #tpu.memory_space<vmem>>, %arg26: memref<1x64xf32, #tpu.memory_space<vmem>>, %arg27: memref<32x32xf32, #tpu.memory_space<vmem>>, %arg28: memref<4x16x16xf32, #tpu.memory_space<vmem>>, %arg29: memref<4x32x32xf32, #tpu.memory_space<vmem>>, %arg30: memref<16x64xf32, #tpu.memory_space<vmem>>) attributes {dimension_semantics = [], scalar_prefetch = 0 : i64, scratch_operands = 0 : i64, tpu.core_type = #tpu.core_type<tc>} {
    %c0 = arith.constant 0 : index
    %c0_0 = arith.constant 0 : index
    %0 = vector.load %arg0[%c0, %c0_0] : memref<16x32xf32, #tpu.memory_space<vmem>>, vector<16x32xf32>
    %1 = arith.mulf %0, %0 : vector<16x32xf32>
    %cst = arith.constant dense<0.000000e+00> : vector<16xf32>
    %2 = vector.multi_reduction <add>, %1, %cst [1] : vector<16x32xf32> to vector<16xf32>
    %3 = vector.shape_cast %2 : vector<16xf32> to vector<16x1xf32>
    %4 = math.sqrt %3 : vector<16x1xf32>
    %cst_1 = arith.constant 9.99999996E-13 : f32
    %5 = vector.broadcast %cst_1 : f32 to vector<16x1xf32>
    %6 = arith.maximumf %4, %5 : vector<16x1xf32>
    %7 = vector.broadcast %6 : vector<16x1xf32> to vector<16x32xf32>
    %8 = arith.divf %0, %7 : vector<16x32xf32>
    %c0_2 = arith.constant 0 : index
    %c0_3 = arith.constant 0 : index
    %9 = vector.load %arg1[%c0_2, %c0_3] : memref<16x32xf32, #tpu.memory_space<vmem>>, vector<16x32xf32>
    %10 = arith.addf %8, %9 : vector<16x32xf32>
    %c0_4 = arith.constant 0 : index
    %c0_5 = arith.constant 0 : index
    %11 = vector.load %arg2[%c0_4, %c0_5] : memref<16x32xf32, #tpu.memory_space<vmem>>, vector<16x32xf32>
    %12 = arith.addf %10, %11 : vector<16x32xf32>
    %c0_6 = arith.constant 0 : index
    %c0_7 = arith.constant 0 : index
    %13 = vector.load %arg3[%c0_6, %c0_7] : memref<32x4xf32, #tpu.memory_space<vmem>>, vector<32x4xf32>
    %cst_8 = arith.constant dense<0.000000e+00> : vector<16x4xf32>
    %14 = tpu.matmul %12, %13, %cst_8 {dimension_numbers = #tpu.dot_dimension_numbers<[1], [0], [0], [1], [0, 0, 1, 1], [], []>} : vector<16x32xf32>, vector<32x4xf32>, vector<16x4xf32> -> vector<16x4xf32>
    %c0_9 = arith.constant 0 : index
    %c0_10 = arith.constant 0 : index
    %15 = vector.load %arg4[%c0_9, %c0_10] : memref<1x4xf32, #tpu.memory_space<vmem>>, vector<1x4xf32>
    %16 = vector.broadcast %15 : vector<1x4xf32> to vector<16x4xf32>
    %17 = arith.addf %14, %16 : vector<16x4xf32>
    %cst_11 = arith.constant 6.28318548 : f32
    %18 = vector.broadcast %cst_11 : f32 to vector<16x4xf32>
    %19 = arith.mulf %18, %17 : vector<16x4xf32>
    %c0_12 = arith.constant 0 : index
    %c0_13 = arith.constant 0 : index
    %20 = vector.load %arg5[%c0_12, %c0_13] : memref<1x4xf32, #tpu.memory_space<vmem>>, vector<1x4xf32>
    %21 = vector.broadcast %20 : vector<1x4xf32> to vector<16x4xf32>
    %22 = arith.divf %19, %21 : vector<16x4xf32>
    %cst_14 = arith.constant 1.57079637 : f32
    %23 = vector.broadcast %cst_14 : f32 to vector<16x4xf32>
    %24 = arith.divf %22, %23 : vector<16x4xf32>
    %cst_15 = arith.constant 5.000000e-01 : f32
    %25 = vector.broadcast %cst_15 : f32 to vector<16x4xf32>
    %26 = arith.addf %24, %25 : vector<16x4xf32>
    %27 = math.floor %26 : vector<16x4xf32>
    %cst_16 = arith.constant 1.57079637 : f32
    %28 = vector.broadcast %cst_16 : f32 to vector<16x4xf32>
    %29 = arith.mulf %27, %28 : vector<16x4xf32>
    %30 = arith.subf %22, %29 : vector<16x4xf32>
    %31 = arith.mulf %30, %30 : vector<16x4xf32>
    %cst_17 = arith.constant 2.75573188E-6 : f32
    %32 = vector.broadcast %cst_17 : f32 to vector<16x4xf32>
    %33 = arith.mulf %31, %32 : vector<16x4xf32>
    %cst_18 = arith.constant -1.98412701E-4 : f32
    %34 = vector.broadcast %cst_18 : f32 to vector<16x4xf32>
    %35 = arith.addf %34, %33 : vector<16x4xf32>
    %36 = arith.mulf %31, %35 : vector<16x4xf32>
    %cst_19 = arith.constant 0.00833333377 : f32
    %37 = vector.broadcast %cst_19 : f32 to vector<16x4xf32>
    %38 = arith.addf %37, %36 : vector<16x4xf32>
    %39 = arith.mulf %31, %38 : vector<16x4xf32>
    %cst_20 = arith.constant -0.166666672 : f32
    %40 = vector.broadcast %cst_20 : f32 to vector<16x4xf32>
    %41 = arith.addf %40, %39 : vector<16x4xf32>
    %42 = arith.mulf %31, %41 : vector<16x4xf32>
    %cst_21 = arith.constant 1.000000e+00 : f32
    %43 = vector.broadcast %cst_21 : f32 to vector<16x4xf32>
    %44 = arith.addf %43, %42 : vector<16x4xf32>
    %45 = arith.mulf %30, %44 : vector<16x4xf32>
    %cst_22 = arith.constant 2.48015876E-5 : f32
    %46 = vector.broadcast %cst_22 : f32 to vector<16x4xf32>
    %47 = arith.mulf %31, %46 : vector<16x4xf32>
    %cst_23 = arith.constant -0.00138888892 : f32
    %48 = vector.broadcast %cst_23 : f32 to vector<16x4xf32>
    %49 = arith.addf %48, %47 : vector<16x4xf32>
    %50 = arith.mulf %31, %49 : vector<16x4xf32>
    %cst_24 = arith.constant 0.0416666679 : f32
    %51 = vector.broadcast %cst_24 : f32 to vector<16x4xf32>
    %52 = arith.addf %51, %50 : vector<16x4xf32>
    %53 = arith.mulf %31, %52 : vector<16x4xf32>
    %cst_25 = arith.constant -5.000000e-01 : f32
    %54 = vector.broadcast %cst_25 : f32 to vector<16x4xf32>
    %55 = arith.addf %54, %53 : vector<16x4xf32>
    %56 = arith.mulf %31, %55 : vector<16x4xf32>
    %cst_26 = arith.constant 1.000000e+00 : f32
    %57 = vector.broadcast %cst_26 : f32 to vector<16x4xf32>
    %58 = arith.addf %57, %56 : vector<16x4xf32>
    %cst_27 = arith.constant 2.500000e-01 : f32
    %59 = vector.broadcast %cst_27 : f32 to vector<16x4xf32>
    %60 = arith.mulf %27, %59 : vector<16x4xf32>
    %61 = math.floor %60 : vector<16x4xf32>
    %cst_28 = arith.constant 4.000000e+00 : f32
    %62 = vector.broadcast %cst_28 : f32 to vector<16x4xf32>
    %63 = arith.mulf %62, %61 : vector<16x4xf32>
    %64 = arith.subf %27, %63 : vector<16x4xf32>
    %cst_29 = arith.constant 0.000000e+00 : f32
    %65 = vector.broadcast %cst_29 : f32 to vector<16x4xf32>
    %66 = arith.cmpf oeq, %64, %65 : vector<16x4xf32>
    %cst_30 = arith.constant 1.000000e+00 : f32
    %67 = vector.broadcast %cst_30 : f32 to vector<16x4xf32>
    %68 = arith.cmpf oeq, %64, %67 : vector<16x4xf32>
    %cst_31 = arith.constant 2.000000e+00 : f32
    %69 = vector.broadcast %cst_31 : f32 to vector<16x4xf32>
    %70 = arith.cmpf oeq, %64, %69 : vector<16x4xf32>
    %cst_32 = arith.constant 0.000000e+00 : f32
    %71 = vector.broadcast %cst_32 : f32 to vector<16x4xf32>
    %72 = arith.subf %71, %45 : vector<16x4xf32>
    %cst_33 = arith.constant 0.000000e+00 : f32
    %73 = vector.broadcast %cst_33 : f32 to vector<16x4xf32>
    %74 = arith.subf %73, %58 : vector<16x4xf32>
    %75 = arith.select %70, %72, %74 : vector<16x4xi1>, vector<16x4xf32>
    %76 = arith.select %68, %58, %75 : vector<16x4xi1>, vector<16x4xf32>
    %77 = arith.select %66, %45, %76 : vector<16x4xi1>, vector<16x4xf32>
    %cst_34 = arith.constant 0.000000e+00 : f32
    %78 = vector.broadcast %cst_34 : f32 to vector<16x4xf32>
    %79 = arith.cmpf oeq, %64, %78 : vector<16x4xf32>
    %cst_35 = arith.constant 1.000000e+00 : f32
    %80 = vector.broadcast %cst_35 : f32 to vector<16x4xf32>
    %81 = arith.cmpf oeq, %64, %80 : vector<16x4xf32>
    %cst_36 = arith.constant 0.000000e+00 : f32
    %82 = vector.broadcast %cst_36 : f32 to vector<16x4xf32>
    %83 = arith.subf %82, %45 : vector<16x4xf32>
    %cst_37 = arith.constant 2.000000e+00 : f32
    %84 = vector.broadcast %cst_37 : f32 to vector<16x4xf32>
    %85 = arith.cmpf oeq, %64, %84 : vector<16x4xf32>
    %cst_38 = arith.constant 0.000000e+00 : f32
    %86 = vector.broadcast %cst_38 : f32 to vector<16x4xf32>
    %87 = arith.subf %86, %58 : vector<16x4xf32>
    %88 = arith.select %85, %87, %45 : vector<16x4xi1>, vector<16x4xf32>
    %89 = arith.select %81, %83, %88 : vector<16x4xi1>, vector<16x4xf32>
    %90 = arith.select %79, %58, %89 : vector<16x4xi1>, vector<16x4xf32>
    %c0_39 = arith.constant 0 : index
    %c0_40 = arith.constant 0 : index
    %91 = vector.load %arg6[%c0_39, %c0_40] : memref<4x32xf32, #tpu.memory_space<vmem>>, vector<4x32xf32>
    %cst_41 = arith.constant dense<0.000000e+00> : vector<16x32xf32>
    %92 = tpu.matmul %90, %91, %cst_41 {dimension_numbers = #tpu.dot_dimension_numbers<[1], [0], [0], [1], [0, 0, 1, 1], [], []>} : vector<16x4xf32>, vector<4x32xf32>, vector<16x32xf32> -> vector<16x32xf32>
    %c0_42 = arith.constant 0 : index
    %c0_43 = arith.constant 0 : index
    %93 = vector.load %arg7[%c0_42, %c0_43] : memref<4x32xf32, #tpu.memory_space<vmem>>, vector<4x32xf32>
    %cst_44 = arith.constant dense<0.000000e+00> : vector<16x32xf32>
    %94 = tpu.matmul %77, %93, %cst_44 {dimension_numbers = #tpu.dot_dimension_numbers<[1], [0], [0], [1], [0, 0, 1, 1], [], []>} : vector<16x4xf32>, vector<4x32xf32>, vector<16x32xf32> -> vector<16x32xf32>
    %95 = arith.addf %92, %94 : vector<16x32xf32>
    %c0_45 = arith.constant 0 : index
    %c0_46 = arith.constant 0 : index
    %96 = vector.load %arg8[%c0_45, %c0_46] : memref<1x32xf32, #tpu.memory_space<vmem>>, vector<1x32xf32>
    %97 = vector.broadcast %96 : vector<1x32xf32> to vector<16x32xf32>
    %98 = arith.addf %95, %97 : vector<16x32xf32>
    %cst_47 = arith.constant 1.000000e-01 : f32
    %99 = vector.broadcast %cst_47 : f32 to vector<16x32xf32>
    %100 = arith.mulf %99, %98 : vector<16x32xf32>
    %101 = arith.addf %12, %100 : vector<16x32xf32>
    %c0_48 = arith.constant 0 : index
    %c0_49 = arith.constant 0 : index
    %102 = vector.load %arg9[%c0_48, %c0_49] : memref<1x32xf32, #tpu.memory_space<vmem>>, vector<1x32xf32>
    %c0_50 = arith.constant 0 : index
    %c0_51 = arith.constant 0 : index
    %103 = vector.load %arg10[%c0_50, %c0_51] : memref<1x32xf32, #tpu.memory_space<vmem>>, vector<1x32xf32>
    %cst_52 = arith.constant dense<0.000000e+00> : vector<16xf32>
    %104 = vector.multi_reduction <add>, %101, %cst_52 [1] : vector<16x32xf32> to vector<16xf32>
    %105 = vector.shape_cast %104 : vector<16xf32> to vector<16x1xf32>
    %cst_53 = arith.constant 3.200000e+01 : f32
    %106 = vector.broadcast %cst_53 : f32 to vector<16x1xf32>
    %107 = arith.divf %105, %106 : vector<16x1xf32>
    %108 = vector.broadcast %107 : vector<16x1xf32> to vector<16x32xf32>
    %109 = arith.subf %101, %108 : vector<16x32xf32>
    %110 = arith.mulf %109, %109 : vector<16x32xf32>
    %cst_54 = arith.constant dense<0.000000e+00> : vector<16xf32>
    %111 = vector.multi_reduction <add>, %110, %cst_54 [1] : vector<16x32xf32> to vector<16xf32>
    %112 = vector.shape_cast %111 : vector<16xf32> to vector<16x1xf32>
    %cst_55 = arith.constant 3.200000e+01 : f32
    %113 = vector.broadcast %cst_55 : f32 to vector<16x1xf32>
    %114 = arith.divf %112, %113 : vector<16x1xf32>
    %115 = vector.broadcast %107 : vector<16x1xf32> to vector<16x32xf32>
    %116 = arith.subf %101, %115 : vector<16x32xf32>
    %cst_56 = arith.constant 9.99999974E-6 : f32
    %117 = vector.broadcast %cst_56 : f32 to vector<16x1xf32>
    %118 = arith.addf %114, %117 : vector<16x1xf32>
    %119 = math.sqrt %118 : vector<16x1xf32>
    %120 = vector.broadcast %119 : vector<16x1xf32> to vector<16x32xf32>
    %121 = arith.divf %116, %120 : vector<16x32xf32>
    %122 = vector.broadcast %102 : vector<1x32xf32> to vector<16x32xf32>
    %123 = arith.mulf %121, %122 : vector<16x32xf32>
    %124 = vector.broadcast %103 : vector<1x32xf32> to vector<16x32xf32>
    %125 = arith.addf %123, %124 : vector<16x32xf32>
    %c0_57 = arith.constant 0 : index
    %c0_58 = arith.constant 0 : index
    %126 = vector.load %arg27[%c0_57, %c0_58] : memref<32x32xf32, #tpu.memory_space<vmem>>, vector<32x32xf32>
    %c0_59 = arith.constant 0 : index
    %c0_60 = arith.constant 0 : index
    %c0_61 = arith.constant 0 : index
    %127 = vector.load %arg11[%c0_59, %c0_60, %c0_61] : memref<2x32x96xf32, #tpu.memory_space<vmem>>, vector<1x32x96xf32>
    %128 = vector.shape_cast %127 : vector<1x32x96xf32> to vector<32x96xf32>
    %cst_62 = arith.constant dense<0.000000e+00> : vector<16x96xf32>
    %129 = tpu.matmul %125, %128, %cst_62 {dimension_numbers = #tpu.dot_dimension_numbers<[1], [0], [0], [1], [0, 0, 1, 1], [], []>} : vector<16x32xf32>, vector<32x96xf32>, vector<16x96xf32> -> vector<16x96xf32>
    %c0_63 = arith.constant 0 : index
    %c0_64 = arith.constant 0 : index
    %c0_65 = arith.constant 0 : index
    %130 = vector.load %arg12[%c0_63, %c0_64, %c0_65] : memref<2x1x96xf32, #tpu.memory_space<vmem>>, vector<1x1x96xf32>
    %131 = vector.shape_cast %130 : vector<1x1x96xf32> to vector<1x96xf32>
    %132 = vector.broadcast %131 : vector<1x96xf32> to vector<16x96xf32>
    %133 = arith.addf %129, %132 : vector<16x96xf32>
    %134 = vector.extract_strided_slice %133 {offsets = [0, 0], sizes = [16, 32], strides = [1, 1]} : vector<16x96xf32> to vector<16x32xf32>
    %135 = vector.extract_strided_slice %133 {offsets = [0, 32], sizes = [16, 32], strides = [1, 1]} : vector<16x96xf32> to vector<16x32xf32>
    %136 = vector.extract_strided_slice %133 {offsets = [0, 64], sizes = [16, 32], strides = [1, 1]} : vector<16x96xf32> to vector<16x32xf32>
    %c0_66 = arith.constant 0 : index
    %c0_67 = arith.constant 0 : index
    %c0_68 = arith.constant 0 : index
    %137 = vector.load %arg13[%c0_66, %c0_67, %c0_68] : memref<2x32x32xf32, #tpu.memory_space<vmem>>, vector<1x32x32xf32>
    %138 = vector.shape_cast %137 : vector<1x32x32xf32> to vector<32x32xf32>
    %cst_69 = arith.constant dense<0.000000e+00> : vector<16x32xf32>
    %139 = tpu.matmul %134, %138, %cst_69 {dimension_numbers = #tpu.dot_dimension_numbers<[1], [0], [0], [1], [0, 0, 1, 1], [], []>} : vector<16x32xf32>, vector<32x32xf32>, vector<16x32xf32> -> vector<16x32xf32>
    %c0_70 = arith.constant 0 : index
    %c0_71 = arith.constant 0 : index
    %c0_72 = arith.constant 0 : index
    %140 = vector.load %arg14[%c0_70, %c0_71, %c0_72] : memref<2x1x32xf32, #tpu.memory_space<vmem>>, vector<1x1x32xf32>
    %141 = vector.shape_cast %140 : vector<1x1x32xf32> to vector<1x32xf32>
    %142 = vector.broadcast %141 : vector<1x32xf32> to vector<16x32xf32>
    %143 = arith.addf %139, %142 : vector<16x32xf32>
    %c0_73 = arith.constant 0 : index
    %c0_74 = arith.constant 0 : index
    %c0_75 = arith.constant 0 : index
    %144 = vector.load %arg13[%c0_73, %c0_74, %c0_75] : memref<2x32x32xf32, #tpu.memory_space<vmem>>, vector<1x32x32xf32>
    %145 = vector.shape_cast %144 : vector<1x32x32xf32> to vector<32x32xf32>
    %cst_76 = arith.constant dense<0.000000e+00> : vector<16x32xf32>
    %146 = tpu.matmul %135, %145, %cst_76 {dimension_numbers = #tpu.dot_dimension_numbers<[1], [0], [0], [1], [0, 0, 1, 1], [], []>} : vector<16x32xf32>, vector<32x32xf32>, vector<16x32xf32> -> vector<16x32xf32>
    %c0_77 = arith.constant 0 : index
    %c0_78 = arith.constant 0 : index
    %c0_79 = arith.constant 0 : index
    %147 = vector.load %arg14[%c0_77, %c0_78, %c0_79] : memref<2x1x32xf32, #tpu.memory_space<vmem>>, vector<1x1x32xf32>
    %148 = vector.shape_cast %147 : vector<1x1x32xf32> to vector<1x32xf32>
    %149 = vector.broadcast %148 : vector<1x32xf32> to vector<16x32xf32>
    %150 = arith.addf %146, %149 : vector<16x32xf32>
    %151 = arith.mulf %143, %143 : vector<16x32xf32>
    %cst_80 = arith.constant dense<0.000000e+00> : vector<16x32xf32>
    %152 = tpu.matmul %151, %126, %cst_80 {dimension_numbers = #tpu.dot_dimension_numbers<[1], [0], [0], [1], [0, 0, 1, 1], [], []>} : vector<16x32xf32>, vector<32x32xf32>, vector<16x32xf32> -> vector<16x32xf32>
    %153 = math.sqrt %152 : vector<16x32xf32>
    %cst_81 = arith.constant 9.99999996E-13 : f32
    %154 = vector.broadcast %cst_81 : f32 to vector<16x32xf32>
    %155 = arith.maximumf %153, %154 : vector<16x32xf32>
    %156 = arith.divf %143, %155 : vector<16x32xf32>
    %157 = arith.mulf %150, %150 : vector<16x32xf32>
    %cst_82 = arith.constant dense<0.000000e+00> : vector<16x32xf32>
    %158 = tpu.matmul %157, %126, %cst_82 {dimension_numbers = #tpu.dot_dimension_numbers<[1], [0], [0], [1], [0, 0, 1, 1], [], []>} : vector<16x32xf32>, vector<32x32xf32>, vector<16x32xf32> -> vector<16x32xf32>
    %159 = math.sqrt %158 : vector<16x32xf32>
    %cst_83 = arith.constant 9.99999996E-13 : f32
    %160 = vector.broadcast %cst_83 : f32 to vector<16x32xf32>
    %161 = arith.maximumf %159, %160 : vector<16x32xf32>
    %162 = arith.divf %150, %161 : vector<16x32xf32>
    %cst_84 = arith.constant 0.000000e+00 : f32
    %163 = vector.broadcast %cst_84 : f32 to vector<16x32xf32>
    %cst_85 = arith.constant 0.000000e+00 : f32
    %164 = vector.broadcast %cst_85 : f32 to vector<16x32xf32>
    %c0_86 = arith.constant 0 : index
    %c0_87 = arith.constant 0 : index
    %c0_88 = arith.constant 0 : index
    %165 = vector.load %arg28[%c0_86, %c0_87, %c0_88] : memref<4x16x16xf32, #tpu.memory_space<vmem>>, vector<1x16x16xf32>
    %166 = vector.shape_cast %165 : vector<1x16x16xf32> to vector<16x16xf32>
    %c0_89 = arith.constant 0 : index
    %c0_90 = arith.constant 0 : index
    %c0_91 = arith.constant 0 : index
    %167 = vector.load %arg29[%c0_89, %c0_90, %c0_91] : memref<4x32x32xf32, #tpu.memory_space<vmem>>, vector<1x32x32xf32>
    %168 = vector.shape_cast %167 : vector<1x32x32xf32> to vector<32x32xf32>
    %cst_92 = arith.constant dense<0.000000e+00> : vector<16x32xf32>
    %169 = tpu.matmul %166, %156, %cst_92 {dimension_numbers = #tpu.dot_dimension_numbers<[1], [0], [0], [1], [0, 0, 1, 1], [], []>} : vector<16x16xf32>, vector<16x32xf32>, vector<16x32xf32> -> vector<16x32xf32>
    %cst_93 = arith.constant dense<0.000000e+00> : vector<16x32xf32>
    %170 = tpu.matmul %169, %168, %cst_93 {dimension_numbers = #tpu.dot_dimension_numbers<[1], [0], [0], [1], [0, 0, 1, 1], [], []>} : vector<16x32xf32>, vector<32x32xf32>, vector<16x32xf32> -> vector<16x32xf32>
    %171 = arith.addf %163, %170 : vector<16x32xf32>
    %cst_94 = arith.constant dense<0.000000e+00> : vector<16x32xf32>
    %172 = tpu.matmul %166, %162, %cst_94 {dimension_numbers = #tpu.dot_dimension_numbers<[1], [0], [0], [1], [0, 0, 1, 1], [], []>} : vector<16x16xf32>, vector<16x32xf32>, vector<16x32xf32> -> vector<16x32xf32>
    %cst_95 = arith.constant dense<0.000000e+00> : vector<16x32xf32>
    %173 = tpu.matmul %172, %168, %cst_95 {dimension_numbers = #tpu.dot_dimension_numbers<[1], [0], [0], [1], [0, 0, 1, 1], [], []>} : vector<16x32xf32>, vector<32x32xf32>, vector<16x32xf32> -> vector<16x32xf32>
    %174 = arith.addf %164, %173 : vector<16x32xf32>
    %c1 = arith.constant 1 : index
    %c0_96 = arith.constant 0 : index
    %c0_97 = arith.constant 0 : index
    %175 = vector.load %arg28[%c1, %c0_96, %c0_97] : memref<4x16x16xf32, #tpu.memory_space<vmem>>, vector<1x16x16xf32>
    %176 = vector.shape_cast %175 : vector<1x16x16xf32> to vector<16x16xf32>
    %c1_98 = arith.constant 1 : index
    %c0_99 = arith.constant 0 : index
    %c0_100 = arith.constant 0 : index
    %177 = vector.load %arg29[%c1_98, %c0_99, %c0_100] : memref<4x32x32xf32, #tpu.memory_space<vmem>>, vector<1x32x32xf32>
    %178 = vector.shape_cast %177 : vector<1x32x32xf32> to vector<32x32xf32>
    %cst_101 = arith.constant dense<0.000000e+00> : vector<16x32xf32>
    %179 = tpu.matmul %176, %156, %cst_101 {dimension_numbers = #tpu.dot_dimension_numbers<[1], [0], [0], [1], [0, 0, 1, 1], [], []>} : vector<16x16xf32>, vector<16x32xf32>, vector<16x32xf32> -> vector<16x32xf32>
    %cst_102 = arith.constant dense<0.000000e+00> : vector<16x32xf32>
    %180 = tpu.matmul %179, %178, %cst_102 {dimension_numbers = #tpu.dot_dimension_numbers<[1], [0], [0], [1], [0, 0, 1, 1], [], []>} : vector<16x32xf32>, vector<32x32xf32>, vector<16x32xf32> -> vector<16x32xf32>
    %181 = arith.addf %171, %180 : vector<16x32xf32>
    %cst_103 = arith.constant dense<0.000000e+00> : vector<16x32xf32>
    %182 = tpu.matmul %176, %162, %cst_103 {dimension_numbers = #tpu.dot_dimension_numbers<[1], [0], [0], [1], [0, 0, 1, 1], [], []>} : vector<16x16xf32>, vector<16x32xf32>, vector<16x32xf32> -> vector<16x32xf32>
    %cst_104 = arith.constant dense<0.000000e+00> : vector<16x32xf32>
    %183 = tpu.matmul %182, %178, %cst_104 {dimension_numbers = #tpu.dot_dimension_numbers<[1], [0], [0], [1], [0, 0, 1, 1], [], []>} : vector<16x32xf32>, vector<32x32xf32>, vector<16x32xf32> -> vector<16x32xf32>
    %184 = arith.addf %174, %183 : vector<16x32xf32>
    %c2 = arith.constant 2 : index
    %c0_105 = arith.constant 0 : index
    %c0_106 = arith.constant 0 : index
    %185 = vector.load %arg28[%c2, %c0_105, %c0_106] : memref<4x16x16xf32, #tpu.memory_space<vmem>>, vector<1x16x16xf32>
    %186 = vector.shape_cast %185 : vector<1x16x16xf32> to vector<16x16xf32>
    %c2_107 = arith.constant 2 : index
    %c0_108 = arith.constant 0 : index
    %c0_109 = arith.constant 0 : index
    %187 = vector.load %arg29[%c2_107, %c0_108, %c0_109] : memref<4x32x32xf32, #tpu.memory_space<vmem>>, vector<1x32x32xf32>
    %188 = vector.shape_cast %187 : vector<1x32x32xf32> to vector<32x32xf32>
    %cst_110 = arith.constant dense<0.000000e+00> : vector<16x32xf32>
    %189 = tpu.matmul %186, %156, %cst_110 {dimension_numbers = #tpu.dot_dimension_numbers<[1], [0], [0], [1], [0, 0, 1, 1], [], []>} : vector<16x16xf32>, vector<16x32xf32>, vector<16x32xf32> -> vector<16x32xf32>
    %cst_111 = arith.constant dense<0.000000e+00> : vector<16x32xf32>
    %190 = tpu.matmul %189, %188, %cst_111 {dimension_numbers = #tpu.dot_dimension_numbers<[1], [0], [0], [1], [0, 0, 1, 1], [], []>} : vector<16x32xf32>, vector<32x32xf32>, vector<16x32xf32> -> vector<16x32xf32>
    %191 = arith.addf %181, %190 : vector<16x32xf32>
    %cst_112 = arith.constant dense<0.000000e+00> : vector<16x32xf32>
    %192 = tpu.matmul %186, %162, %cst_112 {dimension_numbers = #tpu.dot_dimension_numbers<[1], [0], [0], [1], [0, 0, 1, 1], [], []>} : vector<16x16xf32>, vector<16x32xf32>, vector<16x32xf32> -> vector<16x32xf32>
    %cst_113 = arith.constant dense<0.000000e+00> : vector<16x32xf32>
    %193 = tpu.matmul %192, %188, %cst_113 {dimension_numbers = #tpu.dot_dimension_numbers<[1], [0], [0], [1], [0, 0, 1, 1], [], []>} : vector<16x32xf32>, vector<32x32xf32>, vector<16x32xf32> -> vector<16x32xf32>
    %194 = arith.addf %184, %193 : vector<16x32xf32>
    %c3 = arith.constant 3 : index
    %c0_114 = arith.constant 0 : index
    %c0_115 = arith.constant 0 : index
    %195 = vector.load %arg28[%c3, %c0_114, %c0_115] : memref<4x16x16xf32, #tpu.memory_space<vmem>>, vector<1x16x16xf32>
    %196 = vector.shape_cast %195 : vector<1x16x16xf32> to vector<16x16xf32>
    %c3_116 = arith.constant 3 : index
    %c0_117 = arith.constant 0 : index
    %c0_118 = arith.constant 0 : index
    %197 = vector.load %arg29[%c3_116, %c0_117, %c0_118] : memref<4x32x32xf32, #tpu.memory_space<vmem>>, vector<1x32x32xf32>
    %198 = vector.shape_cast %197 : vector<1x32x32xf32> to vector<32x32xf32>
    %cst_119 = arith.constant dense<0.000000e+00> : vector<16x32xf32>
    %199 = tpu.matmul %196, %156, %cst_119 {dimension_numbers = #tpu.dot_dimension_numbers<[1], [0], [0], [1], [0, 0, 1, 1], [], []>} : vector<16x16xf32>, vector<16x32xf32>, vector<16x32xf32> -> vector<16x32xf32>
    %cst_120 = arith.constant dense<0.000000e+00> : vector<16x32xf32>
    %200 = tpu.matmul %199, %198, %cst_120 {dimension_numbers = #tpu.dot_dimension_numbers<[1], [0], [0], [1], [0, 0, 1, 1], [], []>} : vector<16x32xf32>, vector<32x32xf32>, vector<16x32xf32> -> vector<16x32xf32>
    %201 = arith.addf %191, %200 : vector<16x32xf32>
    %cst_121 = arith.constant dense<0.000000e+00> : vector<16x32xf32>
    %202 = tpu.matmul %196, %162, %cst_121 {dimension_numbers = #tpu.dot_dimension_numbers<[1], [0], [0], [1], [0, 0, 1, 1], [], []>} : vector<16x16xf32>, vector<16x32xf32>, vector<16x32xf32> -> vector<16x32xf32>
    %cst_122 = arith.constant dense<0.000000e+00> : vector<16x32xf32>
    %203 = tpu.matmul %202, %198, %cst_122 {dimension_numbers = #tpu.dot_dimension_numbers<[1], [0], [0], [1], [0, 0, 1, 1], [], []>} : vector<16x32xf32>, vector<32x32xf32>, vector<16x32xf32> -> vector<16x32xf32>
    %204 = arith.addf %194, %203 : vector<16x32xf32>
    %cst_123 = arith.constant 0.176776692 : f32
    %205 = vector.broadcast %cst_123 : f32 to vector<16x32xf32>
    %206 = arith.mulf %134, %205 : vector<16x32xf32>
    %cst_124 = arith.constant 1.250000e-01 : f32
    %207 = vector.broadcast %cst_124 : f32 to vector<16x32xf32>
    %208 = arith.mulf %201, %207 : vector<16x32xf32>
    %209 = vector.extract_strided_slice %206 {offsets = [0, 0], sizes = [8, 8], strides = [1, 1]} : vector<16x32xf32> to vector<8x8xf32>
    %210 = vector.extract_strided_slice %135 {offsets = [0, 0], sizes = [8, 8], strides = [1, 1]} : vector<16x32xf32> to vector<8x8xf32>
    %211 = vector.extract_strided_slice %136 {offsets = [0, 0], sizes = [8, 8], strides = [1, 1]} : vector<16x32xf32> to vector<8x8xf32>
    %212 = vector.extract_strided_slice %208 {offsets = [0, 0], sizes = [8, 8], strides = [1, 1]} : vector<16x32xf32> to vector<8x8xf32>
    %213 = vector.extract_strided_slice %204 {offsets = [0, 0], sizes = [8, 8], strides = [1, 1]} : vector<16x32xf32> to vector<8x8xf32>
    %cst_125 = arith.constant dense<0.000000e+00> : vector<8x8xf32>
    %214 = tpu.matmul %209, %210, %cst_125 {dimension_numbers = #tpu.dot_dimension_numbers<[1], [1], [0], [0], [0, 0, 1, 0], [], []>} : vector<8x8xf32>, vector<8x8xf32>, vector<8x8xf32> -> vector<8x8xf32>
    %cst_126 = arith.constant dense<0.000000e+00> : vector<8x8xf32>
    %215 = tpu.matmul %212, %213, %cst_126 {dimension_numbers = #tpu.dot_dimension_numbers<[1], [1], [0], [0], [0, 0, 1, 0], [], []>} : vector<8x8xf32>, vector<8x8xf32>, vector<8x8xf32> -> vector<8x8xf32>
    %216 = arith.addf %214, %215 : vector<8x8xf32>
    %cst_127 = arith.constant dense<0xFF800000> : vector<8xf32>
    %217 = vector.multi_reduction <maximumf>, %216, %cst_127 [1] : vector<8x8xf32> to vector<8xf32>
    %218 = vector.shape_cast %217 : vector<8xf32> to vector<8x1xf32>
    %219 = vector.broadcast %218 : vector<8x1xf32> to vector<8x8xf32>
    %220 = arith.subf %216, %219 : vector<8x8xf32>
    %221 = math.exp %220 : vector<8x8xf32>
    %cst_128 = arith.constant dense<0.000000e+00> : vector<8xf32>
    %222 = vector.multi_reduction <add>, %221, %cst_128 [1] : vector<8x8xf32> to vector<8xf32>
    %223 = vector.shape_cast %222 : vector<8xf32> to vector<8x1xf32>
    %224 = vector.broadcast %223 : vector<8x1xf32> to vector<8x8xf32>
    %225 = arith.divf %221, %224 : vector<8x8xf32>
    %cst_129 = arith.constant dense<0.000000e+00> : vector<8x8xf32>
    %226 = tpu.matmul %225, %211, %cst_129 {dimension_numbers = #tpu.dot_dimension_numbers<[1], [0], [0], [1], [0, 0, 1, 1], [], []>} : vector<8x8xf32>, vector<8x8xf32>, vector<8x8xf32> -> vector<8x8xf32>
    %227 = vector.extract_strided_slice %206 {offsets = [0, 8], sizes = [8, 8], strides = [1, 1]} : vector<16x32xf32> to vector<8x8xf32>
    %228 = vector.extract_strided_slice %135 {offsets = [0, 8], sizes = [8, 8], strides = [1, 1]} : vector<16x32xf32> to vector<8x8xf32>
    %229 = vector.extract_strided_slice %136 {offsets = [0, 8], sizes = [8, 8], strides = [1, 1]} : vector<16x32xf32> to vector<8x8xf32>
    %230 = vector.extract_strided_slice %208 {offsets = [0, 8], sizes = [8, 8], strides = [1, 1]} : vector<16x32xf32> to vector<8x8xf32>
    %231 = vector.extract_strided_slice %204 {offsets = [0, 8], sizes = [8, 8], strides = [1, 1]} : vector<16x32xf32> to vector<8x8xf32>
    %cst_130 = arith.constant dense<0.000000e+00> : vector<8x8xf32>
    %232 = tpu.matmul %227, %228, %cst_130 {dimension_numbers = #tpu.dot_dimension_numbers<[1], [1], [0], [0], [0, 0, 1, 0], [], []>} : vector<8x8xf32>, vector<8x8xf32>, vector<8x8xf32> -> vector<8x8xf32>
    %cst_131 = arith.constant dense<0.000000e+00> : vector<8x8xf32>
    %233 = tpu.matmul %230, %231, %cst_131 {dimension_numbers = #tpu.dot_dimension_numbers<[1], [1], [0], [0], [0, 0, 1, 0], [], []>} : vector<8x8xf32>, vector<8x8xf32>, vector<8x8xf32> -> vector<8x8xf32>
    %234 = arith.addf %232, %233 : vector<8x8xf32>
    %cst_132 = arith.constant dense<0xFF800000> : vector<8xf32>
    %235 = vector.multi_reduction <maximumf>, %234, %cst_132 [1] : vector<8x8xf32> to vector<8xf32>
    %236 = vector.shape_cast %235 : vector<8xf32> to vector<8x1xf32>
    %237 = vector.broadcast %236 : vector<8x1xf32> to vector<8x8xf32>
    %238 = arith.subf %234, %237 : vector<8x8xf32>
    %239 = math.exp %238 : vector<8x8xf32>
    %cst_133 = arith.constant dense<0.000000e+00> : vector<8xf32>
    %240 = vector.multi_reduction <add>, %239, %cst_133 [1] : vector<8x8xf32> to vector<8xf32>
    %241 = vector.shape_cast %240 : vector<8xf32> to vector<8x1xf32>
    %242 = vector.broadcast %241 : vector<8x1xf32> to vector<8x8xf32>
    %243 = arith.divf %239, %242 : vector<8x8xf32>
    %cst_134 = arith.constant dense<0.000000e+00> : vector<8x8xf32>
    %244 = tpu.matmul %243, %229, %cst_134 {dimension_numbers = #tpu.dot_dimension_numbers<[1], [0], [0], [1], [0, 0, 1, 1], [], []>} : vector<8x8xf32>, vector<8x8xf32>, vector<8x8xf32> -> vector<8x8xf32>
    %245 = vector.extract_strided_slice %206 {offsets = [0, 16], sizes = [8, 8], strides = [1, 1]} : vector<16x32xf32> to vector<8x8xf32>
    %246 = vector.extract_strided_slice %135 {offsets = [0, 16], sizes = [8, 8], strides = [1, 1]} : vector<16x32xf32> to vector<8x8xf32>
    %247 = vector.extract_strided_slice %136 {offsets = [0, 16], sizes = [8, 8], strides = [1, 1]} : vector<16x32xf32> to vector<8x8xf32>
    %248 = vector.extract_strided_slice %208 {offsets = [0, 16], sizes = [8, 8], strides = [1, 1]} : vector<16x32xf32> to vector<8x8xf32>
    %249 = vector.extract_strided_slice %204 {offsets = [0, 16], sizes = [8, 8], strides = [1, 1]} : vector<16x32xf32> to vector<8x8xf32>
    %cst_135 = arith.constant dense<0.000000e+00> : vector<8x8xf32>
    %250 = tpu.matmul %245, %246, %cst_135 {dimension_numbers = #tpu.dot_dimension_numbers<[1], [1], [0], [0], [0, 0, 1, 0], [], []>} : vector<8x8xf32>, vector<8x8xf32>, vector<8x8xf32> -> vector<8x8xf32>
    %cst_136 = arith.constant dense<0.000000e+00> : vector<8x8xf32>
    %251 = tpu.matmul %248, %249, %cst_136 {dimension_numbers = #tpu.dot_dimension_numbers<[1], [1], [0], [0], [0, 0, 1, 0], [], []>} : vector<8x8xf32>, vector<8x8xf32>, vector<8x8xf32> -> vector<8x8xf32>
    %252 = arith.addf %250, %251 : vector<8x8xf32>
    %cst_137 = arith.constant dense<0xFF800000> : vector<8xf32>
    %253 = vector.multi_reduction <maximumf>, %252, %cst_137 [1] : vector<8x8xf32> to vector<8xf32>
    %254 = vector.shape_cast %253 : vector<8xf32> to vector<8x1xf32>
    %255 = vector.broadcast %254 : vector<8x1xf32> to vector<8x8xf32>
    %256 = arith.subf %252, %255 : vector<8x8xf32>
    %257 = math.exp %256 : vector<8x8xf32>
    %cst_138 = arith.constant dense<0.000000e+00> : vector<8xf32>
    %258 = vector.multi_reduction <add>, %257, %cst_138 [1] : vector<8x8xf32> to vector<8xf32>
    %259 = vector.shape_cast %258 : vector<8xf32> to vector<8x1xf32>
    %260 = vector.broadcast %259 : vector<8x1xf32> to vector<8x8xf32>
    %261 = arith.divf %257, %260 : vector<8x8xf32>
    %cst_139 = arith.constant dense<0.000000e+00> : vector<8x8xf32>
    %262 = tpu.matmul %261, %247, %cst_139 {dimension_numbers = #tpu.dot_dimension_numbers<[1], [0], [0], [1], [0, 0, 1, 1], [], []>} : vector<8x8xf32>, vector<8x8xf32>, vector<8x8xf32> -> vector<8x8xf32>
    %263 = vector.extract_strided_slice %206 {offsets = [0, 24], sizes = [8, 8], strides = [1, 1]} : vector<16x32xf32> to vector<8x8xf32>
    %264 = vector.extract_strided_slice %135 {offsets = [0, 24], sizes = [8, 8], strides = [1, 1]} : vector<16x32xf32> to vector<8x8xf32>
    %265 = vector.extract_strided_slice %136 {offsets = [0, 24], sizes = [8, 8], strides = [1, 1]} : vector<16x32xf32> to vector<8x8xf32>
    %266 = vector.extract_strided_slice %208 {offsets = [0, 24], sizes = [8, 8], strides = [1, 1]} : vector<16x32xf32> to vector<8x8xf32>
    %267 = vector.extract_strided_slice %204 {offsets = [0, 24], sizes = [8, 8], strides = [1, 1]} : vector<16x32xf32> to vector<8x8xf32>
    %cst_140 = arith.constant dense<0.000000e+00> : vector<8x8xf32>
    %268 = tpu.matmul %263, %264, %cst_140 {dimension_numbers = #tpu.dot_dimension_numbers<[1], [1], [0], [0], [0, 0, 1, 0], [], []>} : vector<8x8xf32>, vector<8x8xf32>, vector<8x8xf32> -> vector<8x8xf32>
    %cst_141 = arith.constant dense<0.000000e+00> : vector<8x8xf32>
    %269 = tpu.matmul %266, %267, %cst_141 {dimension_numbers = #tpu.dot_dimension_numbers<[1], [1], [0], [0], [0, 0, 1, 0], [], []>} : vector<8x8xf32>, vector<8x8xf32>, vector<8x8xf32> -> vector<8x8xf32>
    %270 = arith.addf %268, %269 : vector<8x8xf32>
    %cst_142 = arith.constant dense<0xFF800000> : vector<8xf32>
    %271 = vector.multi_reduction <maximumf>, %270, %cst_142 [1] : vector<8x8xf32> to vector<8xf32>
    %272 = vector.shape_cast %271 : vector<8xf32> to vector<8x1xf32>
    %273 = vector.broadcast %272 : vector<8x1xf32> to vector<8x8xf32>
    %274 = arith.subf %270, %273 : vector<8x8xf32>
    %275 = math.exp %274 : vector<8x8xf32>
    %cst_143 = arith.constant dense<0.000000e+00> : vector<8xf32>
    %276 = vector.multi_reduction <add>, %275, %cst_143 [1] : vector<8x8xf32> to vector<8xf32>
    %277 = vector.shape_cast %276 : vector<8xf32> to vector<8x1xf32>
    %278 = vector.broadcast %277 : vector<8x1xf32> to vector<8x8xf32>
    %279 = arith.divf %275, %278 : vector<8x8xf32>
    %cst_144 = arith.constant dense<0.000000e+00> : vector<8x8xf32>
    %280 = tpu.matmul %279, %265, %cst_144 {dimension_numbers = #tpu.dot_dimension_numbers<[1], [0], [0], [1], [0, 0, 1, 1], [], []>} : vector<8x8xf32>, vector<8x8xf32>, vector<8x8xf32> -> vector<8x8xf32>
    %281 = tpu.concatenate %226, %244, %262, %280 in 1 : vector<8x8xf32>, vector<8x8xf32>, vector<8x8xf32>, vector<8x8xf32> -> vector<8x32xf32>
    %282 = vector.extract_strided_slice %206 {offsets = [8, 0], sizes = [8, 8], strides = [1, 1]} : vector<16x32xf32> to vector<8x8xf32>
    %283 = vector.extract_strided_slice %135 {offsets = [8, 0], sizes = [8, 8], strides = [1, 1]} : vector<16x32xf32> to vector<8x8xf32>
    %284 = vector.extract_strided_slice %136 {offsets = [8, 0], sizes = [8, 8], strides = [1, 1]} : vector<16x32xf32> to vector<8x8xf32>
    %285 = vector.extract_strided_slice %208 {offsets = [8, 0], sizes = [8, 8], strides = [1, 1]} : vector<16x32xf32> to vector<8x8xf32>
    %286 = vector.extract_strided_slice %204 {offsets = [8, 0], sizes = [8, 8], strides = [1, 1]} : vector<16x32xf32> to vector<8x8xf32>
    %cst_145 = arith.constant dense<0.000000e+00> : vector<8x8xf32>
    %287 = tpu.matmul %282, %283, %cst_145 {dimension_numbers = #tpu.dot_dimension_numbers<[1], [1], [0], [0], [0, 0, 1, 0], [], []>} : vector<8x8xf32>, vector<8x8xf32>, vector<8x8xf32> -> vector<8x8xf32>
    %cst_146 = arith.constant dense<0.000000e+00> : vector<8x8xf32>
    %288 = tpu.matmul %285, %286, %cst_146 {dimension_numbers = #tpu.dot_dimension_numbers<[1], [1], [0], [0], [0, 0, 1, 0], [], []>} : vector<8x8xf32>, vector<8x8xf32>, vector<8x8xf32> -> vector<8x8xf32>
    %289 = arith.addf %287, %288 : vector<8x8xf32>
    %cst_147 = arith.constant dense<0xFF800000> : vector<8xf32>
    %290 = vector.multi_reduction <maximumf>, %289, %cst_147 [1] : vector<8x8xf32> to vector<8xf32>
    %291 = vector.shape_cast %290 : vector<8xf32> to vector<8x1xf32>
    %292 = vector.broadcast %291 : vector<8x1xf32> to vector<8x8xf32>
    %293 = arith.subf %289, %292 : vector<8x8xf32>
    %294 = math.exp %293 : vector<8x8xf32>
    %cst_148 = arith.constant dense<0.000000e+00> : vector<8xf32>
    %295 = vector.multi_reduction <add>, %294, %cst_148 [1] : vector<8x8xf32> to vector<8xf32>
    %296 = vector.shape_cast %295 : vector<8xf32> to vector<8x1xf32>
    %297 = vector.broadcast %296 : vector<8x1xf32> to vector<8x8xf32>
    %298 = arith.divf %294, %297 : vector<8x8xf32>
    %cst_149 = arith.constant dense<0.000000e+00> : vector<8x8xf32>
    %299 = tpu.matmul %298, %284, %cst_149 {dimension_numbers = #tpu.dot_dimension_numbers<[1], [0], [0], [1], [0, 0, 1, 1], [], []>} : vector<8x8xf32>, vector<8x8xf32>, vector<8x8xf32> -> vector<8x8xf32>
    %300 = vector.extract_strided_slice %206 {offsets = [8, 8], sizes = [8, 8], strides = [1, 1]} : vector<16x32xf32> to vector<8x8xf32>
    %301 = vector.extract_strided_slice %135 {offsets = [8, 8], sizes = [8, 8], strides = [1, 1]} : vector<16x32xf32> to vector<8x8xf32>
    %302 = vector.extract_strided_slice %136 {offsets = [8, 8], sizes = [8, 8], strides = [1, 1]} : vector<16x32xf32> to vector<8x8xf32>
    %303 = vector.extract_strided_slice %208 {offsets = [8, 8], sizes = [8, 8], strides = [1, 1]} : vector<16x32xf32> to vector<8x8xf32>
    %304 = vector.extract_strided_slice %204 {offsets = [8, 8], sizes = [8, 8], strides = [1, 1]} : vector<16x32xf32> to vector<8x8xf32>
    %cst_150 = arith.constant dense<0.000000e+00> : vector<8x8xf32>
    %305 = tpu.matmul %300, %301, %cst_150 {dimension_numbers = #tpu.dot_dimension_numbers<[1], [1], [0], [0], [0, 0, 1, 0], [], []>} : vector<8x8xf32>, vector<8x8xf32>, vector<8x8xf32> -> vector<8x8xf32>
    %cst_151 = arith.constant dense<0.000000e+00> : vector<8x8xf32>
    %306 = tpu.matmul %303, %304, %cst_151 {dimension_numbers = #tpu.dot_dimension_numbers<[1], [1], [0], [0], [0, 0, 1, 0], [], []>} : vector<8x8xf32>, vector<8x8xf32>, vector<8x8xf32> -> vector<8x8xf32>
    %307 = arith.addf %305, %306 : vector<8x8xf32>
    %cst_152 = arith.constant dense<0xFF800000> : vector<8xf32>
    %308 = vector.multi_reduction <maximumf>, %307, %cst_152 [1] : vector<8x8xf32> to vector<8xf32>
    %309 = vector.shape_cast %308 : vector<8xf32> to vector<8x1xf32>
    %310 = vector.broadcast %309 : vector<8x1xf32> to vector<8x8xf32>
    %311 = arith.subf %307, %310 : vector<8x8xf32>
    %312 = math.exp %311 : vector<8x8xf32>
    %cst_153 = arith.constant dense<0.000000e+00> : vector<8xf32>
    %313 = vector.multi_reduction <add>, %312, %cst_153 [1] : vector<8x8xf32> to vector<8xf32>
    %314 = vector.shape_cast %313 : vector<8xf32> to vector<8x1xf32>
    %315 = vector.broadcast %314 : vector<8x1xf32> to vector<8x8xf32>
    %316 = arith.divf %312, %315 : vector<8x8xf32>
    %cst_154 = arith.constant dense<0.000000e+00> : vector<8x8xf32>
    %317 = tpu.matmul %316, %302, %cst_154 {dimension_numbers = #tpu.dot_dimension_numbers<[1], [0], [0], [1], [0, 0, 1, 1], [], []>} : vector<8x8xf32>, vector<8x8xf32>, vector<8x8xf32> -> vector<8x8xf32>
    %318 = vector.extract_strided_slice %206 {offsets = [8, 16], sizes = [8, 8], strides = [1, 1]} : vector<16x32xf32> to vector<8x8xf32>
    %319 = vector.extract_strided_slice %135 {offsets = [8, 16], sizes = [8, 8], strides = [1, 1]} : vector<16x32xf32> to vector<8x8xf32>
    %320 = vector.extract_strided_slice %136 {offsets = [8, 16], sizes = [8, 8], strides = [1, 1]} : vector<16x32xf32> to vector<8x8xf32>
    %321 = vector.extract_strided_slice %208 {offsets = [8, 16], sizes = [8, 8], strides = [1, 1]} : vector<16x32xf32> to vector<8x8xf32>
    %322 = vector.extract_strided_slice %204 {offsets = [8, 16], sizes = [8, 8], strides = [1, 1]} : vector<16x32xf32> to vector<8x8xf32>
    %cst_155 = arith.constant dense<0.000000e+00> : vector<8x8xf32>
    %323 = tpu.matmul %318, %319, %cst_155 {dimension_numbers = #tpu.dot_dimension_numbers<[1], [1], [0], [0], [0, 0, 1, 0], [], []>} : vector<8x8xf32>, vector<8x8xf32>, vector<8x8xf32> -> vector<8x8xf32>
    %cst_156 = arith.constant dense<0.000000e+00> : vector<8x8xf32>
    %324 = tpu.matmul %321, %322, %cst_156 {dimension_numbers = #tpu.dot_dimension_numbers<[1], [1], [0], [0], [0, 0, 1, 0], [], []>} : vector<8x8xf32>, vector<8x8xf32>, vector<8x8xf32> -> vector<8x8xf32>
    %325 = arith.addf %323, %324 : vector<8x8xf32>
    %cst_157 = arith.constant dense<0xFF800000> : vector<8xf32>
    %326 = vector.multi_reduction <maximumf>, %325, %cst_157 [1] : vector<8x8xf32> to vector<8xf32>
    %327 = vector.shape_cast %326 : vector<8xf32> to vector<8x1xf32>
    %328 = vector.broadcast %327 : vector<8x1xf32> to vector<8x8xf32>
    %329 = arith.subf %325, %328 : vector<8x8xf32>
    %330 = math.exp %329 : vector<8x8xf32>
    %cst_158 = arith.constant dense<0.000000e+00> : vector<8xf32>
    %331 = vector.multi_reduction <add>, %330, %cst_158 [1] : vector<8x8xf32> to vector<8xf32>
    %332 = vector.shape_cast %331 : vector<8xf32> to vector<8x1xf32>
    %333 = vector.broadcast %332 : vector<8x1xf32> to vector<8x8xf32>
    %334 = arith.divf %330, %333 : vector<8x8xf32>
    %cst_159 = arith.constant dense<0.000000e+00> : vector<8x8xf32>
    %335 = tpu.matmul %334, %320, %cst_159 {dimension_numbers = #tpu.dot_dimension_numbers<[1], [0], [0], [1], [0, 0, 1, 1], [], []>} : vector<8x8xf32>, vector<8x8xf32>, vector<8x8xf32> -> vector<8x8xf32>
    %336 = vector.extract_strided_slice %206 {offsets = [8, 24], sizes = [8, 8], strides = [1, 1]} : vector<16x32xf32> to vector<8x8xf32>
    %337 = vector.extract_strided_slice %135 {offsets = [8, 24], sizes = [8, 8], strides = [1, 1]} : vector<16x32xf32> to vector<8x8xf32>
    %338 = vector.extract_strided_slice %136 {offsets = [8, 24], sizes = [8, 8], strides = [1, 1]} : vector<16x32xf32> to vector<8x8xf32>
    %339 = vector.extract_strided_slice %208 {offsets = [8, 24], sizes = [8, 8], strides = [1, 1]} : vector<16x32xf32> to vector<8x8xf32>
    %340 = vector.extract_strided_slice %204 {offsets = [8, 24], sizes = [8, 8], strides = [1, 1]} : vector<16x32xf32> to vector<8x8xf32>
    %cst_160 = arith.constant dense<0.000000e+00> : vector<8x8xf32>
    %341 = tpu.matmul %336, %337, %cst_160 {dimension_numbers = #tpu.dot_dimension_numbers<[1], [1], [0], [0], [0, 0, 1, 0], [], []>} : vector<8x8xf32>, vector<8x8xf32>, vector<8x8xf32> -> vector<8x8xf32>
    %cst_161 = arith.constant dense<0.000000e+00> : vector<8x8xf32>
    %342 = tpu.matmul %339, %340, %cst_161 {dimension_numbers = #tpu.dot_dimension_numbers<[1], [1], [0], [0], [0, 0, 1, 0], [], []>} : vector<8x8xf32>, vector<8x8xf32>, vector<8x8xf32> -> vector<8x8xf32>
    %343 = arith.addf %341, %342 : vector<8x8xf32>
    %cst_162 = arith.constant dense<0xFF800000> : vector<8xf32>
    %344 = vector.multi_reduction <maximumf>, %343, %cst_162 [1] : vector<8x8xf32> to vector<8xf32>
    %345 = vector.shape_cast %344 : vector<8xf32> to vector<8x1xf32>
    %346 = vector.broadcast %345 : vector<8x1xf32> to vector<8x8xf32>
    %347 = arith.subf %343, %346 : vector<8x8xf32>
    %348 = math.exp %347 : vector<8x8xf32>
    %cst_163 = arith.constant dense<0.000000e+00> : vector<8xf32>
    %349 = vector.multi_reduction <add>, %348, %cst_163 [1] : vector<8x8xf32> to vector<8xf32>
    %350 = vector.shape_cast %349 : vector<8xf32> to vector<8x1xf32>
    %351 = vector.broadcast %350 : vector<8x1xf32> to vector<8x8xf32>
    %352 = arith.divf %348, %351 : vector<8x8xf32>
    %cst_164 = arith.constant dense<0.000000e+00> : vector<8x8xf32>
    %353 = tpu.matmul %352, %338, %cst_164 {dimension_numbers = #tpu.dot_dimension_numbers<[1], [0], [0], [1], [0, 0, 1, 1], [], []>} : vector<8x8xf32>, vector<8x8xf32>, vector<8x8xf32> -> vector<8x8xf32>
    %354 = tpu.concatenate %299, %317, %335, %353 in 1 : vector<8x8xf32>, vector<8x8xf32>, vector<8x8xf32>, vector<8x8xf32> -> vector<8x32xf32>
    %355 = tpu.concatenate %281, %354 in 0 : vector<8x32xf32>, vector<8x32xf32> -> vector<16x32xf32>
    %c0_165 = arith.constant 0 : index
    %c0_166 = arith.constant 0 : index
    %c0_167 = arith.constant 0 : index
    %356 = vector.load %arg15[%c0_165, %c0_166, %c0_167] : memref<2x32x32xf32, #tpu.memory_space<vmem>>, vector<1x32x32xf32>
    %357 = vector.shape_cast %356 : vector<1x32x32xf32> to vector<32x32xf32>
    %cst_168 = arith.constant dense<0.000000e+00> : vector<16x32xf32>
    %358 = tpu.matmul %355, %357, %cst_168 {dimension_numbers = #tpu.dot_dimension_numbers<[1], [0], [0], [1], [0, 0, 1, 1], [], []>} : vector<16x32xf32>, vector<32x32xf32>, vector<16x32xf32> -> vector<16x32xf32>
    %c0_169 = arith.constant 0 : index
    %c0_170 = arith.constant 0 : index
    %c0_171 = arith.constant 0 : index
    %359 = vector.load %arg16[%c0_169, %c0_170, %c0_171] : memref<2x1x32xf32, #tpu.memory_space<vmem>>, vector<1x1x32xf32>
    %360 = vector.shape_cast %359 : vector<1x1x32xf32> to vector<1x32xf32>
    %361 = vector.broadcast %360 : vector<1x32xf32> to vector<16x32xf32>
    %362 = arith.addf %358, %361 : vector<16x32xf32>
    %363 = arith.addf %125, %362 : vector<16x32xf32>
    %c0_172 = arith.constant 0 : index
    %c0_173 = arith.constant 0 : index
    %c0_174 = arith.constant 0 : index
    %364 = vector.load %arg17[%c0_172, %c0_173, %c0_174] : memref<2x1x32xf32, #tpu.memory_space<vmem>>, vector<1x1x32xf32>
    %365 = vector.shape_cast %364 : vector<1x1x32xf32> to vector<1x32xf32>
    %c0_175 = arith.constant 0 : index
    %c0_176 = arith.constant 0 : index
    %c0_177 = arith.constant 0 : index
    %366 = vector.load %arg18[%c0_175, %c0_176, %c0_177] : memref<2x1x32xf32, #tpu.memory_space<vmem>>, vector<1x1x32xf32>
    %367 = vector.shape_cast %366 : vector<1x1x32xf32> to vector<1x32xf32>
    %cst_178 = arith.constant dense<0.000000e+00> : vector<16xf32>
    %368 = vector.multi_reduction <add>, %363, %cst_178 [1] : vector<16x32xf32> to vector<16xf32>
    %369 = vector.shape_cast %368 : vector<16xf32> to vector<16x1xf32>
    %cst_179 = arith.constant 3.200000e+01 : f32
    %370 = vector.broadcast %cst_179 : f32 to vector<16x1xf32>
    %371 = arith.divf %369, %370 : vector<16x1xf32>
    %372 = vector.broadcast %371 : vector<16x1xf32> to vector<16x32xf32>
    %373 = arith.subf %363, %372 : vector<16x32xf32>
    %374 = arith.mulf %373, %373 : vector<16x32xf32>
    %cst_180 = arith.constant dense<0.000000e+00> : vector<16xf32>
    %375 = vector.multi_reduction <add>, %374, %cst_180 [1] : vector<16x32xf32> to vector<16xf32>
    %376 = vector.shape_cast %375 : vector<16xf32> to vector<16x1xf32>
    %cst_181 = arith.constant 3.200000e+01 : f32
    %377 = vector.broadcast %cst_181 : f32 to vector<16x1xf32>
    %378 = arith.divf %376, %377 : vector<16x1xf32>
    %379 = vector.broadcast %371 : vector<16x1xf32> to vector<16x32xf32>
    %380 = arith.subf %363, %379 : vector<16x32xf32>
    %cst_182 = arith.constant 9.99999974E-6 : f32
    %381 = vector.broadcast %cst_182 : f32 to vector<16x1xf32>
    %382 = arith.addf %378, %381 : vector<16x1xf32>
    %383 = math.sqrt %382 : vector<16x1xf32>
    %384 = vector.broadcast %383 : vector<16x1xf32> to vector<16x32xf32>
    %385 = arith.divf %380, %384 : vector<16x32xf32>
    %386 = vector.broadcast %365 : vector<1x32xf32> to vector<16x32xf32>
    %387 = arith.mulf %385, %386 : vector<16x32xf32>
    %388 = vector.broadcast %367 : vector<1x32xf32> to vector<16x32xf32>
    %389 = arith.addf %387, %388 : vector<16x32xf32>
    %c0_183 = arith.constant 0 : index
    %c0_184 = arith.constant 0 : index
    %c0_185 = arith.constant 0 : index
    %390 = vector.load %arg19[%c0_183, %c0_184, %c0_185] : memref<2x32x64xf32, #tpu.memory_space<vmem>>, vector<1x32x64xf32>
    %391 = vector.shape_cast %390 : vector<1x32x64xf32> to vector<32x64xf32>
    %cst_186 = arith.constant dense<0.000000e+00> : vector<16x64xf32>
    %392 = tpu.matmul %389, %391, %cst_186 {dimension_numbers = #tpu.dot_dimension_numbers<[1], [0], [0], [1], [0, 0, 1, 1], [], []>} : vector<16x32xf32>, vector<32x64xf32>, vector<16x64xf32> -> vector<16x64xf32>
    %c0_187 = arith.constant 0 : index
    %c0_188 = arith.constant 0 : index
    %c0_189 = arith.constant 0 : index
    %393 = vector.load %arg20[%c0_187, %c0_188, %c0_189] : memref<2x1x64xf32, #tpu.memory_space<vmem>>, vector<1x1x64xf32>
    %394 = vector.shape_cast %393 : vector<1x1x64xf32> to vector<1x64xf32>
    %395 = vector.broadcast %394 : vector<1x64xf32> to vector<16x64xf32>
    %396 = arith.addf %392, %395 : vector<16x64xf32>
    %cst_190 = arith.constant 5.000000e-01 : f32
    %397 = vector.broadcast %cst_190 : f32 to vector<16x64xf32>
    %398 = arith.mulf %397, %396 : vector<16x64xf32>
    %cst_191 = arith.constant 0.707106769 : f32
    %399 = vector.broadcast %cst_191 : f32 to vector<16x64xf32>
    %400 = arith.mulf %396, %399 : vector<16x64xf32>
    %cst_192 = arith.constant 0.000000e+00 : f32
    %401 = vector.broadcast %cst_192 : f32 to vector<16x64xf32>
    %402 = arith.cmpf olt, %400, %401 : vector<16x64xf32>
    %cst_193 = arith.constant -1.000000e+00 : f32
    %cst_194 = arith.constant 1.000000e+00 : f32
    %403 = vector.broadcast %cst_193 : f32 to vector<16x64xf32>
    %404 = vector.broadcast %cst_194 : f32 to vector<16x64xf32>
    %405 = arith.select %402, %403, %404 : vector<16x64xi1>, vector<16x64xf32>
    %406 = math.absf %400 : vector<16x64xf32>
    %cst_195 = arith.constant 0.327591091 : f32
    %407 = vector.broadcast %cst_195 : f32 to vector<16x64xf32>
    %408 = arith.mulf %407, %406 : vector<16x64xf32>
    %cst_196 = arith.constant 1.000000e+00 : f32
    %409 = vector.broadcast %cst_196 : f32 to vector<16x64xf32>
    %410 = arith.addf %409, %408 : vector<16x64xf32>
    %cst_197 = arith.constant 1.000000e+00 : f32
    %411 = vector.broadcast %cst_197 : f32 to vector<16x64xf32>
    %412 = arith.divf %411, %410 : vector<16x64xf32>
    %cst_198 = arith.constant 1.06140542 : f32
    %413 = vector.broadcast %cst_198 : f32 to vector<16x64xf32>
    %414 = arith.mulf %412, %413 : vector<16x64xf32>
    %cst_199 = arith.constant -1.45315206 : f32
    %415 = vector.broadcast %cst_199 : f32 to vector<16x64xf32>
    %416 = arith.addf %415, %414 : vector<16x64xf32>
    %417 = arith.mulf %412, %416 : vector<16x64xf32>
    %cst_200 = arith.constant 1.42141378 : f32
    %418 = vector.broadcast %cst_200 : f32 to vector<16x64xf32>
    %419 = arith.addf %418, %417 : vector<16x64xf32>
    %420 = arith.mulf %412, %419 : vector<16x64xf32>
    %cst_201 = arith.constant -0.284496725 : f32
    %421 = vector.broadcast %cst_201 : f32 to vector<16x64xf32>
    %422 = arith.addf %421, %420 : vector<16x64xf32>
    %423 = arith.mulf %412, %422 : vector<16x64xf32>
    %cst_202 = arith.constant 0.254829586 : f32
    %424 = vector.broadcast %cst_202 : f32 to vector<16x64xf32>
    %425 = arith.addf %424, %423 : vector<16x64xf32>
    %426 = arith.mulf %412, %425 : vector<16x64xf32>
    %cst_203 = arith.constant 0.000000e+00 : f32
    %427 = vector.broadcast %cst_203 : f32 to vector<16x64xf32>
    %428 = arith.subf %427, %406 : vector<16x64xf32>
    %429 = arith.mulf %428, %406 : vector<16x64xf32>
    %430 = math.exp %429 : vector<16x64xf32>
    %431 = arith.mulf %426, %430 : vector<16x64xf32>
    %cst_204 = arith.constant 1.000000e+00 : f32
    %432 = vector.broadcast %cst_204 : f32 to vector<16x64xf32>
    %433 = arith.subf %432, %431 : vector<16x64xf32>
    %434 = arith.mulf %405, %433 : vector<16x64xf32>
    %cst_205 = arith.constant 1.000000e+00 : f32
    %435 = vector.broadcast %cst_205 : f32 to vector<16x64xf32>
    %436 = arith.addf %435, %434 : vector<16x64xf32>
    %437 = arith.mulf %398, %436 : vector<16x64xf32>
    %c0_206 = arith.constant 0 : index
    %c0_207 = arith.constant 0 : index
    %c0_208 = arith.constant 0 : index
    %438 = vector.load %arg21[%c0_206, %c0_207, %c0_208] : memref<2x64x32xf32, #tpu.memory_space<vmem>>, vector<1x64x32xf32>
    %439 = vector.shape_cast %438 : vector<1x64x32xf32> to vector<64x32xf32>
    %cst_209 = arith.constant dense<0.000000e+00> : vector<16x32xf32>
    %440 = tpu.matmul %437, %439, %cst_209 {dimension_numbers = #tpu.dot_dimension_numbers<[1], [0], [0], [1], [0, 0, 1, 1], [], []>} : vector<16x64xf32>, vector<64x32xf32>, vector<16x32xf32> -> vector<16x32xf32>
    %c0_210 = arith.constant 0 : index
    %c0_211 = arith.constant 0 : index
    %c0_212 = arith.constant 0 : index
    %441 = vector.load %arg22[%c0_210, %c0_211, %c0_212] : memref<2x1x32xf32, #tpu.memory_space<vmem>>, vector<1x1x32xf32>
    %442 = vector.shape_cast %441 : vector<1x1x32xf32> to vector<1x32xf32>
    %443 = vector.broadcast %442 : vector<1x32xf32> to vector<16x32xf32>
    %444 = arith.addf %440, %443 : vector<16x32xf32>
    %445 = arith.addf %389, %444 : vector<16x32xf32>
    %c0_213 = arith.constant 0 : index
    %c0_214 = arith.constant 0 : index
    %c0_215 = arith.constant 0 : index
    %446 = vector.load %arg23[%c0_213, %c0_214, %c0_215] : memref<2x1x32xf32, #tpu.memory_space<vmem>>, vector<1x1x32xf32>
    %447 = vector.shape_cast %446 : vector<1x1x32xf32> to vector<1x32xf32>
    %c0_216 = arith.constant 0 : index
    %c0_217 = arith.constant 0 : index
    %c0_218 = arith.constant 0 : index
    %448 = vector.load %arg24[%c0_216, %c0_217, %c0_218] : memref<2x1x32xf32, #tpu.memory_space<vmem>>, vector<1x1x32xf32>
    %449 = vector.shape_cast %448 : vector<1x1x32xf32> to vector<1x32xf32>
    %cst_219 = arith.constant dense<0.000000e+00> : vector<16xf32>
    %450 = vector.multi_reduction <add>, %445, %cst_219 [1] : vector<16x32xf32> to vector<16xf32>
    %451 = vector.shape_cast %450 : vector<16xf32> to vector<16x1xf32>
    %cst_220 = arith.constant 3.200000e+01 : f32
    %452 = vector.broadcast %cst_220 : f32 to vector<16x1xf32>
    %453 = arith.divf %451, %452 : vector<16x1xf32>
    %454 = vector.broadcast %453 : vector<16x1xf32> to vector<16x32xf32>
    %455 = arith.subf %445, %454 : vector<16x32xf32>
    %456 = arith.mulf %455, %455 : vector<16x32xf32>
    %cst_221 = arith.constant dense<0.000000e+00> : vector<16xf32>
    %457 = vector.multi_reduction <add>, %456, %cst_221 [1] : vector<16x32xf32> to vector<16xf32>
    %458 = vector.shape_cast %457 : vector<16xf32> to vector<16x1xf32>
    %cst_222 = arith.constant 3.200000e+01 : f32
    %459 = vector.broadcast %cst_222 : f32 to vector<16x1xf32>
    %460 = arith.divf %458, %459 : vector<16x1xf32>
    %461 = vector.broadcast %453 : vector<16x1xf32> to vector<16x32xf32>
    %462 = arith.subf %445, %461 : vector<16x32xf32>
    %cst_223 = arith.constant 9.99999974E-6 : f32
    %463 = vector.broadcast %cst_223 : f32 to vector<16x1xf32>
    %464 = arith.addf %460, %463 : vector<16x1xf32>
    %465 = math.sqrt %464 : vector<16x1xf32>
    %466 = vector.broadcast %465 : vector<16x1xf32> to vector<16x32xf32>
    %467 = arith.divf %462, %466 : vector<16x32xf32>
    %468 = vector.broadcast %447 : vector<1x32xf32> to vector<16x32xf32>
    %469 = arith.mulf %467, %468 : vector<16x32xf32>
    %470 = vector.broadcast %449 : vector<1x32xf32> to vector<16x32xf32>
    %471 = arith.addf %469, %470 : vector<16x32xf32>
    %c1_224 = arith.constant 1 : index
    %c0_225 = arith.constant 0 : index
    %c0_226 = arith.constant 0 : index
    %472 = vector.load %arg11[%c1_224, %c0_225, %c0_226] : memref<2x32x96xf32, #tpu.memory_space<vmem>>, vector<1x32x96xf32>
    %473 = vector.shape_cast %472 : vector<1x32x96xf32> to vector<32x96xf32>
    %cst_227 = arith.constant dense<0.000000e+00> : vector<16x96xf32>
    %474 = tpu.matmul %471, %473, %cst_227 {dimension_numbers = #tpu.dot_dimension_numbers<[1], [0], [0], [1], [0, 0, 1, 1], [], []>} : vector<16x32xf32>, vector<32x96xf32>, vector<16x96xf32> -> vector<16x96xf32>
    %c1_228 = arith.constant 1 : index
    %c0_229 = arith.constant 0 : index
    %c0_230 = arith.constant 0 : index
    %475 = vector.load %arg12[%c1_228, %c0_229, %c0_230] : memref<2x1x96xf32, #tpu.memory_space<vmem>>, vector<1x1x96xf32>
    %476 = vector.shape_cast %475 : vector<1x1x96xf32> to vector<1x96xf32>
    %477 = vector.broadcast %476 : vector<1x96xf32> to vector<16x96xf32>
    %478 = arith.addf %474, %477 : vector<16x96xf32>
    %479 = vector.extract_strided_slice %478 {offsets = [0, 0], sizes = [16, 32], strides = [1, 1]} : vector<16x96xf32> to vector<16x32xf32>
    %480 = vector.extract_strided_slice %478 {offsets = [0, 32], sizes = [16, 32], strides = [1, 1]} : vector<16x96xf32> to vector<16x32xf32>
    %481 = vector.extract_strided_slice %478 {offsets = [0, 64], sizes = [16, 32], strides = [1, 1]} : vector<16x96xf32> to vector<16x32xf32>
    %c1_231 = arith.constant 1 : index
    %c0_232 = arith.constant 0 : index
    %c0_233 = arith.constant 0 : index
    %482 = vector.load %arg13[%c1_231, %c0_232, %c0_233] : memref<2x32x32xf32, #tpu.memory_space<vmem>>, vector<1x32x32xf32>
    %483 = vector.shape_cast %482 : vector<1x32x32xf32> to vector<32x32xf32>
    %cst_234 = arith.constant dense<0.000000e+00> : vector<16x32xf32>
    %484 = tpu.matmul %479, %483, %cst_234 {dimension_numbers = #tpu.dot_dimension_numbers<[1], [0], [0], [1], [0, 0, 1, 1], [], []>} : vector<16x32xf32>, vector<32x32xf32>, vector<16x32xf32> -> vector<16x32xf32>
    %c1_235 = arith.constant 1 : index
    %c0_236 = arith.constant 0 : index
    %c0_237 = arith.constant 0 : index
    %485 = vector.load %arg14[%c1_235, %c0_236, %c0_237] : memref<2x1x32xf32, #tpu.memory_space<vmem>>, vector<1x1x32xf32>
    %486 = vector.shape_cast %485 : vector<1x1x32xf32> to vector<1x32xf32>
    %487 = vector.broadcast %486 : vector<1x32xf32> to vector<16x32xf32>
    %488 = arith.addf %484, %487 : vector<16x32xf32>
    %c1_238 = arith.constant 1 : index
    %c0_239 = arith.constant 0 : index
    %c0_240 = arith.constant 0 : index
    %489 = vector.load %arg13[%c1_238, %c0_239, %c0_240] : memref<2x32x32xf32, #tpu.memory_space<vmem>>, vector<1x32x32xf32>
    %490 = vector.shape_cast %489 : vector<1x32x32xf32> to vector<32x32xf32>
    %cst_241 = arith.constant dense<0.000000e+00> : vector<16x32xf32>
    %491 = tpu.matmul %480, %490, %cst_241 {dimension_numbers = #tpu.dot_dimension_numbers<[1], [0], [0], [1], [0, 0, 1, 1], [], []>} : vector<16x32xf32>, vector<32x32xf32>, vector<16x32xf32> -> vector<16x32xf32>
    %c1_242 = arith.constant 1 : index
    %c0_243 = arith.constant 0 : index
    %c0_244 = arith.constant 0 : index
    %492 = vector.load %arg14[%c1_242, %c0_243, %c0_244] : memref<2x1x32xf32, #tpu.memory_space<vmem>>, vector<1x1x32xf32>
    %493 = vector.shape_cast %492 : vector<1x1x32xf32> to vector<1x32xf32>
    %494 = vector.broadcast %493 : vector<1x32xf32> to vector<16x32xf32>
    %495 = arith.addf %491, %494 : vector<16x32xf32>
    %496 = arith.mulf %488, %488 : vector<16x32xf32>
    %cst_245 = arith.constant dense<0.000000e+00> : vector<16x32xf32>
    %497 = tpu.matmul %496, %126, %cst_245 {dimension_numbers = #tpu.dot_dimension_numbers<[1], [0], [0], [1], [0, 0, 1, 1], [], []>} : vector<16x32xf32>, vector<32x32xf32>, vector<16x32xf32> -> vector<16x32xf32>
    %498 = math.sqrt %497 : vector<16x32xf32>
    %cst_246 = arith.constant 9.99999996E-13 : f32
    %499 = vector.broadcast %cst_246 : f32 to vector<16x32xf32>
    %500 = arith.maximumf %498, %499 : vector<16x32xf32>
    %501 = arith.divf %488, %500 : vector<16x32xf32>
    %502 = arith.mulf %495, %495 : vector<16x32xf32>
    %cst_247 = arith.constant dense<0.000000e+00> : vector<16x32xf32>
    %503 = tpu.matmul %502, %126, %cst_247 {dimension_numbers = #tpu.dot_dimension_numbers<[1], [0], [0], [1], [0, 0, 1, 1], [], []>} : vector<16x32xf32>, vector<32x32xf32>, vector<16x32xf32> -> vector<16x32xf32>
    %504 = math.sqrt %503 : vector<16x32xf32>
    %cst_248 = arith.constant 9.99999996E-13 : f32
    %505 = vector.broadcast %cst_248 : f32 to vector<16x32xf32>
    %506 = arith.maximumf %504, %505 : vector<16x32xf32>
    %507 = arith.divf %495, %506 : vector<16x32xf32>
    %cst_249 = arith.constant 0.000000e+00 : f32
    %508 = vector.broadcast %cst_249 : f32 to vector<16x32xf32>
    %cst_250 = arith.constant 0.000000e+00 : f32
    %509 = vector.broadcast %cst_250 : f32 to vector<16x32xf32>
    %c0_251 = arith.constant 0 : index
    %c0_252 = arith.constant 0 : index
    %c0_253 = arith.constant 0 : index
    %510 = vector.load %arg28[%c0_251, %c0_252, %c0_253] : memref<4x16x16xf32, #tpu.memory_space<vmem>>, vector<1x16x16xf32>
    %511 = vector.shape_cast %510 : vector<1x16x16xf32> to vector<16x16xf32>
    %c0_254 = arith.constant 0 : index
    %c0_255 = arith.constant 0 : index
    %c0_256 = arith.constant 0 : index
    %512 = vector.load %arg29[%c0_254, %c0_255, %c0_256] : memref<4x32x32xf32, #tpu.memory_space<vmem>>, vector<1x32x32xf32>
    %513 = vector.shape_cast %512 : vector<1x32x32xf32> to vector<32x32xf32>
    %cst_257 = arith.constant dense<0.000000e+00> : vector<16x32xf32>
    %514 = tpu.matmul %511, %501, %cst_257 {dimension_numbers = #tpu.dot_dimension_numbers<[1], [0], [0], [1], [0, 0, 1, 1], [], []>} : vector<16x16xf32>, vector<16x32xf32>, vector<16x32xf32> -> vector<16x32xf32>
    %cst_258 = arith.constant dense<0.000000e+00> : vector<16x32xf32>
    %515 = tpu.matmul %514, %513, %cst_258 {dimension_numbers = #tpu.dot_dimension_numbers<[1], [0], [0], [1], [0, 0, 1, 1], [], []>} : vector<16x32xf32>, vector<32x32xf32>, vector<16x32xf32> -> vector<16x32xf32>
    %516 = arith.addf %508, %515 : vector<16x32xf32>
    %cst_259 = arith.constant dense<0.000000e+00> : vector<16x32xf32>
    %517 = tpu.matmul %511, %507, %cst_259 {dimension_numbers = #tpu.dot_dimension_numbers<[1], [0], [0], [1], [0, 0, 1, 1], [], []>} : vector<16x16xf32>, vector<16x32xf32>, vector<16x32xf32> -> vector<16x32xf32>
    %cst_260 = arith.constant dense<0.000000e+00> : vector<16x32xf32>
    %518 = tpu.matmul %517, %513, %cst_260 {dimension_numbers = #tpu.dot_dimension_numbers<[1], [0], [0], [1], [0, 0, 1, 1], [], []>} : vector<16x32xf32>, vector<32x32xf32>, vector<16x32xf32> -> vector<16x32xf32>
    %519 = arith.addf %509, %518 : vector<16x32xf32>
    %c1_261 = arith.constant 1 : index
    %c0_262 = arith.constant 0 : index
    %c0_263 = arith.constant 0 : index
    %520 = vector.load %arg28[%c1_261, %c0_262, %c0_263] : memref<4x16x16xf32, #tpu.memory_space<vmem>>, vector<1x16x16xf32>
    %521 = vector.shape_cast %520 : vector<1x16x16xf32> to vector<16x16xf32>
    %c1_264 = arith.constant 1 : index
    %c0_265 = arith.constant 0 : index
    %c0_266 = arith.constant 0 : index
    %522 = vector.load %arg29[%c1_264, %c0_265, %c0_266] : memref<4x32x32xf32, #tpu.memory_space<vmem>>, vector<1x32x32xf32>
    %523 = vector.shape_cast %522 : vector<1x32x32xf32> to vector<32x32xf32>
    %cst_267 = arith.constant dense<0.000000e+00> : vector<16x32xf32>
    %524 = tpu.matmul %521, %501, %cst_267 {dimension_numbers = #tpu.dot_dimension_numbers<[1], [0], [0], [1], [0, 0, 1, 1], [], []>} : vector<16x16xf32>, vector<16x32xf32>, vector<16x32xf32> -> vector<16x32xf32>
    %cst_268 = arith.constant dense<0.000000e+00> : vector<16x32xf32>
    %525 = tpu.matmul %524, %523, %cst_268 {dimension_numbers = #tpu.dot_dimension_numbers<[1], [0], [0], [1], [0, 0, 1, 1], [], []>} : vector<16x32xf32>, vector<32x32xf32>, vector<16x32xf32> -> vector<16x32xf32>
    %526 = arith.addf %516, %525 : vector<16x32xf32>
    %cst_269 = arith.constant dense<0.000000e+00> : vector<16x32xf32>
    %527 = tpu.matmul %521, %507, %cst_269 {dimension_numbers = #tpu.dot_dimension_numbers<[1], [0], [0], [1], [0, 0, 1, 1], [], []>} : vector<16x16xf32>, vector<16x32xf32>, vector<16x32xf32> -> vector<16x32xf32>
    %cst_270 = arith.constant dense<0.000000e+00> : vector<16x32xf32>
    %528 = tpu.matmul %527, %523, %cst_270 {dimension_numbers = #tpu.dot_dimension_numbers<[1], [0], [0], [1], [0, 0, 1, 1], [], []>} : vector<16x32xf32>, vector<32x32xf32>, vector<16x32xf32> -> vector<16x32xf32>
    %529 = arith.addf %519, %528 : vector<16x32xf32>
    %c2_271 = arith.constant 2 : index
    %c0_272 = arith.constant 0 : index
    %c0_273 = arith.constant 0 : index
    %530 = vector.load %arg28[%c2_271, %c0_272, %c0_273] : memref<4x16x16xf32, #tpu.memory_space<vmem>>, vector<1x16x16xf32>
    %531 = vector.shape_cast %530 : vector<1x16x16xf32> to vector<16x16xf32>
    %c2_274 = arith.constant 2 : index
    %c0_275 = arith.constant 0 : index
    %c0_276 = arith.constant 0 : index
    %532 = vector.load %arg29[%c2_274, %c0_275, %c0_276] : memref<4x32x32xf32, #tpu.memory_space<vmem>>, vector<1x32x32xf32>
    %533 = vector.shape_cast %532 : vector<1x32x32xf32> to vector<32x32xf32>
    %cst_277 = arith.constant dense<0.000000e+00> : vector<16x32xf32>
    %534 = tpu.matmul %531, %501, %cst_277 {dimension_numbers = #tpu.dot_dimension_numbers<[1], [0], [0], [1], [0, 0, 1, 1], [], []>} : vector<16x16xf32>, vector<16x32xf32>, vector<16x32xf32> -> vector<16x32xf32>
    %cst_278 = arith.constant dense<0.000000e+00> : vector<16x32xf32>
    %535 = tpu.matmul %534, %533, %cst_278 {dimension_numbers = #tpu.dot_dimension_numbers<[1], [0], [0], [1], [0, 0, 1, 1], [], []>} : vector<16x32xf32>, vector<32x32xf32>, vector<16x32xf32> -> vector<16x32xf32>
    %536 = arith.addf %526, %535 : vector<16x32xf32>
    %cst_279 = arith.constant dense<0.000000e+00> : vector<16x32xf32>
    %537 = tpu.matmul %531, %507, %cst_279 {dimension_numbers = #tpu.dot_dimension_numbers<[1], [0], [0], [1], [0, 0, 1, 1], [], []>} : vector<16x16xf32>, vector<16x32xf32>, vector<16x32xf32> -> vector<16x32xf32>
    %cst_280 = arith.constant dense<0.000000e+00> : vector<16x32xf32>
    %538 = tpu.matmul %537, %533, %cst_280 {dimension_numbers = #tpu.dot_dimension_numbers<[1], [0], [0], [1], [0, 0, 1, 1], [], []>} : vector<16x32xf32>, vector<32x32xf32>, vector<16x32xf32> -> vector<16x32xf32>
    %539 = arith.addf %529, %538 : vector<16x32xf32>
    %c3_281 = arith.constant 3 : index
    %c0_282 = arith.constant 0 : index
    %c0_283 = arith.constant 0 : index
    %540 = vector.load %arg28[%c3_281, %c0_282, %c0_283] : memref<4x16x16xf32, #tpu.memory_space<vmem>>, vector<1x16x16xf32>
    %541 = vector.shape_cast %540 : vector<1x16x16xf32> to vector<16x16xf32>
    %c3_284 = arith.constant 3 : index
    %c0_285 = arith.constant 0 : index
    %c0_286 = arith.constant 0 : index
    %542 = vector.load %arg29[%c3_284, %c0_285, %c0_286] : memref<4x32x32xf32, #tpu.memory_space<vmem>>, vector<1x32x32xf32>
    %543 = vector.shape_cast %542 : vector<1x32x32xf32> to vector<32x32xf32>
    %cst_287 = arith.constant dense<0.000000e+00> : vector<16x32xf32>
    %544 = tpu.matmul %541, %501, %cst_287 {dimension_numbers = #tpu.dot_dimension_numbers<[1], [0], [0], [1], [0, 0, 1, 1], [], []>} : vector<16x16xf32>, vector<16x32xf32>, vector<16x32xf32> -> vector<16x32xf32>
    %cst_288 = arith.constant dense<0.000000e+00> : vector<16x32xf32>
    %545 = tpu.matmul %544, %543, %cst_288 {dimension_numbers = #tpu.dot_dimension_numbers<[1], [0], [0], [1], [0, 0, 1, 1], [], []>} : vector<16x32xf32>, vector<32x32xf32>, vector<16x32xf32> -> vector<16x32xf32>
    %546 = arith.addf %536, %545 : vector<16x32xf32>
    %cst_289 = arith.constant dense<0.000000e+00> : vector<16x32xf32>
    %547 = tpu.matmul %541, %507, %cst_289 {dimension_numbers = #tpu.dot_dimension_numbers<[1], [0], [0], [1], [0, 0, 1, 1], [], []>} : vector<16x16xf32>, vector<16x32xf32>, vector<16x32xf32> -> vector<16x32xf32>
    %cst_290 = arith.constant dense<0.000000e+00> : vector<16x32xf32>
    %548 = tpu.matmul %547, %543, %cst_290 {dimension_numbers = #tpu.dot_dimension_numbers<[1], [0], [0], [1], [0, 0, 1, 1], [], []>} : vector<16x32xf32>, vector<32x32xf32>, vector<16x32xf32> -> vector<16x32xf32>
    %549 = arith.addf %539, %548 : vector<16x32xf32>
    %cst_291 = arith.constant 0.176776692 : f32
    %550 = vector.broadcast %cst_291 : f32 to vector<16x32xf32>
    %551 = arith.mulf %479, %550 : vector<16x32xf32>
    %cst_292 = arith.constant 1.250000e-01 : f32
    %552 = vector.broadcast %cst_292 : f32 to vector<16x32xf32>
    %553 = arith.mulf %546, %552 : vector<16x32xf32>
    %554 = vector.extract_strided_slice %551 {offsets = [0, 0], sizes = [8, 8], strides = [1, 1]} : vector<16x32xf32> to vector<8x8xf32>
    %555 = vector.extract_strided_slice %480 {offsets = [0, 0], sizes = [8, 8], strides = [1, 1]} : vector<16x32xf32> to vector<8x8xf32>
    %556 = vector.extract_strided_slice %481 {offsets = [0, 0], sizes = [8, 8], strides = [1, 1]} : vector<16x32xf32> to vector<8x8xf32>
    %557 = vector.extract_strided_slice %553 {offsets = [0, 0], sizes = [8, 8], strides = [1, 1]} : vector<16x32xf32> to vector<8x8xf32>
    %558 = vector.extract_strided_slice %549 {offsets = [0, 0], sizes = [8, 8], strides = [1, 1]} : vector<16x32xf32> to vector<8x8xf32>
    %cst_293 = arith.constant dense<0.000000e+00> : vector<8x8xf32>
    %559 = tpu.matmul %554, %555, %cst_293 {dimension_numbers = #tpu.dot_dimension_numbers<[1], [1], [0], [0], [0, 0, 1, 0], [], []>} : vector<8x8xf32>, vector<8x8xf32>, vector<8x8xf32> -> vector<8x8xf32>
    %cst_294 = arith.constant dense<0.000000e+00> : vector<8x8xf32>
    %560 = tpu.matmul %557, %558, %cst_294 {dimension_numbers = #tpu.dot_dimension_numbers<[1], [1], [0], [0], [0, 0, 1, 0], [], []>} : vector<8x8xf32>, vector<8x8xf32>, vector<8x8xf32> -> vector<8x8xf32>
    %561 = arith.addf %559, %560 : vector<8x8xf32>
    %cst_295 = arith.constant dense<0xFF800000> : vector<8xf32>
    %562 = vector.multi_reduction <maximumf>, %561, %cst_295 [1] : vector<8x8xf32> to vector<8xf32>
    %563 = vector.shape_cast %562 : vector<8xf32> to vector<8x1xf32>
    %564 = vector.broadcast %563 : vector<8x1xf32> to vector<8x8xf32>
    %565 = arith.subf %561, %564 : vector<8x8xf32>
    %566 = math.exp %565 : vector<8x8xf32>
    %cst_296 = arith.constant dense<0.000000e+00> : vector<8xf32>
    %567 = vector.multi_reduction <add>, %566, %cst_296 [1] : vector<8x8xf32> to vector<8xf32>
    %568 = vector.shape_cast %567 : vector<8xf32> to vector<8x1xf32>
    %569 = vector.broadcast %568 : vector<8x1xf32> to vector<8x8xf32>
    %570 = arith.divf %566, %569 : vector<8x8xf32>
    %cst_297 = arith.constant dense<0.000000e+00> : vector<8x8xf32>
    %571 = tpu.matmul %570, %556, %cst_297 {dimension_numbers = #tpu.dot_dimension_numbers<[1], [0], [0], [1], [0, 0, 1, 1], [], []>} : vector<8x8xf32>, vector<8x8xf32>, vector<8x8xf32> -> vector<8x8xf32>
    %572 = vector.extract_strided_slice %551 {offsets = [0, 8], sizes = [8, 8], strides = [1, 1]} : vector<16x32xf32> to vector<8x8xf32>
    %573 = vector.extract_strided_slice %480 {offsets = [0, 8], sizes = [8, 8], strides = [1, 1]} : vector<16x32xf32> to vector<8x8xf32>
    %574 = vector.extract_strided_slice %481 {offsets = [0, 8], sizes = [8, 8], strides = [1, 1]} : vector<16x32xf32> to vector<8x8xf32>
    %575 = vector.extract_strided_slice %553 {offsets = [0, 8], sizes = [8, 8], strides = [1, 1]} : vector<16x32xf32> to vector<8x8xf32>
    %576 = vector.extract_strided_slice %549 {offsets = [0, 8], sizes = [8, 8], strides = [1, 1]} : vector<16x32xf32> to vector<8x8xf32>
    %cst_298 = arith.constant dense<0.000000e+00> : vector<8x8xf32>
    %577 = tpu.matmul %572, %573, %cst_298 {dimension_numbers = #tpu.dot_dimension_numbers<[1], [1], [0], [0], [0, 0, 1, 0], [], []>} : vector<8x8xf32>, vector<8x8xf32>, vector<8x8xf32> -> vector<8x8xf32>
    %cst_299 = arith.constant dense<0.000000e+00> : vector<8x8xf32>
    %578 = tpu.matmul %575, %576, %cst_299 {dimension_numbers = #tpu.dot_dimension_numbers<[1], [1], [0], [0], [0, 0, 1, 0], [], []>} : vector<8x8xf32>, vector<8x8xf32>, vector<8x8xf32> -> vector<8x8xf32>
    %579 = arith.addf %577, %578 : vector<8x8xf32>
    %cst_300 = arith.constant dense<0xFF800000> : vector<8xf32>
    %580 = vector.multi_reduction <maximumf>, %579, %cst_300 [1] : vector<8x8xf32> to vector<8xf32>
    %581 = vector.shape_cast %580 : vector<8xf32> to vector<8x1xf32>
    %582 = vector.broadcast %581 : vector<8x1xf32> to vector<8x8xf32>
    %583 = arith.subf %579, %582 : vector<8x8xf32>
    %584 = math.exp %583 : vector<8x8xf32>
    %cst_301 = arith.constant dense<0.000000e+00> : vector<8xf32>
    %585 = vector.multi_reduction <add>, %584, %cst_301 [1] : vector<8x8xf32> to vector<8xf32>
    %586 = vector.shape_cast %585 : vector<8xf32> to vector<8x1xf32>
    %587 = vector.broadcast %586 : vector<8x1xf32> to vector<8x8xf32>
    %588 = arith.divf %584, %587 : vector<8x8xf32>
    %cst_302 = arith.constant dense<0.000000e+00> : vector<8x8xf32>
    %589 = tpu.matmul %588, %574, %cst_302 {dimension_numbers = #tpu.dot_dimension_numbers<[1], [0], [0], [1], [0, 0, 1, 1], [], []>} : vector<8x8xf32>, vector<8x8xf32>, vector<8x8xf32> -> vector<8x8xf32>
    %590 = vector.extract_strided_slice %551 {offsets = [0, 16], sizes = [8, 8], strides = [1, 1]} : vector<16x32xf32> to vector<8x8xf32>
    %591 = vector.extract_strided_slice %480 {offsets = [0, 16], sizes = [8, 8], strides = [1, 1]} : vector<16x32xf32> to vector<8x8xf32>
    %592 = vector.extract_strided_slice %481 {offsets = [0, 16], sizes = [8, 8], strides = [1, 1]} : vector<16x32xf32> to vector<8x8xf32>
    %593 = vector.extract_strided_slice %553 {offsets = [0, 16], sizes = [8, 8], strides = [1, 1]} : vector<16x32xf32> to vector<8x8xf32>
    %594 = vector.extract_strided_slice %549 {offsets = [0, 16], sizes = [8, 8], strides = [1, 1]} : vector<16x32xf32> to vector<8x8xf32>
    %cst_303 = arith.constant dense<0.000000e+00> : vector<8x8xf32>
    %595 = tpu.matmul %590, %591, %cst_303 {dimension_numbers = #tpu.dot_dimension_numbers<[1], [1], [0], [0], [0, 0, 1, 0], [], []>} : vector<8x8xf32>, vector<8x8xf32>, vector<8x8xf32> -> vector<8x8xf32>
    %cst_304 = arith.constant dense<0.000000e+00> : vector<8x8xf32>
    %596 = tpu.matmul %593, %594, %cst_304 {dimension_numbers = #tpu.dot_dimension_numbers<[1], [1], [0], [0], [0, 0, 1, 0], [], []>} : vector<8x8xf32>, vector<8x8xf32>, vector<8x8xf32> -> vector<8x8xf32>
    %597 = arith.addf %595, %596 : vector<8x8xf32>
    %cst_305 = arith.constant dense<0xFF800000> : vector<8xf32>
    %598 = vector.multi_reduction <maximumf>, %597, %cst_305 [1] : vector<8x8xf32> to vector<8xf32>
    %599 = vector.shape_cast %598 : vector<8xf32> to vector<8x1xf32>
    %600 = vector.broadcast %599 : vector<8x1xf32> to vector<8x8xf32>
    %601 = arith.subf %597, %600 : vector<8x8xf32>
    %602 = math.exp %601 : vector<8x8xf32>
    %cst_306 = arith.constant dense<0.000000e+00> : vector<8xf32>
    %603 = vector.multi_reduction <add>, %602, %cst_306 [1] : vector<8x8xf32> to vector<8xf32>
    %604 = vector.shape_cast %603 : vector<8xf32> to vector<8x1xf32>
    %605 = vector.broadcast %604 : vector<8x1xf32> to vector<8x8xf32>
    %606 = arith.divf %602, %605 : vector<8x8xf32>
    %cst_307 = arith.constant dense<0.000000e+00> : vector<8x8xf32>
    %607 = tpu.matmul %606, %592, %cst_307 {dimension_numbers = #tpu.dot_dimension_numbers<[1], [0], [0], [1], [0, 0, 1, 1], [], []>} : vector<8x8xf32>, vector<8x8xf32>, vector<8x8xf32> -> vector<8x8xf32>
    %608 = vector.extract_strided_slice %551 {offsets = [0, 24], sizes = [8, 8], strides = [1, 1]} : vector<16x32xf32> to vector<8x8xf32>
    %609 = vector.extract_strided_slice %480 {offsets = [0, 24], sizes = [8, 8], strides = [1, 1]} : vector<16x32xf32> to vector<8x8xf32>
    %610 = vector.extract_strided_slice %481 {offsets = [0, 24], sizes = [8, 8], strides = [1, 1]} : vector<16x32xf32> to vector<8x8xf32>
    %611 = vector.extract_strided_slice %553 {offsets = [0, 24], sizes = [8, 8], strides = [1, 1]} : vector<16x32xf32> to vector<8x8xf32>
    %612 = vector.extract_strided_slice %549 {offsets = [0, 24], sizes = [8, 8], strides = [1, 1]} : vector<16x32xf32> to vector<8x8xf32>
    %cst_308 = arith.constant dense<0.000000e+00> : vector<8x8xf32>
    %613 = tpu.matmul %608, %609, %cst_308 {dimension_numbers = #tpu.dot_dimension_numbers<[1], [1], [0], [0], [0, 0, 1, 0], [], []>} : vector<8x8xf32>, vector<8x8xf32>, vector<8x8xf32> -> vector<8x8xf32>
    %cst_309 = arith.constant dense<0.000000e+00> : vector<8x8xf32>
    %614 = tpu.matmul %611, %612, %cst_309 {dimension_numbers = #tpu.dot_dimension_numbers<[1], [1], [0], [0], [0, 0, 1, 0], [], []>} : vector<8x8xf32>, vector<8x8xf32>, vector<8x8xf32> -> vector<8x8xf32>
    %615 = arith.addf %613, %614 : vector<8x8xf32>
    %cst_310 = arith.constant dense<0xFF800000> : vector<8xf32>
    %616 = vector.multi_reduction <maximumf>, %615, %cst_310 [1] : vector<8x8xf32> to vector<8xf32>
    %617 = vector.shape_cast %616 : vector<8xf32> to vector<8x1xf32>
    %618 = vector.broadcast %617 : vector<8x1xf32> to vector<8x8xf32>
    %619 = arith.subf %615, %618 : vector<8x8xf32>
    %620 = math.exp %619 : vector<8x8xf32>
    %cst_311 = arith.constant dense<0.000000e+00> : vector<8xf32>
    %621 = vector.multi_reduction <add>, %620, %cst_311 [1] : vector<8x8xf32> to vector<8xf32>
    %622 = vector.shape_cast %621 : vector<8xf32> to vector<8x1xf32>
    %623 = vector.broadcast %622 : vector<8x1xf32> to vector<8x8xf32>
    %624 = arith.divf %620, %623 : vector<8x8xf32>
    %cst_312 = arith.constant dense<0.000000e+00> : vector<8x8xf32>
    %625 = tpu.matmul %624, %610, %cst_312 {dimension_numbers = #tpu.dot_dimension_numbers<[1], [0], [0], [1], [0, 0, 1, 1], [], []>} : vector<8x8xf32>, vector<8x8xf32>, vector<8x8xf32> -> vector<8x8xf32>
    %626 = tpu.concatenate %571, %589, %607, %625 in 1 : vector<8x8xf32>, vector<8x8xf32>, vector<8x8xf32>, vector<8x8xf32> -> vector<8x32xf32>
    %627 = vector.extract_strided_slice %551 {offsets = [8, 0], sizes = [8, 8], strides = [1, 1]} : vector<16x32xf32> to vector<8x8xf32>
    %628 = vector.extract_strided_slice %480 {offsets = [8, 0], sizes = [8, 8], strides = [1, 1]} : vector<16x32xf32> to vector<8x8xf32>
    %629 = vector.extract_strided_slice %481 {offsets = [8, 0], sizes = [8, 8], strides = [1, 1]} : vector<16x32xf32> to vector<8x8xf32>
    %630 = vector.extract_strided_slice %553 {offsets = [8, 0], sizes = [8, 8], strides = [1, 1]} : vector<16x32xf32> to vector<8x8xf32>
    %631 = vector.extract_strided_slice %549 {offsets = [8, 0], sizes = [8, 8], strides = [1, 1]} : vector<16x32xf32> to vector<8x8xf32>
    %cst_313 = arith.constant dense<0.000000e+00> : vector<8x8xf32>
    %632 = tpu.matmul %627, %628, %cst_313 {dimension_numbers = #tpu.dot_dimension_numbers<[1], [1], [0], [0], [0, 0, 1, 0], [], []>} : vector<8x8xf32>, vector<8x8xf32>, vector<8x8xf32> -> vector<8x8xf32>
    %cst_314 = arith.constant dense<0.000000e+00> : vector<8x8xf32>
    %633 = tpu.matmul %630, %631, %cst_314 {dimension_numbers = #tpu.dot_dimension_numbers<[1], [1], [0], [0], [0, 0, 1, 0], [], []>} : vector<8x8xf32>, vector<8x8xf32>, vector<8x8xf32> -> vector<8x8xf32>
    %634 = arith.addf %632, %633 : vector<8x8xf32>
    %cst_315 = arith.constant dense<0xFF800000> : vector<8xf32>
    %635 = vector.multi_reduction <maximumf>, %634, %cst_315 [1] : vector<8x8xf32> to vector<8xf32>
    %636 = vector.shape_cast %635 : vector<8xf32> to vector<8x1xf32>
    %637 = vector.broadcast %636 : vector<8x1xf32> to vector<8x8xf32>
    %638 = arith.subf %634, %637 : vector<8x8xf32>
    %639 = math.exp %638 : vector<8x8xf32>
    %cst_316 = arith.constant dense<0.000000e+00> : vector<8xf32>
    %640 = vector.multi_reduction <add>, %639, %cst_316 [1] : vector<8x8xf32> to vector<8xf32>
    %641 = vector.shape_cast %640 : vector<8xf32> to vector<8x1xf32>
    %642 = vector.broadcast %641 : vector<8x1xf32> to vector<8x8xf32>
    %643 = arith.divf %639, %642 : vector<8x8xf32>
    %cst_317 = arith.constant dense<0.000000e+00> : vector<8x8xf32>
    %644 = tpu.matmul %643, %629, %cst_317 {dimension_numbers = #tpu.dot_dimension_numbers<[1], [0], [0], [1], [0, 0, 1, 1], [], []>} : vector<8x8xf32>, vector<8x8xf32>, vector<8x8xf32> -> vector<8x8xf32>
    %645 = vector.extract_strided_slice %551 {offsets = [8, 8], sizes = [8, 8], strides = [1, 1]} : vector<16x32xf32> to vector<8x8xf32>
    %646 = vector.extract_strided_slice %480 {offsets = [8, 8], sizes = [8, 8], strides = [1, 1]} : vector<16x32xf32> to vector<8x8xf32>
    %647 = vector.extract_strided_slice %481 {offsets = [8, 8], sizes = [8, 8], strides = [1, 1]} : vector<16x32xf32> to vector<8x8xf32>
    %648 = vector.extract_strided_slice %553 {offsets = [8, 8], sizes = [8, 8], strides = [1, 1]} : vector<16x32xf32> to vector<8x8xf32>
    %649 = vector.extract_strided_slice %549 {offsets = [8, 8], sizes = [8, 8], strides = [1, 1]} : vector<16x32xf32> to vector<8x8xf32>
    %cst_318 = arith.constant dense<0.000000e+00> : vector<8x8xf32>
    %650 = tpu.matmul %645, %646, %cst_318 {dimension_numbers = #tpu.dot_dimension_numbers<[1], [1], [0], [0], [0, 0, 1, 0], [], []>} : vector<8x8xf32>, vector<8x8xf32>, vector<8x8xf32> -> vector<8x8xf32>
    %cst_319 = arith.constant dense<0.000000e+00> : vector<8x8xf32>
    %651 = tpu.matmul %648, %649, %cst_319 {dimension_numbers = #tpu.dot_dimension_numbers<[1], [1], [0], [0], [0, 0, 1, 0], [], []>} : vector<8x8xf32>, vector<8x8xf32>, vector<8x8xf32> -> vector<8x8xf32>
    %652 = arith.addf %650, %651 : vector<8x8xf32>
    %cst_320 = arith.constant dense<0xFF800000> : vector<8xf32>
    %653 = vector.multi_reduction <maximumf>, %652, %cst_320 [1] : vector<8x8xf32> to vector<8xf32>
    %654 = vector.shape_cast %653 : vector<8xf32> to vector<8x1xf32>
    %655 = vector.broadcast %654 : vector<8x1xf32> to vector<8x8xf32>
    %656 = arith.subf %652, %655 : vector<8x8xf32>
    %657 = math.exp %656 : vector<8x8xf32>
    %cst_321 = arith.constant dense<0.000000e+00> : vector<8xf32>
    %658 = vector.multi_reduction <add>, %657, %cst_321 [1] : vector<8x8xf32> to vector<8xf32>
    %659 = vector.shape_cast %658 : vector<8xf32> to vector<8x1xf32>
    %660 = vector.broadcast %659 : vector<8x1xf32> to vector<8x8xf32>
    %661 = arith.divf %657, %660 : vector<8x8xf32>
    %cst_322 = arith.constant dense<0.000000e+00> : vector<8x8xf32>
    %662 = tpu.matmul %661, %647, %cst_322 {dimension_numbers = #tpu.dot_dimension_numbers<[1], [0], [0], [1], [0, 0, 1, 1], [], []>} : vector<8x8xf32>, vector<8x8xf32>, vector<8x8xf32> -> vector<8x8xf32>
    %663 = vector.extract_strided_slice %551 {offsets = [8, 16], sizes = [8, 8], strides = [1, 1]} : vector<16x32xf32> to vector<8x8xf32>
    %664 = vector.extract_strided_slice %480 {offsets = [8, 16], sizes = [8, 8], strides = [1, 1]} : vector<16x32xf32> to vector<8x8xf32>
    %665 = vector.extract_strided_slice %481 {offsets = [8, 16], sizes = [8, 8], strides = [1, 1]} : vector<16x32xf32> to vector<8x8xf32>
    %666 = vector.extract_strided_slice %553 {offsets = [8, 16], sizes = [8, 8], strides = [1, 1]} : vector<16x32xf32> to vector<8x8xf32>
    %667 = vector.extract_strided_slice %549 {offsets = [8, 16], sizes = [8, 8], strides = [1, 1]} : vector<16x32xf32> to vector<8x8xf32>
    %cst_323 = arith.constant dense<0.000000e+00> : vector<8x8xf32>
    %668 = tpu.matmul %663, %664, %cst_323 {dimension_numbers = #tpu.dot_dimension_numbers<[1], [1], [0], [0], [0, 0, 1, 0], [], []>} : vector<8x8xf32>, vector<8x8xf32>, vector<8x8xf32> -> vector<8x8xf32>
    %cst_324 = arith.constant dense<0.000000e+00> : vector<8x8xf32>
    %669 = tpu.matmul %666, %667, %cst_324 {dimension_numbers = #tpu.dot_dimension_numbers<[1], [1], [0], [0], [0, 0, 1, 0], [], []>} : vector<8x8xf32>, vector<8x8xf32>, vector<8x8xf32> -> vector<8x8xf32>
    %670 = arith.addf %668, %669 : vector<8x8xf32>
    %cst_325 = arith.constant dense<0xFF800000> : vector<8xf32>
    %671 = vector.multi_reduction <maximumf>, %670, %cst_325 [1] : vector<8x8xf32> to vector<8xf32>
    %672 = vector.shape_cast %671 : vector<8xf32> to vector<8x1xf32>
    %673 = vector.broadcast %672 : vector<8x1xf32> to vector<8x8xf32>
    %674 = arith.subf %670, %673 : vector<8x8xf32>
    %675 = math.exp %674 : vector<8x8xf32>
    %cst_326 = arith.constant dense<0.000000e+00> : vector<8xf32>
    %676 = vector.multi_reduction <add>, %675, %cst_326 [1] : vector<8x8xf32> to vector<8xf32>
    %677 = vector.shape_cast %676 : vector<8xf32> to vector<8x1xf32>
    %678 = vector.broadcast %677 : vector<8x1xf32> to vector<8x8xf32>
    %679 = arith.divf %675, %678 : vector<8x8xf32>
    %cst_327 = arith.constant dense<0.000000e+00> : vector<8x8xf32>
    %680 = tpu.matmul %679, %665, %cst_327 {dimension_numbers = #tpu.dot_dimension_numbers<[1], [0], [0], [1], [0, 0, 1, 1], [], []>} : vector<8x8xf32>, vector<8x8xf32>, vector<8x8xf32> -> vector<8x8xf32>
    %681 = vector.extract_strided_slice %551 {offsets = [8, 24], sizes = [8, 8], strides = [1, 1]} : vector<16x32xf32> to vector<8x8xf32>
    %682 = vector.extract_strided_slice %480 {offsets = [8, 24], sizes = [8, 8], strides = [1, 1]} : vector<16x32xf32> to vector<8x8xf32>
    %683 = vector.extract_strided_slice %481 {offsets = [8, 24], sizes = [8, 8], strides = [1, 1]} : vector<16x32xf32> to vector<8x8xf32>
    %684 = vector.extract_strided_slice %553 {offsets = [8, 24], sizes = [8, 8], strides = [1, 1]} : vector<16x32xf32> to vector<8x8xf32>
    %685 = vector.extract_strided_slice %549 {offsets = [8, 24], sizes = [8, 8], strides = [1, 1]} : vector<16x32xf32> to vector<8x8xf32>
    %cst_328 = arith.constant dense<0.000000e+00> : vector<8x8xf32>
    %686 = tpu.matmul %681, %682, %cst_328 {dimension_numbers = #tpu.dot_dimension_numbers<[1], [1], [0], [0], [0, 0, 1, 0], [], []>} : vector<8x8xf32>, vector<8x8xf32>, vector<8x8xf32> -> vector<8x8xf32>
    %cst_329 = arith.constant dense<0.000000e+00> : vector<8x8xf32>
    %687 = tpu.matmul %684, %685, %cst_329 {dimension_numbers = #tpu.dot_dimension_numbers<[1], [1], [0], [0], [0, 0, 1, 0], [], []>} : vector<8x8xf32>, vector<8x8xf32>, vector<8x8xf32> -> vector<8x8xf32>
    %688 = arith.addf %686, %687 : vector<8x8xf32>
    %cst_330 = arith.constant dense<0xFF800000> : vector<8xf32>
    %689 = vector.multi_reduction <maximumf>, %688, %cst_330 [1] : vector<8x8xf32> to vector<8xf32>
    %690 = vector.shape_cast %689 : vector<8xf32> to vector<8x1xf32>
    %691 = vector.broadcast %690 : vector<8x1xf32> to vector<8x8xf32>
    %692 = arith.subf %688, %691 : vector<8x8xf32>
    %693 = math.exp %692 : vector<8x8xf32>
    %cst_331 = arith.constant dense<0.000000e+00> : vector<8xf32>
    %694 = vector.multi_reduction <add>, %693, %cst_331 [1] : vector<8x8xf32> to vector<8xf32>
    %695 = vector.shape_cast %694 : vector<8xf32> to vector<8x1xf32>
    %696 = vector.broadcast %695 : vector<8x1xf32> to vector<8x8xf32>
    %697 = arith.divf %693, %696 : vector<8x8xf32>
    %cst_332 = arith.constant dense<0.000000e+00> : vector<8x8xf32>
    %698 = tpu.matmul %697, %683, %cst_332 {dimension_numbers = #tpu.dot_dimension_numbers<[1], [0], [0], [1], [0, 0, 1, 1], [], []>} : vector<8x8xf32>, vector<8x8xf32>, vector<8x8xf32> -> vector<8x8xf32>
    %699 = tpu.concatenate %644, %662, %680, %698 in 1 : vector<8x8xf32>, vector<8x8xf32>, vector<8x8xf32>, vector<8x8xf32> -> vector<8x32xf32>
    %700 = tpu.concatenate %626, %699 in 0 : vector<8x32xf32>, vector<8x32xf32> -> vector<16x32xf32>
    %c1_333 = arith.constant 1 : index
    %c0_334 = arith.constant 0 : index
    %c0_335 = arith.constant 0 : index
    %701 = vector.load %arg15[%c1_333, %c0_334, %c0_335] : memref<2x32x32xf32, #tpu.memory_space<vmem>>, vector<1x32x32xf32>
    %702 = vector.shape_cast %701 : vector<1x32x32xf32> to vector<32x32xf32>
    %cst_336 = arith.constant dense<0.000000e+00> : vector<16x32xf32>
    %703 = tpu.matmul %700, %702, %cst_336 {dimension_numbers = #tpu.dot_dimension_numbers<[1], [0], [0], [1], [0, 0, 1, 1], [], []>} : vector<16x32xf32>, vector<32x32xf32>, vector<16x32xf32> -> vector<16x32xf32>
    %c1_337 = arith.constant 1 : index
    %c0_338 = arith.constant 0 : index
    %c0_339 = arith.constant 0 : index
    %704 = vector.load %arg16[%c1_337, %c0_338, %c0_339] : memref<2x1x32xf32, #tpu.memory_space<vmem>>, vector<1x1x32xf32>
    %705 = vector.shape_cast %704 : vector<1x1x32xf32> to vector<1x32xf32>
    %706 = vector.broadcast %705 : vector<1x32xf32> to vector<16x32xf32>
    %707 = arith.addf %703, %706 : vector<16x32xf32>
    %708 = arith.addf %471, %707 : vector<16x32xf32>
    %c1_340 = arith.constant 1 : index
    %c0_341 = arith.constant 0 : index
    %c0_342 = arith.constant 0 : index
    %709 = vector.load %arg17[%c1_340, %c0_341, %c0_342] : memref<2x1x32xf32, #tpu.memory_space<vmem>>, vector<1x1x32xf32>
    %710 = vector.shape_cast %709 : vector<1x1x32xf32> to vector<1x32xf32>
    %c1_343 = arith.constant 1 : index
    %c0_344 = arith.constant 0 : index
    %c0_345 = arith.constant 0 : index
    %711 = vector.load %arg18[%c1_343, %c0_344, %c0_345] : memref<2x1x32xf32, #tpu.memory_space<vmem>>, vector<1x1x32xf32>
    %712 = vector.shape_cast %711 : vector<1x1x32xf32> to vector<1x32xf32>
    %cst_346 = arith.constant dense<0.000000e+00> : vector<16xf32>
    %713 = vector.multi_reduction <add>, %708, %cst_346 [1] : vector<16x32xf32> to vector<16xf32>
    %714 = vector.shape_cast %713 : vector<16xf32> to vector<16x1xf32>
    %cst_347 = arith.constant 3.200000e+01 : f32
    %715 = vector.broadcast %cst_347 : f32 to vector<16x1xf32>
    %716 = arith.divf %714, %715 : vector<16x1xf32>
    %717 = vector.broadcast %716 : vector<16x1xf32> to vector<16x32xf32>
    %718 = arith.subf %708, %717 : vector<16x32xf32>
    %719 = arith.mulf %718, %718 : vector<16x32xf32>
    %cst_348 = arith.constant dense<0.000000e+00> : vector<16xf32>
    %720 = vector.multi_reduction <add>, %719, %cst_348 [1] : vector<16x32xf32> to vector<16xf32>
    %721 = vector.shape_cast %720 : vector<16xf32> to vector<16x1xf32>
    %cst_349 = arith.constant 3.200000e+01 : f32
    %722 = vector.broadcast %cst_349 : f32 to vector<16x1xf32>
    %723 = arith.divf %721, %722 : vector<16x1xf32>
    %724 = vector.broadcast %716 : vector<16x1xf32> to vector<16x32xf32>
    %725 = arith.subf %708, %724 : vector<16x32xf32>
    %cst_350 = arith.constant 9.99999974E-6 : f32
    %726 = vector.broadcast %cst_350 : f32 to vector<16x1xf32>
    %727 = arith.addf %723, %726 : vector<16x1xf32>
    %728 = math.sqrt %727 : vector<16x1xf32>
    %729 = vector.broadcast %728 : vector<16x1xf32> to vector<16x32xf32>
    %730 = arith.divf %725, %729 : vector<16x32xf32>
    %731 = vector.broadcast %710 : vector<1x32xf32> to vector<16x32xf32>
    %732 = arith.mulf %730, %731 : vector<16x32xf32>
    %733 = vector.broadcast %712 : vector<1x32xf32> to vector<16x32xf32>
    %734 = arith.addf %732, %733 : vector<16x32xf32>
    %c1_351 = arith.constant 1 : index
    %c0_352 = arith.constant 0 : index
    %c0_353 = arith.constant 0 : index
    %735 = vector.load %arg19[%c1_351, %c0_352, %c0_353] : memref<2x32x64xf32, #tpu.memory_space<vmem>>, vector<1x32x64xf32>
    %736 = vector.shape_cast %735 : vector<1x32x64xf32> to vector<32x64xf32>
    %cst_354 = arith.constant dense<0.000000e+00> : vector<16x64xf32>
    %737 = tpu.matmul %734, %736, %cst_354 {dimension_numbers = #tpu.dot_dimension_numbers<[1], [0], [0], [1], [0, 0, 1, 1], [], []>} : vector<16x32xf32>, vector<32x64xf32>, vector<16x64xf32> -> vector<16x64xf32>
    %c1_355 = arith.constant 1 : index
    %c0_356 = arith.constant 0 : index
    %c0_357 = arith.constant 0 : index
    %738 = vector.load %arg20[%c1_355, %c0_356, %c0_357] : memref<2x1x64xf32, #tpu.memory_space<vmem>>, vector<1x1x64xf32>
    %739 = vector.shape_cast %738 : vector<1x1x64xf32> to vector<1x64xf32>
    %740 = vector.broadcast %739 : vector<1x64xf32> to vector<16x64xf32>
    %741 = arith.addf %737, %740 : vector<16x64xf32>
    %cst_358 = arith.constant 5.000000e-01 : f32
    %742 = vector.broadcast %cst_358 : f32 to vector<16x64xf32>
    %743 = arith.mulf %742, %741 : vector<16x64xf32>
    %cst_359 = arith.constant 0.707106769 : f32
    %744 = vector.broadcast %cst_359 : f32 to vector<16x64xf32>
    %745 = arith.mulf %741, %744 : vector<16x64xf32>
    %cst_360 = arith.constant 0.000000e+00 : f32
    %746 = vector.broadcast %cst_360 : f32 to vector<16x64xf32>
    %747 = arith.cmpf olt, %745, %746 : vector<16x64xf32>
    %cst_361 = arith.constant -1.000000e+00 : f32
    %cst_362 = arith.constant 1.000000e+00 : f32
    %748 = vector.broadcast %cst_361 : f32 to vector<16x64xf32>
    %749 = vector.broadcast %cst_362 : f32 to vector<16x64xf32>
    %750 = arith.select %747, %748, %749 : vector<16x64xi1>, vector<16x64xf32>
    %751 = math.absf %745 : vector<16x64xf32>
    %cst_363 = arith.constant 0.327591091 : f32
    %752 = vector.broadcast %cst_363 : f32 to vector<16x64xf32>
    %753 = arith.mulf %752, %751 : vector<16x64xf32>
    %cst_364 = arith.constant 1.000000e+00 : f32
    %754 = vector.broadcast %cst_364 : f32 to vector<16x64xf32>
    %755 = arith.addf %754, %753 : vector<16x64xf32>
    %cst_365 = arith.constant 1.000000e+00 : f32
    %756 = vector.broadcast %cst_365 : f32 to vector<16x64xf32>
    %757 = arith.divf %756, %755 : vector<16x64xf32>
    %cst_366 = arith.constant 1.06140542 : f32
    %758 = vector.broadcast %cst_366 : f32 to vector<16x64xf32>
    %759 = arith.mulf %757, %758 : vector<16x64xf32>
    %cst_367 = arith.constant -1.45315206 : f32
    %760 = vector.broadcast %cst_367 : f32 to vector<16x64xf32>
    %761 = arith.addf %760, %759 : vector<16x64xf32>
    %762 = arith.mulf %757, %761 : vector<16x64xf32>
    %cst_368 = arith.constant 1.42141378 : f32
    %763 = vector.broadcast %cst_368 : f32 to vector<16x64xf32>
    %764 = arith.addf %763, %762 : vector<16x64xf32>
    %765 = arith.mulf %757, %764 : vector<16x64xf32>
    %cst_369 = arith.constant -0.284496725 : f32
    %766 = vector.broadcast %cst_369 : f32 to vector<16x64xf32>
    %767 = arith.addf %766, %765 : vector<16x64xf32>
    %768 = arith.mulf %757, %767 : vector<16x64xf32>
    %cst_370 = arith.constant 0.254829586 : f32
    %769 = vector.broadcast %cst_370 : f32 to vector<16x64xf32>
    %770 = arith.addf %769, %768 : vector<16x64xf32>
    %771 = arith.mulf %757, %770 : vector<16x64xf32>
    %cst_371 = arith.constant 0.000000e+00 : f32
    %772 = vector.broadcast %cst_371 : f32 to vector<16x64xf32>
    %773 = arith.subf %772, %751 : vector<16x64xf32>
    %774 = arith.mulf %773, %751 : vector<16x64xf32>
    %775 = math.exp %774 : vector<16x64xf32>
    %776 = arith.mulf %771, %775 : vector<16x64xf32>
    %cst_372 = arith.constant 1.000000e+00 : f32
    %777 = vector.broadcast %cst_372 : f32 to vector<16x64xf32>
    %778 = arith.subf %777, %776 : vector<16x64xf32>
    %779 = arith.mulf %750, %778 : vector<16x64xf32>
    %cst_373 = arith.constant 1.000000e+00 : f32
    %780 = vector.broadcast %cst_373 : f32 to vector<16x64xf32>
    %781 = arith.addf %780, %779 : vector<16x64xf32>
    %782 = arith.mulf %743, %781 : vector<16x64xf32>
    %c1_374 = arith.constant 1 : index
    %c0_375 = arith.constant 0 : index
    %c0_376 = arith.constant 0 : index
    %783 = vector.load %arg21[%c1_374, %c0_375, %c0_376] : memref<2x64x32xf32, #tpu.memory_space<vmem>>, vector<1x64x32xf32>
    %784 = vector.shape_cast %783 : vector<1x64x32xf32> to vector<64x32xf32>
    %cst_377 = arith.constant dense<0.000000e+00> : vector<16x32xf32>
    %785 = tpu.matmul %782, %784, %cst_377 {dimension_numbers = #tpu.dot_dimension_numbers<[1], [0], [0], [1], [0, 0, 1, 1], [], []>} : vector<16x64xf32>, vector<64x32xf32>, vector<16x32xf32> -> vector<16x32xf32>
    %c1_378 = arith.constant 1 : index
    %c0_379 = arith.constant 0 : index
    %c0_380 = arith.constant 0 : index
    %786 = vector.load %arg22[%c1_378, %c0_379, %c0_380] : memref<2x1x32xf32, #tpu.memory_space<vmem>>, vector<1x1x32xf32>
    %787 = vector.shape_cast %786 : vector<1x1x32xf32> to vector<1x32xf32>
    %788 = vector.broadcast %787 : vector<1x32xf32> to vector<16x32xf32>
    %789 = arith.addf %785, %788 : vector<16x32xf32>
    %790 = arith.addf %734, %789 : vector<16x32xf32>
    %c1_381 = arith.constant 1 : index
    %c0_382 = arith.constant 0 : index
    %c0_383 = arith.constant 0 : index
    %791 = vector.load %arg23[%c1_381, %c0_382, %c0_383] : memref<2x1x32xf32, #tpu.memory_space<vmem>>, vector<1x1x32xf32>
    %792 = vector.shape_cast %791 : vector<1x1x32xf32> to vector<1x32xf32>
    %c1_384 = arith.constant 1 : index
    %c0_385 = arith.constant 0 : index
    %c0_386 = arith.constant 0 : index
    %793 = vector.load %arg24[%c1_384, %c0_385, %c0_386] : memref<2x1x32xf32, #tpu.memory_space<vmem>>, vector<1x1x32xf32>
    %794 = vector.shape_cast %793 : vector<1x1x32xf32> to vector<1x32xf32>
    %cst_387 = arith.constant dense<0.000000e+00> : vector<16xf32>
    %795 = vector.multi_reduction <add>, %790, %cst_387 [1] : vector<16x32xf32> to vector<16xf32>
    %796 = vector.shape_cast %795 : vector<16xf32> to vector<16x1xf32>
    %cst_388 = arith.constant 3.200000e+01 : f32
    %797 = vector.broadcast %cst_388 : f32 to vector<16x1xf32>
    %798 = arith.divf %796, %797 : vector<16x1xf32>
    %799 = vector.broadcast %798 : vector<16x1xf32> to vector<16x32xf32>
    %800 = arith.subf %790, %799 : vector<16x32xf32>
    %801 = arith.mulf %800, %800 : vector<16x32xf32>
    %cst_389 = arith.constant dense<0.000000e+00> : vector<16xf32>
    %802 = vector.multi_reduction <add>, %801, %cst_389 [1] : vector<16x32xf32> to vector<16xf32>
    %803 = vector.shape_cast %802 : vector<16xf32> to vector<16x1xf32>
    %cst_390 = arith.constant 3.200000e+01 : f32
    %804 = vector.broadcast %cst_390 : f32 to vector<16x1xf32>
    %805 = arith.divf %803, %804 : vector<16x1xf32>
    %806 = vector.broadcast %798 : vector<16x1xf32> to vector<16x32xf32>
    %807 = arith.subf %790, %806 : vector<16x32xf32>
    %cst_391 = arith.constant 9.99999974E-6 : f32
    %808 = vector.broadcast %cst_391 : f32 to vector<16x1xf32>
    %809 = arith.addf %805, %808 : vector<16x1xf32>
    %810 = math.sqrt %809 : vector<16x1xf32>
    %811 = vector.broadcast %810 : vector<16x1xf32> to vector<16x32xf32>
    %812 = arith.divf %807, %811 : vector<16x32xf32>
    %813 = vector.broadcast %792 : vector<1x32xf32> to vector<16x32xf32>
    %814 = arith.mulf %812, %813 : vector<16x32xf32>
    %815 = vector.broadcast %794 : vector<1x32xf32> to vector<16x32xf32>
    %816 = arith.addf %814, %815 : vector<16x32xf32>
    %c0_392 = arith.constant 0 : index
    %c0_393 = arith.constant 0 : index
    %817 = vector.load %arg25[%c0_392, %c0_393] : memref<32x64xf32, #tpu.memory_space<vmem>>, vector<32x64xf32>
    %cst_394 = arith.constant dense<0.000000e+00> : vector<16x64xf32>
    %818 = tpu.matmul %816, %817, %cst_394 {dimension_numbers = #tpu.dot_dimension_numbers<[1], [0], [0], [1], [0, 0, 1, 1], [], []>} : vector<16x32xf32>, vector<32x64xf32>, vector<16x64xf32> -> vector<16x64xf32>
    %c0_395 = arith.constant 0 : index
    %c0_396 = arith.constant 0 : index
    %819 = vector.load %arg26[%c0_395, %c0_396] : memref<1x64xf32, #tpu.memory_space<vmem>>, vector<1x64xf32>
    %820 = vector.broadcast %819 : vector<1x64xf32> to vector<16x64xf32>
    %821 = arith.addf %818, %820 : vector<16x64xf32>
    %c0_397 = arith.constant 0 : index
    %c0_398 = arith.constant 0 : index
    %822 = vector.load %arg30[%c0_397, %c0_398] : memref<16x64xf32, #tpu.memory_space<vmem>>, vector<16x64xf32>
    tpu.vector_store %arg30[%c0_397, %c0_398], %821 {strides = array<i32>} : memref<16x64xf32, #tpu.memory_space<vmem>>, vector<16x64xf32>,
    return
  }
}

</mosaic_0001>

<bundles_post_ra>
// kernel: forward_fn.1
= control target key start
LH: loop header
LB: loop body
LE: loop exit
PB: predicated region body
PF: predicated region fallthrough
CT: control target
= control target key end

     0   :  { %s11153_s6 = smov 1   ;;  %s11154_s10 = smov 2   ;;  %s12331_s0 = inlined_call_operand.smem [shape: u32[31], index: -1, kind: input, shape index: {}] }
   0x1   :  { %s11210_s5 = sld [smem:[%s12331_s0]]   ;;  %s11155_s14 = smov 3  }
   0x2   :  { %s11215_s9 = sld [smem:[%s12331_s0 + %s11153_s6]]   ;;  %s11156_s18 = smov 4  }
   0x3   :  { %s11220_s13 = sld [smem:[%s12331_s0 + %s11154_s10]]   ;;  %s11157_s22 = smov 5  }
   0x4   :  { %s11225_s17 = sld [smem:[%s12331_s0 + %s11155_s14]]   ;;  %s11158_s26 = smov 6  }
   0x5   :  { %s11230_s21 = sld [smem:[%s12331_s0 + %s11156_s18]]   ;;  %s11159_s30 = smov 7  }
   0x6   :  { %s11235_s25 = sld [smem:[%s12331_s0 + %s11157_s22]]   ;;  %s11160_s4 = smov 8  }
   0x7   :  { %s11240_s29 = sld [smem:[%s12331_s0 + %s11158_s26]]   ;;  %s11161_s10 = smov 9  }
   0x8   :  { %s11245_s3 = sld [smem:[%s12331_s0 + %s11159_s30]]   ;;  %s11162_s15 = smov 10  }
   0x9   :  { %s11250_s8 = sld [smem:[%s12331_s0 + %s11160_s4]]   ;;  %s11163_s20 = smov 11  }
   0xa   :  { %s11255_s14 = sld [smem:[%s12331_s0 + %s11161_s10]]   ;;  %s11164_s26 = smov 12  }
   0xb   :  { %s11260_s19 = sld [smem:[%s12331_s0 + %s11162_s15]]   ;;  %s11165_s1 = smov 13  }
   0xc   :  { %s11265_s24 = sld [smem:[%s12331_s0 + %s11163_s20]]   ;;  %s11166_s7 = smov 14  }
   0xd   :  { %s11270_s30 = sld [smem:[%s12331_s0 + %s11164_s26]]   ;;  %s11167_s15 = smov 15  }
   0xe   :  { %s11275_s6 = sld [smem:[%s12331_s0 + %s11165_s1]]   ;;  %s11168_s22 = smov 16  }
   0xf   :  { %s11280_s12 = sld [smem:[%s12331_s0 + %s11166_s7]]   ;;  %s11169_s28 = smov 17  }
  0x10   :  { %s11285_s20 = sld [smem:[%s12331_s0 + %s11167_s15]]   ;;  %s11170_s7 = smov 18  }
  0x11   :  { %s11290_s27 = sld [smem:[%s12331_s0 + %s11168_s22]]   ;;  %s11171_s15 = smov 19  }
  0x12   :  { %s11295_s4 = sld [smem:[%s12331_s0 + %s11169_s28]]   ;;  %s11172_s22 = smov 20  }
  0x13   :  { %s11173_s28 = smov 21  }
  0x15   :  { %12344 = sst [smem:[#allocation5_spill]] %s11280_s12 }
  0x16   :  { %12345 = sst [smem:[#allocation6_spill]] %s11285_s20 }
  0x17   :  { %12346 = sst [smem:[#allocation7_spill]] %s11290_s27 }
  0x18   :  { %12347 = sst [smem:[#allocation8_spill]] %s11295_s4 }
  0x19   :  { %s11300_s12 = sld [smem:[%s12331_s0 + %s11170_s7]]   ;;  %s11174_s7 = smov 22  }
  0x1a   :  { %s11305_s20 = sld [smem:[%s12331_s0 + %s11171_s15]]   ;;  %s11175_s15 = smov 23  }
  0x1b   :  { %s11310_s27 = sld [smem:[%s12331_s0 + %s11172_s22]]   ;;  %s11176_s22 = smov 24  }
  0x1c   :  { %s11315_s4 = sld [smem:[%s12331_s0 + %s11173_s28]]   ;;  %s11177_s28 = smov 25  }
  0x1f   :  { %12348 = sst [smem:[#allocation9_spill]] %s11300_s12 }
  0x20   :  { %12349 = sst [smem:[#allocation10_spill]] %s11305_s20 }
  0x21   :  { %12350 = sst [smem:[#allocation11_spill]] %s11310_s27 }
  0x22   :  { %12351 = sst [smem:[#allocation12_spill]] %s11315_s4 }
  0x23   :  { %s11320_s12 = sld [smem:[%s12331_s0 + %s11174_s7]]   ;;  %s11178_s7 = smov 26  }
  0x24   :  { %s11325_s20 = sld [smem:[%s12331_s0 + %s11175_s15]]   ;;  %s11179_s15 = smov 27  }
  0x25   :  { %s11330_s27 = sld [smem:[%s12331_s0 + %s11176_s22]]   ;;  %s11180_s22 = smov 28  }
  0x26   :  { %s11335_s4 = sld [smem:[%s12331_s0 + %s11177_s28]]   ;;  %s11181_s28 = smov 29  }
  0x29   :  { %12352 = sst [smem:[#allocation13_spill]] %s11320_s12 }
  0x2a   :  { %12353 = sst [smem:[#allocation14_spill]] %s11325_s20 }
  0x2b   :  { %12354 = sst [smem:[#allocation15_spill]] %s11330_s27 }
  0x2c   :  { %12355 = sst [smem:[#allocation16_spill]] %s11335_s4 }
  0x2d   :  { %s11340_s12 = sld [smem:[%s12331_s0 + %s11178_s7]]   ;;  %s11182_s7 = smov 30  }
  0x2e   :  { %s11345_s20 = sld [smem:[%s12331_s0 + %s11179_s15]]  }
  0x2f   :  { %s11350_s27 = sld [smem:[%s12331_s0 + %s11180_s22]]  }
  0x30   :  { %s11355_s4 = sld [smem:[%s12331_s0 + %s11181_s28]]  }
  0x33   :  { %12356 = sst [smem:[#allocation17_spill]] %s11340_s12 }
  0x34   :  { %s11360_s12 = sld [smem:[%s12331_s0 + %s11182_s7]]  }
  0x35   :  { %v127_v0 = vld [vmem:[%s11210_s5] sm:$0xff]  ;;  %vm131_vm0 = vcmask 261120   ;;  %v128_v1 = vld [vmem:[%s11210_s5 + $0x8] sm:$0xff] }
  0x36   :  { %66 = vsyncpa [#allocation3], 0  ;;  %v129_v2 = vmul.f32 %v127_v0, %v127_v0  ;;  %v130_v3 = vmul.f32 %v128_v1, %v128_v1  ;;  %v166_v6 = vld [vmem:[%s11225_s17] sm:$0xff]  ;;  %v167_v7 = vld [vmem:[%s11225_s17 + $0x8] sm:$0xff]  ;;  %vm356_vm5 = vcmask 1043456   ;;  %vm349_vm10 = vcmask 31744  }
  0x37   :  { %v168_v8 = vld [vmem:[%s11225_s17 + $0x10] sm:$0xff]  ;;  %v10500_v9 = vpack.c.bf16 %v167_v7, %v166_v6  ;;  %v169_v10 = vld [vmem:[%s11225_s17 + $0x18] sm:$0xff]  ;;  %v158_v27 = vld [vmem:[%s11215_s9] sm:$0xff]  ;;  %s11183_s0 = smov 96   ;;  %s12357_s5 = sld [smem:[#allocation5_spill]] }
  0x38   :  { %v132_v4 = vsel %vm131_vm0, %v129_v2, 0.0  ;;  %v135_v5 = vsel %vm131_vm0, %v130_v3, 0.0  ;;  %v10504_v11 = vpack.c.bf16 %v169_v10, %v168_v8  ;;  %v162_v29 = vld [vmem:[%s11220_s13] sm:$0xff]  ;;  %v159_v32 = vld [vmem:[%s11215_s9 + $0x8] sm:$0xff]  ;;  %s11184_s9 = smov 88   ;;  %s11188_s17 = smov 56  }
  0x39   :  { %133 = vadd.xlane.f32.xlu0 %v132_v4  ;;  %10501 = vmatprep.subr.bf16.mxu0 %v10500_v9  ;;  %v163_v35 = vld [vmem:[%s11220_s13 + $0x8] sm:$0xff]  ;;  %v348_v38 = vld [vmem:[%s11245_s3] sm:$0xf]  ;;  %s11187_s13 = smov 120   ;;  %s11192_s3 = smov 80  }
  0x3a   :  { %10503 = vmatpush3.bf16.msra.mxu0 %v10500_v9  ;;  %v347_v39 = vld [vmem:[%s11240_s29] sm:$0xf]  ;;  %s11191_s29 = smov 64   ;;  %s11198_s15 = smov 24  }
  0x3b   :  { %10505 = vmatprep.subr.bf16.mxu0 %v10504_v11  ;;  %9764 = vmatprep.subr.msk.mxu1 %vm356_vm5, %v347_v39  ;;  %v9112_v40 = vld [vmem:[%s11235_s25] ss:$0 sm:$0xff]  ;;  %s11190_s25 = smov 104   ;;  %s12358_s16 = sld [smem:[#allocation6_spill]] }
  0x3c   :  { %9765 = vmatpush3.msk.msra.mxu1 %vm356_vm5, %v347_v39  ;;  %v9109_v41 = vld [vmem:[%s11230_s21] ss:$0 sm:$0xff]  ;;  %s11189_s21 = smov 112   ;;  %s12359_s18 = sld [smem:[#allocation7_spill]] }
  0x3d   :  { %136 = vadd.xlane.f32.xlu0 %v135_v5  ;;  %s12360_s22 = sld [smem:[#allocation10_spill]]  ;;  %s12361_s23 = sld [smem:[#allocation8_spill]] }
  0x3e   :  { %10507 = vmatpush3.bf16.msra.mxu0 %v10504_v11  ;;  %s12362_s26 = sld [smem:[#allocation9_spill]]  ;;  %s12363_s28 = sld [smem:[#allocation12_spill]] }
  0x3f   :  { %9759 = vmatprep.subr.msk.mxu0 %vm356_vm5, %v348_v38  ;;  %s12364_s1 = sld [smem:[#allocation11_spill]]  ;;  %s12365_s2 = sld [smem:[#allocation13_spill]] }
  0x40   :  { %s12367_s7 = sld [smem:[#allocation15_spill]] }
  0xc6   :  { %v134_v12 = vpop.xlane.xlu0 %133 }
  0xc7   :  { %10959 = vrsqrt.f32 %v134_v12  ;;  %vm140_vm1 = vcmp.eq.f32.partialorder %v134_v12, inf  ;;  %v143_v16 = vand.u32 2147483648, %v134_v12  ;;  %vm142_vm2 = vcmp.eq.f32.partialorder %v134_v12, 0.0 }
  0xca   :  { %v137_v13 = vpop.xlane.xlu0 %136 }
  0xcb   :  { %10961 = vrsqrt.f32 %v137_v13  ;;  %vm147_vm3 = vcmp.eq.f32.partialorder %v137_v13, inf  ;;  %v150_v22 = vand.u32 2147483648, %v137_v13  ;;  %vm149_vm4 = vcmp.eq.f32.partialorder %v137_v13, 0.0 }
  0xd1   :  { %v10960_v14 = vpop.eup %10959 }
  0xd2   :  { %v139_v15 = vmul.f32 %v10960_v14, %v134_v12 }
  0xd4   :  { %v141_v17 = vsel %vm140_vm1, %v134_v12, %v139_v15 }
  0xd5   :  { %v10962_v18 = vpop.eup %10961  ;;  %v144_v19 = vsel %vm142_vm2, %v143_v16, %v141_v17  ;;  %vm1074_vm2 = vcmask 130048  }
  0xd6   :  { %v146_v20 = vmul.f32 %v10962_v18, %v137_v13  ;;  %v152_v21 = vmax.f32 %v144_v19, 1e-12 }
  0xd8   :  { %v148_v23 = vsel %vm147_vm3, %v137_v13, %v146_v20  ;;  %10963 = vrcp.f32 %v152_v21 }
  0xd9   :  { %v151_v24 = vsel %vm149_vm4, %v150_v22, %v148_v23 }
  0xda   :  { %v153_v25 = vmax.f32 %v151_v24, 1e-12 }
  0xdc   :  { %10965 = vrcp.f32 %v153_v25 }
  0xdd   :  { %10967 = vrcp.f32 %v9112_v40 }
  0xe2   :  { %v10964_v26 = vpop.eup %10963 }
  0xe3   :  { %v155_v28 = vmul.f32 %v10964_v26, %v127_v0 }
  0xe5   :  { %v160_v30 = vadd.f32 %v158_v27, %v155_v28 }
  0xe6   :  { %v10966_v31 = vpop.eup %10965 }
  0xe7   :  { %v11373_v33 = vadd.f32 %v162_v29, %v160_v30  ;;  %v157_v34 = vmul.f32 %v10966_v31, %v128_v1  ;;  %v10968_v45 = vpop.eup %10967 }
  0xe9   :  { %9756 = vmatprep.mubr.msk.f32.mxu0 %vm131_vm0, %v11373_v33  ;;  %v161_v36 = vadd.f32 %v159_v32, %v157_v34 }
  0xeb   :  { %v11378_v37 = vadd.f32 %v163_v35, %v161_v36 }
  0xed   :  { %9757 = vmatmul.mubr.msk.f32.vlgmr.msra.gmra.mrb[0].mxu0 %vm131_vm0, %v11378_v37 }
  0xee   :  { %9760 = vmatpush3.msk.msra.mxu0 %vm356_vm5, %v348_v38 }
 0x1c0   :  { %v9758_v42 = vpop.f32.mrb[0].mxu0 }
 0x1c1   :  { %v255_v43 = vadd.f32 %v9758_v42, %v9109_v41  ;;  %v249_v44 = vpop.f32.mrb[1].mxu0 }
 0x1c2   :  { %v250_v46 = vadd.f32 %v9109_v41, %v249_v44 }
 0x1c3   :  { %v259_v47 = vmul.f32 6.2831855, %v255_v43 }
 0x1c4   :  { %v258_v48 = vmul.f32 6.2831855, %v250_v46 }
 0x1c5   :  { %v269_v49 = vmul.f32 %v10968_v45, %v259_v47 }
 0x1c6   :  { %v268_v50 = vmul.f32 %v10968_v45, %v258_v48 }
 0x1c7   :  { %v272_v51 = vmul.f32 0.63661975, %v269_v49 }
 0x1c8   :  { %v271_v52 = vmul.f32 0.63661975, %v268_v50 }
 0x1c9   :  { %v274_v53 = vadd.f32 0.5, %v272_v51 }
 0x1ca   :  { %v273_v54 = vadd.f32 0.5, %v271_v52 }
 0x1cb   :  { %v276_v55 = vfloor.f32 %v274_v53 }
 0x1cc   :  { %v275_v56 = vfloor.f32 %v273_v54 }
 0x1cd   :  { %v278_v57 = vmul.f32 1.5707964, %v276_v55  ;;  %v318_v1 = vmul.f32 0.25, %v276_v55 }
 0x1ce   :  { %v277_v58 = vmul.f32 1.5707964, %v275_v56  ;;  %v317_v5 = vmul.f32 0.25, %v275_v56 }
 0x1cf   :  { %v280_v59 = vsub.f32 %v269_v49, %v278_v57  ;;  %v320_v11 = vfloor.f32 %v318_v1 }
 0x1d0   :  { %v279_v60 = vsub.f32 %v268_v50, %v277_v58  ;;  %v319_v15 = vfloor.f32 %v317_v5 }
 0x1d1   :  { %v282_v61 = vmul.f32 %v280_v59, %v280_v59  ;;  %v322_v21 = vmul.f32 4.0, %v320_v11 }
 0x1d2   :  { %v281_v62 = vmul.f32 %v279_v60, %v279_v60  ;;  %v321_v25 = vmul.f32 4.0, %v319_v15 }
 0x1d3   :  { %v284_v63 = vmul.f32 2.7557319e-06, %v282_v61  ;;  %v302_v0 = vmul.f32 2.4801588e-05, %v282_v61  ;;  %v324_v34 = vsub.f32 %v276_v55, %v322_v21 }
 0x1d4   :  { %v283_v2 = vmul.f32 2.7557319e-06, %v281_v62  ;;  %v301_v3 = vmul.f32 2.4801588e-05, %v281_v62  ;;  %v323_v36 = vsub.f32 %v275_v56, %v321_v25  ;;  %v688_v25 = vld [vmem:[%s11275_s6 + $0x8] sm:$0xff] }
 0x1d5   :  { %v286_v4 = vadd.f32 -0.0001984127, %v284_v63  ;;  %v304_v6 = vadd.f32 -0.0013888889, %v302_v0  ;;  %vm330_vm6 = vcmp.eq.f32.partialorder %v324_v34, 2.0  ;;  %vm328_vm8 = vcmp.eq.f32.partialorder %v324_v34, 1.0 }
 0x1d6   :  { %v285_v7 = vadd.f32 -0.0001984127, %v283_v2  ;;  %v303_v8 = vadd.f32 -0.0013888889, %v301_v3  ;;  %vm329_vm7 = vcmp.eq.f32.partialorder %v323_v36, 2.0  ;;  %vm327_vm9 = vcmp.eq.f32.partialorder %v323_v36, 1.0 }
 0x1d7   :  { %v288_v9 = vmul.f32 %v286_v4, %v282_v61  ;;  %v306_v10 = vmul.f32 %v304_v6, %v282_v61  ;;  %vm325_vm11 = vcmp.eq.f32.partialorder %v323_v36, 0.0  ;;  %vm326_vm12 = vcmp.eq.f32.partialorder %v324_v34, 0.0 }
 0x1d8   :  { %v287_v12 = vmul.f32 %v285_v7, %v281_v62  ;;  %v305_v13 = vmul.f32 %v303_v8, %v281_v62 }
 0x1d9   :  { %v290_v14 = vadd.f32 0.008333334, %v288_v9  ;;  %v308_v16 = vadd.f32 0.041666668, %v306_v10 }
 0x1da   :  { %v289_v17 = vadd.f32 0.008333334, %v287_v12  ;;  %v307_v18 = vadd.f32 0.041666668, %v305_v13 }
 0x1db   :  { %v292_v19 = vmul.f32 %v290_v14, %v282_v61  ;;  %v310_v20 = vmul.f32 %v308_v16, %v282_v61 }
 0x1dc   :  { %v291_v22 = vmul.f32 %v289_v17, %v281_v62  ;;  %v309_v23 = vmul.f32 %v307_v18, %v281_v62  ;;  %v595_v18 = vld [vmem:[%s11265_s24] sm:$0xff] }
 0x1dd   :  { %v294_v24 = vadd.f32 -0.16666667, %v292_v19  ;;  %v312_v26 = vadd.f32 -0.5, %v310_v20  ;;  %v596_v19 = vld [vmem:[%s11265_s24 + $0x8] sm:$0xff]  ;;  %v597_v20 = vld [vmem:[%s11265_s24 + $0x10] sm:$0xff] }
 0x1de   :  { %v293_v27 = vadd.f32 -0.16666667, %v291_v22  ;;  %v311_v28 = vadd.f32 -0.5, %v309_v23  ;;  %v10508_v21 = vpack.c.bf16 %v596_v19, %v595_v18  ;;  %v598_v22 = vld [vmem:[%s11265_s24 + $0x18] sm:$0xff]  ;;  %v9138_v18 = vld [vmem:[%s11350_s27 + $0x10] sm:$0xff]  ;;  %v1068_v19 = vld [vmem:[%s11350_s27] sm:$0xff] }
 0x1df   :  { %v296_v29 = vmul.f32 %v294_v24, %v282_v61  ;;  %v314_v30 = vmul.f32 %v312_v26, %v282_v61  ;;  %v9119_v61 = vld [vmem:[%s11250_s8] ss:$0 sm:$0xff]  ;;  %v10512_v23 = vpack.c.bf16 %v598_v22, %v597_v20  ;;  %s11193_s8 = smov 48  }
 0x1e0   :  { %v295_v31 = vmul.f32 %v293_v27, %v281_v62  ;;  %v313_v32 = vmul.f32 %v311_v28, %v281_v62  ;;  %10509 = vmatprep.subr.bf16.mxu1 %v10508_v21  ;;  %v687_v24 = vld [vmem:[%s11275_s6] sm:$0xff] }
 0x1e1   :  { %v298_v35 = vadd.f32 1.0, %v296_v29  ;;  %v316_v38 = vadd.f32 1.0, %v314_v30  ;;  %v10516_v26 = vpack.c.bf16 %v688_v25, %v687_v24 }
 0x1e2   :  { %v297_v39 = vadd.f32 1.0, %v295_v31  ;;  %v315_v40 = vadd.f32 1.0, %v313_v32 }
 0x1e3   :  { %v300_v41 = vmul.f32 %v298_v35, %v280_v59  ;;  %v334_v42 = vsub.f32 0.0, %v316_v38  ;;  %10517 = vmatprep.subr.bf16.mxu0 %v10516_v26 }
 0x1e4   :  { %v299_v43 = vmul.f32 %v297_v39, %v279_v60  ;;  %v333_v44 = vsub.f32 0.0, %v315_v40 }
 0x1e5   :  { %v332_v45 = vsub.f32 0.0, %v300_v41  ;;  %v342_v46 = vsel %vm330_vm6, %v334_v42, %v300_v41 }
 0x1e6   :  { %v331_v47 = vsub.f32 0.0, %v299_v43  ;;  %v341_v48 = vsel %vm329_vm7, %v333_v44, %v299_v43 }
 0x1e7   :  { %v344_v49 = vsel %vm328_vm8, %v332_v45, %v342_v46  ;;  %v336_v50 = vsel %vm330_vm6, %v332_v45, %v334_v42  ;;  %v9120_v46 = vld [vmem:[%s11255_s14] ss:$0 sm:$0xff]  ;;  %s11194_s14 = smov 72  }
 0x1e8   :  { %v343_v51 = vsel %vm327_vm9, %v331_v47, %v341_v48  ;;  %v335_v52 = vsel %vm329_vm7, %v331_v47, %v333_v44  ;;  %v338_v53 = vsel %vm328_vm8, %v316_v38, %v336_v50  ;;  %v346_v57 = vsel %vm326_vm12, %v316_v38, %v344_v49  ;;  %v9121_v48 = vld [vmem:[%s11260_s19] ss:$0 sm:$0xff]  ;;  %s11195_s19 = smov 40  }
 0x1e9   :  { %v345_v54 = vsel %vm325_vm11, %v315_v40, %v343_v51  ;;  %v337_v55 = vsel %vm327_vm9, %v315_v40, %v335_v52  ;;  %v340_v58 = vsel %vm326_vm12, %v300_v41, %v338_v53  ;;  %vm2383_vm12 = vcmask 64512  }
 0x1ea   :  { %9766 = vmatprep.mubr.msk.f32.mxu1 %vm349_vm10, %v345_v54  ;;  %v339_v56 = vsel %vm325_vm11, %v299_v43, %v337_v55  ;;  %v689_v55 = vld [vmem:[%s11275_s6 + $0x10] sm:$0xff]  ;;  %vm11186_vm11 = vmmov 0  }
 0x1eb   :  { %9761 = vmatprep.mubr.msk.f32.mxu0 %vm349_vm10, %v339_v56  ;;  %9767 = vmatmul.mubr.msk.f32.vlgmr.msra.gmra.mrb[0].mxu1 %vm349_vm10, %v346_v57  ;;  %v690_v56 = vld [vmem:[%s11275_s6 + $0x18] sm:$0xff] }
 0x1ec   :  { %9762 = vmatmul.mubr.msk.f32.vlgmr.msra.gmra.mrb[2].mxu0 %vm349_vm10, %v340_v58  ;;  %10511 = vmatpush3.bf16.msra.mxu1 %v10508_v21  ;;  %v10520_v57 = vpack.c.bf16 %v690_v56, %v689_v55  ;;  %v591_v58 = vld [vmem:[%s11345_s20] sm:$0xff] }
 0x1ed   :  { %10513 = vmatprep.subr.bf16.mxu1 %v10512_v23  ;;  %10519 = vmatpush3.bf16.msra.mxu0 %v10516_v26 }
 0x1ee   :  { %10521 = vmatprep.subr.bf16.mxu0 %v10520_v57 }
 0x1f0   :  { %10515 = vmatpush3.bf16.msra.mxu1 %v10512_v23 }
 0x1f1   :  { %10525 = vmatprep.subr.bf16.mxu1 %v10516_v26  ;;  %10523 = vmatpush3.bf16.msra.mxu0 %v10520_v57 }
 0x2be   :  { %v9768_v59 = vpop.f32.mrb[0].mxu1 }
 0x2bf   :  { %v9763_v60 = vpop.f32.mrb[2].mxu0  ;;  %v510_v62 = vpop.f32.mrb[1].mxu1 }
 0x2c0   :  { %v516_v63 = vadd.f32 %v9768_v59, %v9763_v60  ;;  %v426_v0 = vpop.f32.mrb[3].mxu0  ;;  %v592_v59 = vld [vmem:[%s11345_s20 + $0x8] sm:$0xff] }
 0x2c1   :  { %v511_v1 = vadd.f32 %v510_v62, %v426_v0  ;;  %v11417_v60 = vpack.c.bf16 %v592_v59, %v591_v58 }
 0x2c2   :  { %v527_v2 = vadd.f32 %v9119_v61, %v516_v63 }
 0x2c3   :  { %v526_v3 = vadd.f32 %v9119_v61, %v511_v1  ;;  %10533 = vmatprep.subr.bf16.mxu0 %v11417_v60  ;;  %v9122_v61 = vld [vmem:[%s11270_s30] ss:$0 sm:$0xff] }
 0x2c4   :  { %v529_v4 = vmul.f32 0.1, %v527_v2  ;;  %v593_v2 = vld [vmem:[%s11345_s20 + $0x10] sm:$0xff] }
 0x2c5   :  { %v528_v5 = vmul.f32 0.1, %v526_v3  ;;  %v594_v3 = vld [vmem:[%s11345_s20 + $0x18] sm:$0xff]  ;;  %s11196_s20 = smov 8  }
 0x2c6   :  { %v531_v8 = vadd.f32 %v529_v4, %v11378_v37  ;;  %v11439_v4 = vpack.c.bf16 %v594_v3, %v593_v2  ;;  %v9141_v2 = vld [vmem:[%s11355_s4 + $0x28] sm:$0xff] }
 0x2c7   :  { %v530_v6 = vadd.f32 %v528_v5, %v11373_v33 }
 0x2c8   :  { %v537_v9 = vsel %vm131_vm0, %v531_v8, 0.0 }
 0x2c9   :  { %v534_v7 = vsel %vm131_vm0, %v530_v6, 0.0 }
 0x2ca   :  { %535 = vadd.xlane.f32.xlu1 %v534_v7  ;;  %v9125_v7 = vld [vmem:[%s12357_s5] ss:$0 sm:$0xff] }
 0x2ce   :  { %538 = vadd.xlane.f32.xlu1 %v537_v9 }
 0x357   :  { %v536_v10 = vpop.xlane.xlu1 %535 }
 0x358   :  { %v541_v11 = vmul.f32 0.03125, %v536_v10 }
 0x35a   :  { %v543_v12 = vsub.f32 %v530_v6, %v541_v11 }
 0x35b   :  { %v539_v13 = vpop.xlane.xlu1 %538 }
 0x35c   :  { %v542_v14 = vmul.f32 0.03125, %v539_v13  ;;  %v545_v15 = vmul.f32 %v543_v12, %v543_v12 }
 0x35e   :  { %v544_v16 = vsub.f32 %v531_v8, %v542_v14  ;;  %v547_v33 = vsel %vm131_vm0, %v545_v15, 0.0 }
 0x35f   :  { %548 = vadd.xlane.f32.xlu0 %v547_v33 }
 0x360   :  { %v546_v37 = vmul.f32 %v544_v16, %v544_v16 }
 0x362   :  { %v550_v17 = vsel %vm131_vm0, %v546_v37, 0.0 }
 0x363   :  { %551 = vadd.xlane.f32.xlu1 %v550_v17 }
 0x3ec   :  { %v549_v27 = vpop.xlane.xlu0 %548 }
 0x3ed   :  { %v553_v28 = vmul.f32 0.03125, %v549_v27 }
 0x3ef   :  { %v555_v29 = vadd.f32 1e-05, %v553_v28 }
 0x3f0   :  { %v552_v30 = vpop.xlane.xlu1 %551 }
 0x3f1   :  { %10969 = vrsqrt.f32 %v555_v29  ;;  %v554_v31 = vmul.f32 0.03125, %v552_v30  ;;  %vm559_vm13 = vcmp.eq.f32.partialorder %v555_v29, inf  ;;  %v562_v36 = vand.u32 2147483648, %v555_v29 }
 0x3f2   :  { %vm561_vm14 = vcmp.eq.f32.partialorder %v555_v29, 0.0 }
 0x3f3   :  { %v556_v32 = vadd.f32 1e-05, %v554_v31 }
 0x3f5   :  { %10971 = vrsqrt.f32 %v556_v32  ;;  %vm566_vm15 = vcmp.eq.f32.partialorder %v556_v32, inf  ;;  %v569_v42 = vand.u32 2147483648, %v556_v32  ;;  %vm568_vm1 = vcmp.eq.f32.partialorder %v556_v32, 0.0 }
 0x3fb   :  { %v10970_v34 = vpop.eup %10969 }
 0x3fc   :  { %v558_v35 = vmul.f32 %v10970_v34, %v555_v29 }
 0x3fe   :  { %v560_v38 = vsel %vm559_vm13, %v555_v29, %v558_v35  ;;  %vm3365_vm13 = vcmask 195584  }
 0x3ff   :  { %v563_v39 = vsel %vm561_vm14, %v562_v36, %v560_v38  ;;  %v10972_v40 = vpop.eup %10971 }
 0x400   :  { %10973 = vrcp.f32 %v563_v39  ;;  %v565_v41 = vmul.f32 %v10972_v40, %v556_v32 }
 0x402   :  { %v567_v43 = vsel %vm566_vm15, %v556_v32, %v565_v41  ;;  %v9139_v41 = vld [vmem:[%s11350_s27 + $0x18] sm:$0xff] }
 0x403   :  { %v570_v44 = vsel %vm568_vm1, %v569_v42, %v567_v43  ;;  %v1069_v42 = vld [vmem:[%s11350_s27 + $0x8] sm:$0xff] }
 0x404   :  { %10975 = vrcp.f32 %v570_v44 }
 0x40a   :  { %v10974_v45 = vpop.eup %10973 }
 0x40b   :  { %v572_v47 = vmul.f32 %v10974_v45, %v543_v12 }
 0x40d   :  { %v581_v49 = vmul.f32 %v9120_v46, %v572_v47 }
 0x40e   :  { %v10976_v50 = vpop.eup %10975 }
 0x40f   :  { %v11405_v51 = vadd.f32 %v9121_v48, %v581_v49  ;;  %v574_v52 = vmul.f32 %v10976_v50, %v544_v16 }
 0x411   :  { %9777 = vmatprep.mubr.msk.f32.mxu1 %vm131_vm0, %v11405_v51  ;;  %v582_v53 = vmul.f32 %v9120_v46, %v574_v52 }
 0x413   :  { %v11409_v54 = vadd.f32 %v9121_v48, %v582_v53 }
 0x415   :  { %9778 = vmatmul.mubr.msk.f32.vlgmr.msra.gmra.mrb[2].mxu1 %vm131_vm0, %v11409_v54 }
 0x416   :  { %10527 = vmatpush3.bf16.msra.mxu1 %v10516_v26 }
 0x417   :  { %10529 = vmatprep.subr.bf16.mxu1 %v10520_v57 }
 0x41a   :  { %10531 = vmatpush3.bf16.msra.mxu1 %v10520_v57 }
 0x41b   :  { %10541 = vmatprep.subr.bf16.mxu1 %v11417_v60 }
 0x4e8   :  { %v9779_v62 = vpop.f32.mrb[2].mxu1 }
 0x4e9   :  { %v11422_v63 = vadd.f32 %v9779_v62, %v9122_v61  ;;  %v678_v0 = vpop.f32.mrb[3].mxu1 }
 0x4ea   :  { %v11424_v1 = vadd.f32 %v9122_v61, %v678_v0  ;;  %v9140_v0 = vld [vmem:[%s11355_s4 + $0x20] sm:$0xff] }
 0x4eb   :  { %781 = vrot.lane.b32.xlu1 %v11422_v63, %s11183_s0 }
 0x4ec   :  { %779 = vrot.lane.b32.xlu0 %v11424_v1, %s11183_s0  ;;  %9788 = vmatprep.mubr.msk.f32.mxu0 %vm131_vm0, %v11424_v1 }
 0x4ed   :  { %9789 = vmatmul.mubr.msk.f32.vlgmr.msra.gmra.mrb[4].mxu0 %vm131_vm0, %v11422_v63 }
 0x4ee   :  { %10535 = vmatpush3.bf16.msra.mxu0 %v11417_v60 }
 0x4ef   :  { %10537 = vmatprep.subr.bf16.mxu0 %v11439_v4 }
 0x4f0   :  { %2702 = vrot.lane.b32.xlu0 %v11424_v1, %s11184_s9 }
 0x4f2   :  { %10539 = vmatpush3.bf16.msra.mxu0 %v11439_v4 }
 0x55d   :  { %v11445_v6 = vpop.permute.xlu1 %781 }
 0x55e   :  { %v11443_v5 = vpop.permute.xlu0 %779 }
 0x55f   :  { %9799 = vmatprep.mubr.msk.f32.mxu1 %vm131_vm0, %v11443_v5 }
 0x560   :  { %9800 = vmatmul.mubr.msk.f32.vlgmr.msra.gmra.mrb[4].mxu1 %vm131_vm0, %v11445_v6 }
 0x561   :  { %10543 = vmatpush3.bf16.msra.mxu1 %v11417_v60 }
 0x562   :  { %10545 = vmatprep.subr.bf16.mxu1 %v11439_v4 }
 0x565   :  { %10547 = vmatpush3.bf16.msra.mxu1 %v11439_v4 }
 0x5c0   :  { %v9790_v8 = vpop.f32.mrb[4].mxu0 }
 0x5c1   :  { %v776_v9 = vadd.f32 %v9790_v8, %v9125_v7  ;;  %v770_v10 = vpop.f32.mrb[5].mxu0  ;;  %v11489_v8 = vpack.c.bf16 %v9141_v2, %v9140_v0 }
 0x5c2   :  { %v771_v11 = vadd.f32 %v9125_v7, %v770_v10  ;;  %v9143_v10 = vld [vmem:[%s11355_s4 + $0x38] sm:$0xff] }
 0x5c3   :  { %v863_v13 = vmul.f32 %v776_v9, %v776_v9 }
 0x5c4   :  { %v862_v12 = vmul.f32 %v771_v11, %v771_v11 }
 0x5c6   :  { %9810 = vmatprep.mubr.msk.f32.mxu0 %vm131_vm0, %v862_v12  ;;  %v1070_v12 = vld [vmem:[%s11355_s4] sm:$0xff] }
 0x5c7   :  { %9811 = vmatmul.mubr.msk.f32.vlgmr.msra.gmra.mrb[6].mxu0 %vm131_vm0, %v863_v13  ;;  %v1071_v13 = vld [vmem:[%s11355_s4 + $0x8] sm:$0xff] }
 0x5c8   :  { %9828 = vmatprep.mubr.msk.f32.mxu0 %vm1074_vm2, %v1068_v19 }
 0x633   :  { %v9801_v14 = vpop.f32.mrb[4].mxu1 }
 0x634   :  { %v11457_v15 = vadd.f32 %v9801_v14, %v9125_v7  ;;  %v853_v16 = vpop.f32.mrb[5].mxu1  ;;  %v11508_v14 = vpack.c.bf16 %v1071_v13, %v1070_v12 }
 0x635   :  { %v11459_v33 = vadd.f32 %v9125_v7, %v853_v16  ;;  %v1073_v16 = vld [vmem:[%s11355_s4 + $0x18] sm:$0xff] }
 0x636   :  { %v966_v17 = vmul.f32 %v11457_v15, %v11457_v15 }
 0x637   :  { %v965_v37 = vmul.f32 %v11459_v33, %v11459_v33 }
 0x639   :  { %9821 = vmatprep.mubr.msk.f32.mxu1 %vm131_vm0, %v965_v37 }
 0x63a   :  { %9822 = vmatmul.mubr.msk.f32.vlgmr.msra.gmra.mrb[6].mxu1 %vm131_vm0, %v966_v17 }
 0x63b   :  { %9842 = vmatprep.mubr.msk.f32.mxu1 %vm1074_vm2, %v9138_v18 }
 0x69a   :  { %v9812_v20 = vpop.f32.mrb[6].mxu0 }
 0x69b   :  { %10977 = vrsqrt.f32 %v9812_v20  ;;  %v936_v21 = vpop.f32.mrb[7].mxu0  ;;  %vm954_vm3 = vcmp.eq.f32.partialorder %v9812_v20, inf  ;;  %v957_v25 = vand.u32 2147483648, %v9812_v20  ;;  %vm956_vm4 = vcmp.eq.f32.partialorder %v9812_v20, 0.0 }
 0x69c   :  { %10979 = vrsqrt.f32 %v936_v21  ;;  %vm947_vm5 = vcmp.eq.f32.partialorder %v936_v21, inf  ;;  %v950_v28 = vand.u32 2147483648, %v936_v21  ;;  %vm949_vm6 = vcmp.eq.f32.partialorder %v936_v21, 0.0 }
 0x6a5   :  { %v10978_v22 = vpop.eup %10977 }
 0x6a6   :  { %v10980_v23 = vpop.eup %10979  ;;  %v953_v24 = vmul.f32 %v10978_v22, %v9812_v20  ;;  %v9156_v22 = vld [vmem:[%s11350_s27 + $0x20] sm:$0xff] }
 0x6a7   :  { %v946_v26 = vmul.f32 %v10980_v23, %v936_v21 }
 0x6a8   :  { %v955_v27 = vsel %vm954_vm3, %v9812_v20, %v953_v24  ;;  %v9158_v20 = vld [vmem:[%s11355_s4 + $0x40] sm:$0xff]  ;;  %v9160_v24 = vld [vmem:[%s11355_s4 + $0x50] sm:$0xff] }
 0x6a9   :  { %v958_v29 = vsel %vm956_vm4, %v957_v25, %v955_v27  ;;  %v948_v30 = vsel %vm947_vm5, %v936_v21, %v946_v26  ;;  %v9159_v21 = vld [vmem:[%s11355_s4 + $0x48] sm:$0xff]  ;;  %v9161_v25 = vld [vmem:[%s11355_s4 + $0x58] sm:$0xff] }
 0x6aa   :  { %v960_v31 = vmax.f32 %v958_v29, 1e-12  ;;  %v951_v32 = vsel %vm949_vm6, %v950_v28, %v948_v30  ;;  %v11529_v23 = vpack.c.bf16 %v9159_v21, %v9158_v20  ;;  %v9157_v26 = vld [vmem:[%s11350_s27 + $0x28] sm:$0xff]  ;;  %v11538_v27 = vpack.c.bf16 %v9161_v25, %v9160_v24 }
 0x6ab   :  { %v959_v34 = vmax.f32 %v951_v32, 1e-12  ;;  %v9172_v32 = vld [vmem:[%s11355_s4 + $0x60] sm:$0xff]  ;;  %vm4662_vm6 = vcmask 523264  }
 0x6ac   :  { %10981 = vrcp.f32 %v960_v31 }
 0x6ad   :  { %10983 = vrcp.f32 %v959_v34  ;;  %v9173_v34 = vld [vmem:[%s11355_s4 + $0x68] sm:$0xff] }
 0x6b6   :  { %v10982_v35 = vpop.eup %10981 }
 0x6b7   :  { %v10984_v36 = vpop.eup %10983  ;;  %v964_v38 = vmul.f32 %v10982_v35, %v776_v9  ;;  %v9142_v9 = vld [vmem:[%s11355_s4 + $0x30] sm:$0xff] }
 0x6b8   :  { %v962_v39 = vmul.f32 %v10984_v36, %v771_v11  ;;  %v11498_v11 = vpack.c.bf16 %v9143_v10, %v9142_v9 }
 0x6ba   :  { %v11471_v40 = vpack.c.bf16 %v964_v38, %v962_v39  ;;  %v9170_v38 = vld [vmem:[%s11350_s27 + $0x30] sm:$0xff]  ;;  %v11564_v39 = vpack.c.bf16 %v9173_v34, %v9172_v32 }
 0x6bc   :  { %10549 = vmatprep.subr.bf16.mxu0 %v11471_v40  ;;  %10557 = vmatprep.subr.bf16.mxu1 %v11471_v40 }
 0x6bd   :  { %10551 = vmatpush3.bf16.msra.mxu0 %v11471_v40  ;;  %10559 = vmatpush3.bf16.msra.mxu1 %v11471_v40 }
 0x6c0   :  { %9843 = vmatmul.mubr.msk.f32.vlgmr.msra.gmra.mrb[8].mxu1 %vm1074_vm2, %v9139_v41  ;;  %9829 = vmatmul.mubr.msk.f32.vlgmr.msra.gmra.mrb[8].mxu0 %vm1074_vm2, %v1069_v42 }
 0x6c1   :  { %9871 = vmatprep.mubr.msk.f32.mxu1 %vm1074_vm2, %v9138_v18  ;;  %9835 = vmatprep.mubr.msk.f32.mxu0 %vm1074_vm2, %v1068_v19 }
 0x70d   :  { %v9823_v43 = vpop.f32.mrb[6].mxu1 }
 0x70e   :  { %10985 = vrsqrt.f32 %v9823_v43  ;;  %v1039_v44 = vpop.f32.mrb[7].mxu1  ;;  %vm1057_vm7 = vcmp.eq.f32.partialorder %v9823_v43, inf  ;;  %v1060_v48 = vand.u32 2147483648, %v9823_v43  ;;  %vm1059_vm8 = vcmp.eq.f32.partialorder %v9823_v43, 0.0 }
 0x70f   :  { %10987 = vrsqrt.f32 %v1039_v44  ;;  %vm1050_vm9 = vcmp.eq.f32.partialorder %v1039_v44, inf  ;;  %v1053_v52 = vand.u32 2147483648, %v1039_v44  ;;  %vm1052_vm10 = vcmp.eq.f32.partialorder %v1039_v44, 0.0 }
 0x718   :  { %v10986_v45 = vpop.eup %10985 }
 0x719   :  { %v10988_v46 = vpop.eup %10987  ;;  %v1056_v47 = vmul.f32 %v10986_v45, %v9823_v43 }
 0x71a   :  { %v1049_v49 = vmul.f32 %v10988_v46, %v1039_v44 }
 0x71b   :  { %v1058_v50 = vsel %vm1057_vm7, %v9823_v43, %v1056_v47  ;;  %v9171_v43 = vld [vmem:[%s11350_s27 + $0x38] sm:$0xff] }
 0x71c   :  { %v1061_v53 = vsel %vm1059_vm8, %v1060_v48, %v1058_v50  ;;  %v1051_v55 = vsel %vm1050_vm9, %v1039_v44, %v1049_v49  ;;  %v11185_v50 = vmov 0.0  }
 0x71d   :  { %v1063_v56 = vmax.f32 %v1061_v53, 1e-12  ;;  %v1054_v57 = vsel %vm1052_vm10, %v1053_v52, %v1051_v55 }
 0x71e   :  { %v1062_v58 = vmax.f32 %v1054_v57, 1e-12 }
 0x71f   :  { %10989 = vrcp.f32 %v1063_v56 }
 0x720   :  { %10991 = vrcp.f32 %v1062_v58  ;;  %v11618_v58 = vmul.f32 0.17677669, %v11424_v1 }
 0x729   :  { %v10990_v59 = vpop.eup %10989 }
 0x72a   :  { %v10992_v61 = vpop.eup %10991  ;;  %v1067_v62 = vmul.f32 %v10990_v59, %v11457_v15  ;;  %v1072_v15 = vld [vmem:[%s11355_s4 + $0x10] sm:$0xff] }
 0x72b   :  { %v1065_v3 = vmul.f32 %v10992_v61, %v11459_v33  ;;  %v11517_v18 = vpack.c.bf16 %v1073_v16, %v1072_v15  ;;  %v2703_v61 = vpop.permute.xlu0 %2702 }
 0x72d   :  { %v11487_v7 = vpack.c.bf16 %v1067_v62, %v1065_v3 }
 0x72f   :  { %10553 = vmatprep.subr.bf16.mxu0 %v11487_v7  ;;  %10577 = vmatprep.subr.bf16.mxu1 %v11487_v7 }
 0x730   :  { %10555 = vmatpush3.bf16.msra.mxu0 %v11487_v7  ;;  %10579 = vmatpush3.bf16.msra.mxu1 %v11487_v7 }
 0x731   :  { %10561 = vmatprep.subr.bf16.mxu0 %v11489_v8  ;;  %10581 = vmatprep.subr.bf16.mxu1 %v11489_v8 }
 0x733   :  { %9872 = vmatmul.mubr.msk.f32.vlgmr.msra.gmra.mrb[10].mxu1 %vm1074_vm2, %v9139_v41  ;;  %9836 = vmatmul.mubr.msk.f32.vlgmr.msra.gmra.mrb[10].mxu0 %vm1074_vm2, %v1069_v42  ;;  %v9174_v41 = vld [vmem:[%s11355_s4 + $0x70] sm:$0xff]  ;;  %v9175_v42 = vld [vmem:[%s11355_s4 + $0x78] sm:$0xff]  ;;  %s11197_s4 = smov 16  }
 0x734   :  { %10563 = vmatpush3.bf16.msra.mxu0 %v11489_v8  ;;  %10583 = vmatpush3.bf16.msra.mxu1 %v11489_v8  ;;  %v11574_v44 = vpack.c.bf16 %v9175_v42, %v9174_v41 }
 0x735   :  { %10565 = vmatprep.subr.bf16.mxu0 %v11498_v11  ;;  %10585 = vmatprep.subr.bf16.mxu1 %v11498_v11 }
 0x738   :  { %10567 = vmatpush3.bf16.msra.mxu0 %v11498_v11  ;;  %10587 = vmatpush3.bf16.msra.mxu1 %v11498_v11 }
 0x739   :  { %10569 = vmatprep.subr.bf16.mxu0 %v11508_v14  ;;  %10589 = vmatprep.subr.bf16.mxu1 %v11508_v14 }
 0x793   :  { %v9844_v33 = vpop.f32.mrb[8].mxu1  ;;  %v9830_v37 = vpop.f32.mrb[8].mxu0 }
 0x794   :  { %v1311_v17 = vpop.f32.mrb[9].mxu1  ;;  %v1147_v19 = vpop.f32.mrb[9].mxu0 }
 0x795   :  { %9853 = vmatprep.mubr.msk.f32.mxu0 %vm131_vm0, %v1311_v17 }
 0x796   :  { %9854 = vmatmul.mubr.msk.f32.vlgmr.msra.gmra.mrb[12].mxu0 %vm131_vm0, %v9844_v33 }
 0x797   :  { %10571 = vmatpush3.bf16.msra.mxu0 %v11508_v14  ;;  %9864 = vmatprep.mubr.msk.f32.mxu0 %vm131_vm0, %v1147_v19 }
 0x798   :  { %10573 = vmatprep.subr.bf16.mxu0 %v11517_v18 }
 0x79b   :  { %10575 = vmatpush3.bf16.msra.mxu0 %v11517_v18 }
 0x79c   :  { %10597 = vmatprep.subr.bf16.mxu0 %v11471_v40 }
 0x79e   :  { %9865 = vmatmul.mubr.msk.f32.vlgmr.msra.gmra.mrb[12].mxu0 %vm131_vm0, %v9830_v37 }
 0x79f   :  { %10599 = vmatpush3.bf16.msra.mxu0 %v11471_v40  ;;  %9900 = vmatprep.mubr.msk.f32.mxu0 %vm1074_vm2, %v9156_v22 }
 0x7a0   :  { %10601 = vmatprep.subr.bf16.mxu0 %v11529_v23 }
 0x7a2   :  { %9901 = vmatmul.mubr.msk.f32.vlgmr.msra.gmra.mrb[14].mxu0 %vm1074_vm2, %v9157_v26 }
 0x7a3   :  { %10603 = vmatpush3.bf16.msra.mxu0 %v11529_v23 }
 0x7a4   :  { %10605 = vmatprep.subr.bf16.mxu0 %v11538_v27 }
 0x7a7   :  { %10607 = vmatpush3.bf16.msra.mxu0 %v11538_v27 }
 0x7a8   :  { %10621 = vmatprep.subr.bf16.mxu0 %v11471_v40 }
 0x806   :  { %v9873_v28 = vpop.f32.mrb[10].mxu1  ;;  %v9837_v29 = vpop.f32.mrb[10].mxu0 }
 0x807   :  { %v1548_v30 = vpop.f32.mrb[11].mxu1  ;;  %v1222_v31 = vpop.f32.mrb[11].mxu0 }
 0x808   :  { %9882 = vmatprep.mubr.msk.f32.mxu1 %vm131_vm0, %v1548_v30 }
 0x809   :  { %9883 = vmatmul.mubr.msk.f32.vlgmr.msra.gmra.mrb[12].mxu1 %vm131_vm0, %v9873_v28 }
 0x80a   :  { %10591 = vmatpush3.bf16.msra.mxu1 %v11508_v14  ;;  %9893 = vmatprep.mubr.msk.f32.mxu1 %vm131_vm0, %v1222_v31 }
 0x80b   :  { %10593 = vmatprep.subr.bf16.mxu1 %v11517_v18 }
 0x80e   :  { %10595 = vmatpush3.bf16.msra.mxu1 %v11517_v18 }
 0x80f   :  { %10609 = vmatprep.subr.bf16.mxu1 %v11487_v7 }
 0x811   :  { %9894 = vmatmul.mubr.msk.f32.vlgmr.msra.gmra.mrb[12].mxu1 %vm131_vm0, %v9837_v29 }
 0x812   :  { %10611 = vmatpush3.bf16.msra.mxu1 %v11487_v7  ;;  %9918 = vmatprep.mubr.msk.f32.mxu1 %vm1074_vm2, %v9156_v22 }
 0x813   :  { %10613 = vmatprep.subr.bf16.mxu1 %v11529_v23 }
 0x815   :  { %9919 = vmatmul.mubr.msk.f32.vlgmr.msra.gmra.mrb[14].mxu1 %vm1074_vm2, %v9157_v26 }
 0x816   :  { %10615 = vmatpush3.bf16.msra.mxu1 %v11529_v23 }
 0x817   :  { %10617 = vmatprep.subr.bf16.mxu1 %v11538_v27 }
 0x81a   :  { %10619 = vmatpush3.bf16.msra.mxu1 %v11538_v27 }
 0x81b   :  { %10633 = vmatprep.subr.bf16.mxu1 %v11487_v7 }
 0x875   :  { %v9902_v35 = vpop.f32.mrb[14].mxu0 }
 0x876   :  { %v1799_v36 = vpop.f32.mrb[15].mxu0 }
 0x877   :  { %9911 = vmatprep.mubr.msk.f32.mxu0 %vm131_vm0, %v1799_v36 }
 0x878   :  { %9912 = vmatmul.mubr.msk.f32.vlgmr.msra.gmra.mrb[12].mxu0 %vm131_vm0, %v9902_v35 }
 0x879   :  { %10623 = vmatpush3.bf16.msra.mxu0 %v11471_v40  ;;  %9936 = vmatprep.mubr.msk.f32.mxu0 %vm1074_vm2, %v9170_v38 }
 0x87a   :  { %10625 = vmatprep.subr.bf16.mxu0 %v11564_v39 }
 0x87c   :  { %9937 = vmatmul.mubr.msk.f32.vlgmr.msra.gmra.mrb[16].mxu0 %vm1074_vm2, %v9171_v43 }
 0x87d   :  { %10627 = vmatpush3.bf16.msra.mxu0 %v11564_v39 }
 0x87e   :  { %10629 = vmatprep.subr.bf16.mxu0 %v11574_v44 }
 0x881   :  { %10631 = vmatpush3.bf16.msra.mxu0 %v11574_v44 }
 0x882   :  { %9968 = vmatprep.subr.mxu0 %v11185_v50 }
 0x8e8   :  { %v9920_v45 = vpop.f32.mrb[14].mxu1 }
 0x8e9   :  { %v1957_v46 = vpop.f32.mrb[15].mxu1 }
 0x8ea   :  { %9929 = vmatprep.mubr.msk.f32.mxu1 %vm131_vm0, %v1957_v46 }
 0x8eb   :  { %9930 = vmatmul.mubr.msk.f32.vlgmr.msra.gmra.mrb[12].mxu1 %vm131_vm0, %v9920_v45 }
 0x8ec   :  { %10635 = vmatpush3.bf16.msra.mxu1 %v11487_v7  ;;  %9954 = vmatprep.mubr.msk.f32.mxu1 %vm1074_vm2, %v9170_v38 }
 0x8ed   :  { %10637 = vmatprep.subr.bf16.mxu1 %v11564_v39 }
 0x8ef   :  { %9955 = vmatmul.mubr.msk.f32.vlgmr.msra.gmra.mrb[16].mxu1 %vm1074_vm2, %v9171_v43 }
 0x8f0   :  { %10639 = vmatpush3.bf16.msra.mxu1 %v11564_v39 }
 0x8f1   :  { %10641 = vmatprep.subr.bf16.mxu1 %v11574_v44 }
 0x8f4   :  { %10643 = vmatpush3.bf16.msra.mxu1 %v11574_v44 }
 0x8f5   :  { %9978 = vmatprep.subr.mxu1 %v11185_v50 }
 0x94f   :  { %v9938_v40 = vpop.f32.mrb[16].mxu0 }
 0x950   :  { %v2129_v47 = vpop.f32.mrb[17].mxu0 }
 0x951   :  { %9947 = vmatprep.mubr.msk.f32.mxu0 %vm131_vm0, %v2129_v47 }
 0x952   :  { %9948 = vmatmul.mubr.msk.f32.vlgmr.msra.gmra.mrb[12].mxu0 %vm131_vm0, %v9938_v40 }
 0x953   :  { %9970 = vmatprep.mubr.msk.f32.mxu0 %vm11186_vm11, %v11185_v50 }
 0x9c2   :  { %v9956_v48 = vpop.f32.mrb[16].mxu1 }
 0x9c3   :  { %v2287_v49 = vpop.f32.mrb[17].mxu1 }
 0x9c4   :  { %9965 = vmatprep.mubr.msk.f32.mxu1 %vm131_vm0, %v2287_v49 }
 0x9c5   :  { %9966 = vmatmul.mubr.msk.f32.vlgmr.msra.gmra.mrb[12].mxu1 %vm131_vm0, %v9956_v48 }
 0x9c6   :  { %9980 = vmatprep.mubr.msk.f32.mxu1 %vm11186_vm11, %v11185_v50 }
 0xa25   :  { %v11599_v52 = vpop.f32.mrb[12].mxu0 }
 0xa26   :  { %v2210_v53 = vpop.f32.mrb[13].mxu0 }
 0xa27   :  { %v11605_v57 = vmul.f32 0.125, %v2210_v53 }
 0xa98   :  { %v11601_v55 = vpop.f32.mrb[12].mxu1 }
 0xa99   :  { %v2368_v56 = vpop.f32.mrb[13].mxu1 }
 0xa9a   :  { %2624 = vrot.lane.b32.xlu1 %v2368_v56, %s11187_s13  ;;  %9969 = vmatpush3.xpose.msk.msra.mxu0 %vm2383_vm12, %v2368_v56 }
 0xa9b   :  { %9973 = vmatprep.subr.mxu0 %v11185_v50 }
 0xa9d   :  { %9971 = vmatmul.mubr.msk.f32.vlgmr.msra.gmra.mrb[18].mxu0 %vm2383_vm12, %v11605_v57 }
 0xa9e   :  { %2622 = vrot.lane.b32.xlu1 %v11605_v57, %s11187_s13  ;;  %9974 = vmatpush3.xpose.msk.msra.mxu0 %vm2383_vm12, %v11443_v5 }
 0xa9f   :  { %9975 = vmatprep.mubr.msk.f32.mxu0 %vm11186_vm11, %v11185_v50  ;;  %9983 = vmatprep.subr.mxu0 %v11185_v50 }
 0xaa2   :  { %2700 = vrot.lane.b32.xlu1 %v11618_v58, %s11187_s13 }
 0xaa5   :  { %9976 = vmatmul.mubr.msk.f32.vlgmr.msra.gmra.mrb[18].mxu0 %vm2383_vm12, %v11618_v58 }
 0xaa6   :  { %9985 = vmatprep.mubr.msk.f32.mxu0 %vm11186_vm11, %v11185_v50 }
 0xb0c   :  { %v2625_v59 = vpop.permute.xlu1 %2624 }
 0xb0d   :  { %9984 = vmatpush3.xpose.msk.msra.mxu0 %vm2383_vm12, %v2625_v59 }
 0xb0e   :  { %9988 = vmatprep.subr.mxu0 %v11185_v50 }
 0xb10   :  { %v2623_v5 = vpop.permute.xlu1 %2622 }
 0xb11   :  { %9986 = vmatmul.mubr.msk.f32.vlgmr.msra.gmra.mrb[20].mxu0 %vm2383_vm12, %v2623_v5 }
 0xb12   :  { %9989 = vmatpush3.xpose.msk.msra.mxu0 %vm2383_vm12, %v2703_v61  ;;  %9990 = vmatprep.mubr.msk.f32.mxu0 %vm11186_vm11, %v11185_v50 }
 0xb13   :  { %10008 = vmatprep.subr.mxu0 %v11185_v50 }
 0xb14   :  { %v2701_v62 = vpop.permute.xlu1 %2700 }
 0xb19   :  { %9991 = vmatmul.mubr.msk.f32.vlgmr.msra.gmra.mrb[20].mxu0 %vm2383_vm12, %v2701_v62 }
 0xb1a   :  { %10010 = vmatprep.mubr.msk.f32.mxu0 %vm11186_vm11, %v11185_v50 }
 0xb78   :  { %v2531_v0 = vpop.f32.mrb[18].mxu0 }
 0xb79   :  { %v9977_v2 = vpop.f32.mrb[19].mxu0  ;;  %v2535_v3 = vsel %vm2383_vm12, %v2531_v0, -inf }
 0xb7a   :  { %2536 = vmax.xlane.f32.xlu0 %v2535_v3 }
 0xbec   :  { %v2774_v7 = vpop.f32.mrb[20].mxu0 }
 0xbed   :  { %v9992_v9 = vpop.f32.mrb[21].mxu0  ;;  %v2778_v10 = vsel %vm2383_vm12, %v2774_v7, -inf }
 0xbee   :  { %2779 = vmax.xlane.f32.xlu1 %v2778_v10 }
 0xbff   :  { %2789 = vrot.lane.b32.xlu1 %v11424_v1, %s11188_s17 }
 0xc03   :  { %2867 = vrot.lane.b32.xlu1 %v2368_v56, %s11189_s21 }
 0xc07   :  { %v2537_v12 = vpop.xlane.xlu0 %2536  ;;  %2865 = vrot.lane.b32.xlu1 %v11605_v57, %s11189_s21 }
 0xc08   :  { %v2538_v13 = vsub.f32 %v2531_v0, %v2537_v12 }
 0xc0a   :  { %v2539_v15 = vmul.f32 1.442695, %v2538_v13 }
 0xc0b   :  { %2943 = vrot.lane.b32.xlu1 %v11618_v58, %s11189_s21 }
 0xc0c   :  { %10993 = vpow2.f32 %v2539_v15 }
 0xc0f   :  { %3110 = vrot.lane.b32.xlu1 %v2368_v56, %s11190_s25 }
 0xc16   :  { %v10994_v16 = vpop.eup %10993 }
 0xc17   :  { %v2541_v33 = vsel %vm2383_vm12, %v10994_v16, 0.0 }
 0xc18   :  { %2542 = vadd.xlane.f32.xlu0 %v2541_v33 }
 0xc7b   :  { %v2780_v37 = vpop.xlane.xlu1 %2779 }
 0xc7c   :  { %v2781_v17 = vsub.f32 %v2774_v7, %v2780_v37 }
 0xc7e   :  { %v2782_v19 = vmul.f32 1.442695, %v2781_v17  ;;  %v11707_v17 = vmul.f32 0.125, %v11599_v52 }
 0xc7f   :  { %v2790_v29 = vpop.permute.xlu1 %2789 }
 0xc80   :  { %10995 = vpow2.f32 %v2782_v19  ;;  %v11712_v19 = vmul.f32 0.17677669, %v11422_v63 }
 0xc83   :  { %v2868_v31 = vpop.permute.xlu1 %2867 }
 0xc87   :  { %v2866_v34 = vpop.permute.xlu1 %2865 }
 0xc8a   :  { %v10996_v20 = vpop.eup %10995 }
 0xc8b   :  { %v2784_v21 = vsel %vm2383_vm12, %v10996_v20, 0.0  ;;  %v2944_v36 = vpop.permute.xlu1 %2943 }
 0xc8c   :  { %2785 = vadd.xlane.f32.xlu0 %v2784_v21 }
 0xca2   :  { %2546 = vrot.lane.b32.xlu0 %v11424_v1, %s11191_s29 }
 0xca5   :  { %v2543_v22 = vpop.xlane.xlu0 %2542 }
 0xca6   :  { %2945 = vrot.lane.b32.xlu0 %v11424_v1, %s11192_s3  ;;  %10997 = vrcp.f32 %v2543_v22 }
 0xcb0   :  { %v10998_v25 = vpop.eup %10997 }
 0xcb1   :  { %v2545_v28 = vmul.f32 %v10998_v25, %v10994_v16 }
 0xd19   :  { %v2786_v24 = vpop.xlane.xlu0 %2785 }
 0xd1a   :  { %10999 = vrcp.f32 %v2786_v24 }
 0xd1d   :  { %v2547_v26 = vpop.permute.xlu0 %2546 }
 0xd1e   :  { %9979 = vmatpush3.msra.mxu1 %v2547_v26 }
 0xd1f   :  { %9981 = vmatmul.mubr.msk.f32.vlgmr.msra.gmra.mrb[18].mxu1 %vm2383_vm12, %v2545_v28  ;;  %9993 = vmatprep.subr.mxu1 %v11185_v50 }
 0xd20   :  { %9994 = vmatpush3.msra.mxu1 %v2790_v29  ;;  %9995 = vmatprep.mubr.msk.f32.mxu1 %vm11186_vm11, %v11185_v50 }
 0xd21   :  { %9998 = vmatprep.subr.mxu1 %v11185_v50  ;;  %v2946_v35 = vpop.permute.xlu0 %2945 }
 0xd24   :  { %v11000_v30 = vpop.eup %10999 }
 0xd25   :  { %v2788_v32 = vmul.f32 %v11000_v30, %v10996_v20 }
 0xd27   :  { %9996 = vmatmul.mubr.msk.f32.vlgmr.msra.gmra.mrb[20].mxu1 %vm2383_vm12, %v2788_v32 }
 0xd28   :  { %9999 = vmatpush3.xpose.msk.msra.mxu1 %vm2383_vm12, %v2868_v31  ;;  %10000 = vmatprep.mubr.msk.f32.mxu1 %vm11186_vm11, %v11185_v50 }
 0xd29   :  { %10003 = vmatprep.subr.mxu1 %v11185_v50 }
 0xd2b   :  { %10001 = vmatmul.mubr.msk.f32.vlgmr.msra.gmra.mrb[22].mxu1 %vm2383_vm12, %v2866_v34 }
 0xd2c   :  { %10004 = vmatpush3.xpose.msk.msra.mxu1 %vm2383_vm12, %v2946_v35  ;;  %10005 = vmatprep.mubr.msk.f32.mxu1 %vm11186_vm11, %v11185_v50 }
 0xd2d   :  { %10023 = vmatprep.subr.mxu1 %v11185_v50 }
 0xd33   :  { %10006 = vmatmul.mubr.msk.f32.vlgmr.msra.gmra.mrb[22].mxu1 %vm2383_vm12, %v2944_v36 }
 0xd34   :  { %10025 = vmatprep.mubr.msk.f32.mxu1 %vm11186_vm11, %v11185_v50 }
 0xdf2   :  { %v11670_v38 = vpop.f32.mrb[18].mxu1 }
 0xdf3   :  { %v9982_v41 = vpop.f32.mrb[19].mxu1 }
 0xdfa   :  { %v11672_v42 = vpop.f32.mrb[20].mxu1 }
 0xdfb   :  { %v9997_v43 = vpop.f32.mrb[21].mxu1 }
 0xe06   :  { %v3017_v45 = vpop.f32.mrb[22].mxu1 }
 0xe07   :  { %v10007_v46 = vpop.f32.mrb[23].mxu1  ;;  %v3021_v40 = vsel %vm2383_vm12, %v3017_v45, -inf }
 0xe08   :  { %3022 = vmax.xlane.f32.xlu0 %v3021_v40 }
 0xe1e   :  { %3032 = vrot.lane.b32.xlu0 %v11424_v1, %s11193_s8 }
 0xe22   :  { %3108 = vrot.lane.b32.xlu0 %v11605_v57, %s11190_s25  ;;  %v3111_v57 = vpop.permute.xlu1 %3110 }
 0xe26   :  { %3186 = vrot.lane.b32.xlu0 %v11618_v58, %s11190_s25 }
 0xe95   :  { %v3023_v47 = vpop.xlane.xlu0 %3022 }
 0xe96   :  { %v3024_v48 = vsub.f32 %v3017_v45, %v3023_v47 }
 0xe98   :  { %v3025_v49 = vmul.f32 1.442695, %v3024_v48 }
 0xe99   :  { %v3033_v53 = vpop.permute.xlu0 %3032 }
 0xe9a   :  { %11001 = vpow2.f32 %v3025_v49  ;;  %10009 = vmatpush3.msra.mxu0 %v3033_v53 }
 0xe9b   :  { %10013 = vmatprep.subr.mxu0 %v11185_v50 }
 0xe9d   :  { %v3109_v62 = vpop.permute.xlu0 %3108 }
 0xea1   :  { %v3187_v2 = vpop.permute.xlu0 %3186 }
 0xea4   :  { %v11002_v56 = vpop.eup %11001 }
 0xea5   :  { %v3027_v59 = vsel %vm2383_vm12, %v11002_v56, 0.0 }
 0xea6   :  { %3028 = vadd.xlane.f32.xlu1 %v3027_v59 }
 0xeb7   :  { %3188 = vrot.lane.b32.xlu1 %v11424_v1, %s11194_s14 }
 0xf33   :  { %v3029_v5 = vpop.xlane.xlu1 %3028 }
 0xf34   :  { %11003 = vrcp.f32 %v3029_v5 }
 0xf37   :  { %v3189_v0 = vpop.permute.xlu1 %3188 }
 0xf3e   :  { %v11004_v58 = vpop.eup %11003 }
 0xf3f   :  { %v3031_v61 = vmul.f32 %v11004_v58, %v11002_v56 }
 0xf41   :  { %10011 = vmatmul.mubr.msk.f32.vlgmr.msra.gmra.mrb[22].mxu0 %vm2383_vm12, %v3031_v61 }
 0xf42   :  { %10014 = vmatpush3.xpose.msk.msra.mxu0 %vm2383_vm12, %v3111_v57  ;;  %10015 = vmatprep.mubr.msk.f32.mxu0 %vm11186_vm11, %v11185_v50 }
 0xf43   :  { %10018 = vmatprep.subr.mxu0 %v11185_v50 }
 0xf45   :  { %10016 = vmatmul.mubr.msk.f32.vlgmr.msra.gmra.mrb[24].mxu0 %vm2383_vm12, %v3109_v62 }
 0xf46   :  { %10019 = vmatpush3.xpose.msk.msra.mxu0 %vm2383_vm12, %v3189_v0  ;;  %10020 = vmatprep.mubr.msk.f32.mxu0 %vm11186_vm11, %v11185_v50 }
 0xf47   :  { %10038 = vmatprep.subr.mxu0 %v11185_v50 }
 0xf4d   :  { %10021 = vmatmul.mubr.msk.f32.vlgmr.msra.gmra.mrb[24].mxu0 %vm2383_vm12, %v3187_v2 }
 0xf4e   :  { %10040 = vmatprep.mubr.msk.f32.mxu0 %vm11186_vm11, %v11185_v50 }
0x1014   :  { %v11698_v3 = vpop.f32.mrb[22].mxu0 }
0x1015   :  { %v10012_v7 = vpop.f32.mrb[23].mxu0 }
0x1020   :  { %v3260_v9 = vpop.f32.mrb[24].mxu0 }
0x1021   :  { %v10022_v10 = vpop.f32.mrb[25].mxu0  ;;  %v3264_v12 = vsel %vm2383_vm12, %v3260_v9, -inf }
0x1022   :  { %3265 = vmax.xlane.f32.xlu1 %v3264_v12 }
0x10af   :  { %v3266_v13 = vpop.xlane.xlu1 %3265 }
0x10b0   :  { %v3267_v15 = vsub.f32 %v3260_v9, %v3266_v13 }
0x10b2   :  { %v3268_v16 = vmul.f32 1.442695, %v3267_v15 }
0x10b4   :  { %11005 = vpow2.f32 %v3268_v16 }
0x10be   :  { %v11006_v33 = vpop.eup %11005 }
0x10bf   :  { %v3270_v37 = vsel %vm2383_vm12, %v11006_v33, 0.0 }
0x10c0   :  { %3271 = vadd.xlane.f32.xlu0 %v3270_v37 }
0x10d6   :  { %3275 = vrot.lane.b32.xlu0 %v11424_v1, %s11195_s19 }
0x10da   :  { %3607 = vrot.lane.b32.xlu0 %v11601_v55, %s11187_s13 }
0x10de   :  { %3605 = vrot.lane.b32.xlu0 %v11707_v17, %s11187_s13 }
0x10e2   :  { %3683 = vrot.lane.b32.xlu0 %v11712_v19, %s11187_s13 }
0x114d   :  { %v3272_v20 = vpop.xlane.xlu0 %3271 }
0x114e   :  { %11007 = vrcp.f32 %v3272_v20 }
0x1151   :  { %v3276_v21 = vpop.permute.xlu0 %3275 }
0x1152   :  { %10024 = vmatpush3.msra.mxu1 %v3276_v21 }
0x1153   :  { %10028 = vmatprep.subr.mxu1 %v11185_v50 }
0x1155   :  { %v3608_v41 = vpop.permute.xlu0 %3607 }
0x1158   :  { %v11008_v1 = vpop.eup %11007 }
0x1159   :  { %v3274_v22 = vmul.f32 %v11008_v1, %v11006_v33  ;;  %v3606_v45 = vpop.permute.xlu0 %3605 }
0x115b   :  { %10026 = vmatmul.mubr.msk.f32.vlgmr.msra.gmra.mrb[24].mxu1 %vm2383_vm12, %v3274_v22 }
0x115c   :  { %10029 = vmatpush3.xpose.msk.msra.mxu1 %vm2383_vm12, %v11601_v55  ;;  %10030 = vmatprep.mubr.msk.f32.mxu1 %vm11186_vm11, %v11185_v50 }
0x115d   :  { %10033 = vmatprep.subr.mxu1 %v11185_v50  ;;  %v3684_v40 = vpop.permute.xlu0 %3683 }
0x115f   :  { %10031 = vmatmul.mubr.msk.f32.vlgmr.msra.gmra.mrb[26].mxu1 %vm2383_vm12, %v11707_v17 }
0x1160   :  { %10034 = vmatpush3.xpose.msk.msra.mxu1 %vm2383_vm12, %v11445_v6  ;;  %10035 = vmatprep.mubr.msk.f32.mxu1 %vm11186_vm11, %v11185_v50 }
0x1161   :  { %10053 = vmatprep.subr.mxu1 %v11185_v50 }
0x1167   :  { %10036 = vmatmul.mubr.msk.f32.vlgmr.msra.gmra.mrb[26].mxu1 %vm2383_vm12, %v11712_v19 }
0x1168   :  { %10055 = vmatprep.mubr.msk.f32.mxu1 %vm11186_vm11, %v11185_v50 }
0x122e   :  { %v11734_v52 = vpop.f32.mrb[24].mxu1 }
0x122f   :  { %v10027_v24 = vpop.f32.mrb[25].mxu1 }
0x123a   :  { %v3514_v25 = vpop.f32.mrb[26].mxu1 }
0x123b   :  { %v10037_v26 = vpop.f32.mrb[27].mxu1  ;;  %v3518_v28 = vsel %vm2383_vm12, %v3514_v25, -inf }
0x123c   :  { %3519 = vmax.xlane.f32.xlu1 %v3518_v28 }
0x124d   :  { %3529 = vrot.lane.b32.xlu1 %v11422_v63, %s11191_s29 }
0x12c9   :  { %v3520_v6 = vpop.xlane.xlu1 %3519 }
0x12ca   :  { %v3521_v29 = vsub.f32 %v3514_v25, %v3520_v6 }
0x12cc   :  { %v3522_v30 = vmul.f32 1.442695, %v3521_v29 }
0x12cd   :  { %v3530_v31 = vpop.permute.xlu1 %3529 }
0x12ce   :  { %11009 = vpow2.f32 %v3522_v30  ;;  %10039 = vmatpush3.msra.mxu0 %v3530_v31 }
0x12cf   :  { %10043 = vmatprep.subr.mxu0 %v11185_v50 }
0x12d8   :  { %v11010_v32 = vpop.eup %11009 }
0x12d9   :  { %v3524_v34 = vsel %vm2383_vm12, %v11010_v32, 0.0 }
0x12da   :  { %3525 = vadd.xlane.f32.xlu1 %v3524_v34 }
0x12eb   :  { %3685 = vrot.lane.b32.xlu1 %v11422_v63, %s11184_s9 }
0x1367   :  { %v3526_v35 = vpop.xlane.xlu1 %3525 }
0x1368   :  { %11011 = vrcp.f32 %v3526_v35 }
0x136b   :  { %v3686_v46 = vpop.permute.xlu1 %3685 }
0x1372   :  { %v11012_v36 = vpop.eup %11011 }
0x1373   :  { %v3528_v43 = vmul.f32 %v11012_v36, %v11010_v32 }
0x1375   :  { %10041 = vmatmul.mubr.msk.f32.vlgmr.msra.gmra.mrb[26].mxu0 %vm2383_vm12, %v3528_v43 }
0x1376   :  { %10044 = vmatpush3.xpose.msk.msra.mxu0 %vm2383_vm12, %v3608_v41  ;;  %10045 = vmatprep.mubr.msk.f32.mxu0 %vm11186_vm11, %v11185_v50 }
0x1377   :  { %10048 = vmatprep.subr.mxu0 %v11185_v50 }
0x1379   :  { %10046 = vmatmul.mubr.msk.f32.vlgmr.msra.gmra.mrb[28].mxu0 %vm2383_vm12, %v3606_v45 }
0x137a   :  { %10049 = vmatpush3.xpose.msk.msra.mxu0 %vm2383_vm12, %v3686_v46  ;;  %10050 = vmatprep.mubr.msk.f32.mxu0 %vm11186_vm11, %v11185_v50 }
0x137b   :  { %10068 = vmatprep.subr.mxu0 %v11185_v50 }
0x1381   :  { %10051 = vmatmul.mubr.msk.f32.vlgmr.msra.gmra.mrb[28].mxu0 %vm2383_vm12, %v3684_v40 }
0x1382   :  { %10070 = vmatprep.mubr.msk.f32.mxu0 %vm11186_vm11, %v11185_v50 }
0x1448   :  { %v11756_v47 = vpop.f32.mrb[26].mxu0 }
0x1449   :  { %v10042_v48 = vpop.f32.mrb[27].mxu0 }
0x1454   :  { %v3757_v49 = vpop.f32.mrb[28].mxu0 }
0x1455   :  { %v10052_v53 = vpop.f32.mrb[29].mxu0  ;;  %v3761_v56 = vsel %vm2383_vm12, %v3757_v49, -inf }
0x1456   :  { %3762 = vmax.xlane.f32.xlu1 %v3761_v56 }
0x1467   :  { %3850 = vrot.lane.b32.xlu1 %v11601_v55, %s11189_s21 }
0x146b   :  { %3848 = vrot.lane.b32.xlu1 %v11707_v17, %s11189_s21 }
0x146f   :  { %3926 = vrot.lane.b32.xlu1 %v11712_v19, %s11189_s21 }
0x1473   :  { %4093 = vrot.lane.b32.xlu1 %v11601_v55, %s11190_s25 }
0x14e3   :  { %v3763_v59 = vpop.xlane.xlu1 %3762 }
0x14e4   :  { %v3764_v57 = vsub.f32 %v3757_v49, %v3763_v59 }
0x14e6   :  { %v3765_v5 = vmul.f32 1.442695, %v3764_v57 }
0x14e7   :  { %v3851_v2 = vpop.permute.xlu1 %3850 }
0x14e8   :  { %11013 = vpow2.f32 %v3765_v5  ;;  %v4349_v5 = vld [vmem:[%s12358_s16] sm:$0xff] }
0x14eb   :  { %v3849_v9 = vpop.permute.xlu1 %3848 }
0x14ef   :  { %v3927_v12 = vpop.permute.xlu1 %3926 }
0x14f2   :  { %v11014_v58 = vpop.eup %11013 }
0x14f3   :  { %v3767_v61 = vsel %vm2383_vm12, %v11014_v58, 0.0  ;;  %v4094_v26 = vpop.permute.xlu1 %4093 }
0x14f4   :  { %3768 = vadd.xlane.f32.xlu0 %v3767_v61  ;;  %v4351_v61 = vld [vmem:[%s12358_s16 + $0x10] sm:$0xff] }
0x150a   :  { %3772 = vrot.lane.b32.xlu0 %v11422_v63, %s11188_s17 }
0x150e   :  { %3928 = vrot.lane.b32.xlu0 %v11422_v63, %s11192_s3 }
0x1581   :  { %v3769_v62 = vpop.xlane.xlu0 %3768 }
0x1582   :  { %11015 = vrcp.f32 %v3769_v62 }
0x1585   :  { %v3773_v0 = vpop.permute.xlu0 %3772 }
0x1586   :  { %10054 = vmatpush3.msra.mxu1 %v3773_v0  ;;  %v4352_v0 = vld [vmem:[%s12358_s16 + $0x18] sm:$0xff] }
0x1587   :  { %10058 = vmatprep.subr.mxu1 %v11185_v50 }
0x1589   :  { %v3929_v10 = vpop.permute.xlu0 %3928 }
0x158c   :  { %v11016_v55 = vpop.eup %11015 }
0x158d   :  { %v3771_v7 = vmul.f32 %v11016_v55, %v11014_v58  ;;  %v4350_v58 = vld [vmem:[%s12358_s16 + $0x8] sm:$0xff]  ;;  %v10648_v55 = vpack.c.bf16 %v4352_v0, %v4351_v61 }
0x158e   :  { %v10644_v62 = vpack.c.bf16 %v4350_v58, %v4349_v5 }
0x158f   :  { %10056 = vmatmul.mubr.msk.f32.vlgmr.msra.gmra.mrb[28].mxu1 %vm2383_vm12, %v3771_v7 }
0x1590   :  { %10059 = vmatpush3.xpose.msk.msra.mxu1 %vm2383_vm12, %v3851_v2  ;;  %10060 = vmatprep.mubr.msk.f32.mxu1 %vm11186_vm11, %v11185_v50 }
0x1591   :  { %10063 = vmatprep.subr.mxu1 %v11185_v50 }
0x1593   :  { %10061 = vmatmul.mubr.msk.f32.vlgmr.msra.gmra.mrb[30].mxu1 %vm2383_vm12, %v3849_v9 }
0x1594   :  { %10064 = vmatpush3.xpose.msk.msra.mxu1 %vm2383_vm12, %v3929_v10  ;;  %10065 = vmatprep.mubr.msk.f32.mxu1 %vm11186_vm11, %v11185_v50 }
0x1595   :  { %10083 = vmatprep.subr.mxu1 %v11185_v50 }
0x159b   :  { %10066 = vmatmul.mubr.msk.f32.vlgmr.msra.gmra.mrb[30].mxu1 %vm2383_vm12, %v3927_v12 }
0x159c   :  { %10085 = vmatprep.mubr.msk.f32.mxu1 %vm11186_vm11, %v11185_v50 }
0x1662   :  { %v3844_v13 = vpop.f32.mrb[28].mxu1 }
0x1663   :  { %v10057_v15 = vpop.f32.mrb[29].mxu1 }
0x166e   :  { %v4000_v16 = vpop.f32.mrb[30].mxu1 }
0x166f   :  { %v10067_v33 = vpop.f32.mrb[31].mxu1  ;;  %v4004_v37 = vsel %vm2383_vm12, %v4000_v16, -inf }
0x1670   :  { %4005 = vmax.xlane.f32.xlu0 %v4004_v37 }
0x1686   :  { %4015 = vrot.lane.b32.xlu0 %v11422_v63, %s11193_s8 }
0x168a   :  { %4091 = vrot.lane.b32.xlu0 %v11707_v17, %s11190_s25 }
0x168e   :  { %4169 = vrot.lane.b32.xlu0 %v11712_v19, %s11190_s25 }
0x16fd   :  { %v4006_v20 = vpop.xlane.xlu0 %4005 }
0x16fe   :  { %v4007_v21 = vsub.f32 %v4000_v16, %v4006_v20  ;;  %v9224_v16 = vld [vmem:[%s12359_s18] ss:$0 sm:$0xff] }
0x1700   :  { %v4008_v1 = vmul.f32 1.442695, %v4007_v21 }
0x1701   :  { %v4016_v22 = vpop.permute.xlu0 %4015 }
0x1702   :  { %11017 = vpow2.f32 %v4008_v1  ;;  %10069 = vmatpush3.msra.mxu0 %v4016_v22 }
0x1703   :  { %10073 = vmatprep.subr.mxu0 %v11185_v50 }
0x1705   :  { %v4092_v6 = vpop.permute.xlu0 %4091 }
0x1709   :  { %v4170_v30 = vpop.permute.xlu0 %4169 }
0x170c   :  { %v11018_v24 = vpop.eup %11017 }
0x170d   :  { %v4010_v25 = vsel %vm2383_vm12, %v11018_v24, 0.0 }
0x170e   :  { %4011 = vadd.xlane.f32.xlu1 %v4010_v25 }
0x171f   :  { %4171 = vrot.lane.b32.xlu1 %v11422_v63, %s11194_s14 }
0x179b   :  { %v4012_v17 = vpop.xlane.xlu1 %4011 }
0x179c   :  { %11019 = vrcp.f32 %v4012_v17 }
0x179f   :  { %v4172_v29 = vpop.permute.xlu1 %4171 }
0x17a6   :  { %v11020_v28 = vpop.eup %11019 }
0x17a7   :  { %v4014_v19 = vmul.f32 %v11020_v28, %v11018_v24 }
0x17a9   :  { %10071 = vmatmul.mubr.msk.f32.vlgmr.msra.gmra.mrb[30].mxu0 %vm2383_vm12, %v4014_v19 }
0x17aa   :  { %10074 = vmatpush3.xpose.msk.msra.mxu0 %vm2383_vm12, %v4094_v26  ;;  %10075 = vmatprep.mubr.msk.f32.mxu0 %vm11186_vm11, %v11185_v50 }
0x17ab   :  { %10078 = vmatprep.subr.mxu0 %v11185_v50 }
0x17ad   :  { %10076 = vmatmul.mubr.msk.f32.vlgmr.msra.gmra.mrb[32].mxu0 %vm2383_vm12, %v4092_v6 }
0x17ae   :  { %10079 = vmatpush3.xpose.msk.msra.mxu0 %vm2383_vm12, %v4172_v29  ;;  %10080 = vmatprep.mubr.msk.f32.mxu0 %vm11186_vm11, %v11185_v50 }
0x17b5   :  { %10081 = vmatmul.mubr.msk.f32.vlgmr.msra.gmra.mrb[32].mxu0 %vm2383_vm12, %v4170_v30 }
0x187c   :  { %v4087_v31 = vpop.f32.mrb[30].mxu0 }
0x187d   :  { %v10072_v32 = vpop.f32.mrb[31].mxu0 }
0x187e   :  { %v4502_v32 = vld [vmem:[%s12360_s22 + $0x8] sm:$0xff] }
0x1888   :  { %v4243_v34 = vpop.f32.mrb[32].mxu0 }
0x1889   :  { %v10082_v35 = vpop.f32.mrb[33].mxu0  ;;  %v4247_v36 = vsel %vm2383_vm12, %v4243_v34, -inf }
0x188a   :  { %4248 = vmax.xlane.f32.xlu1 %v4247_v36  ;;  %v4504_v36 = vld [vmem:[%s12360_s22 + $0x18] sm:$0xff] }
0x189b   :  { %3352 = vrot.lane.b32.xlu1 %v11672_v42, %s11196_s20 }
0x189f   :  { %3356 = vrot.lane.b32.xlu1 %v11698_v3, %s11197_s4 }
0x18a3   :  { %3360 = vrot.lane.b32.xlu1 %v11734_v52, %s11198_s15 }
0x1917   :  { %v4249_v41 = vpop.xlane.xlu1 %4248 }
0x1918   :  { %v4250_v43 = vsub.f32 %v4243_v34, %v4249_v41  ;;  %v4503_v34 = vld [vmem:[%s12360_s22 + $0x10] sm:$0xff] }
0x1919   :  { %v10656_v41 = vpack.c.bf16 %v4504_v36, %v4503_v34 }
0x191a   :  { %v4251_v45 = vmul.f32 1.442695, %v4250_v43 }
0x191b   :  { %v3353_v42 = vpop.permute.xlu1 %3352 }
0x191c   :  { %11021 = vpow2.f32 %v4251_v45 }
0x191f   :  { %v3357_v48 = vpop.permute.xlu1 %3356 }
0x1923   :  { %v3361_v53 = vpop.permute.xlu1 %3360 }
0x1926   :  { %v11022_v46 = vpop.eup %11021 }
0x1927   :  { %v4253_v40 = vsel %vm2383_vm12, %v11022_v46, 0.0 }
0x1928   :  { %4254 = vadd.xlane.f32.xlu0 %v4253_v40 }
0x193e   :  { %4258 = vrot.lane.b32.xlu0 %v11422_v63, %s11195_s19  ;;  %v3363_v63 = vsel %vm2383_vm12, %v11670_v38, %v3353_v42 }
0x193f   :  { %v3364_v59 = vsel %vm1074_vm2, %v3363_v63, %v3357_v48 }
0x1940   :  { %v3366_v57 = vsel %vm3365_vm13, %v3364_v59, %v3361_v53 }
0x1942   :  { %4335 = vrot.lane.b32.xlu0 %v3844_v13, %s11196_s20 }
0x1946   :  { %4339 = vrot.lane.b32.xlu0 %v4087_v31, %s11197_s4  ;;  %v4501_v31 = vld [vmem:[%s12360_s22] sm:$0xff] }
0x1947   :  { %v10652_v35 = vpack.c.bf16 %v4502_v32, %v4501_v31 }
0x1949   :  { %10653 = vmatprep.subr.bf16.mxu0 %v10652_v35 }
0x194a   :  { %10655 = vmatpush3.bf16.msra.mxu0 %v10652_v35 }
0x194b   :  { %10657 = vmatprep.subr.bf16.mxu0 %v10656_v41 }
0x194e   :  { %10659 = vmatpush3.bf16.msra.mxu0 %v10656_v41 }
0x19b5   :  { %v4255_v3 = vpop.xlane.xlu0 %4254 }
0x19b6   :  { %11023 = vrcp.f32 %v4255_v3 }
0x19b9   :  { %v4259_v52 = vpop.permute.xlu0 %4258 }
0x19ba   :  { %10084 = vmatpush3.msra.mxu1 %v4259_v52 }
0x19bb   :  { %10645 = vmatprep.subr.bf16.mxu1 %v10644_v62 }
0x19bd   :  { %v4336_v7 = vpop.permute.xlu0 %4335 }
0x19be   :  { %v4346_v10 = vsel %vm2383_vm12, %v11756_v47, %v4336_v7 }
0x19c0   :  { %v11024_v49 = vpop.eup %11023 }
0x19c1   :  { %v4257_v56 = vmul.f32 %v11024_v49, %v11022_v46  ;;  %v4340_v9 = vpop.permute.xlu0 %4339 }
0x19c2   :  { %v4347_v12 = vsel %vm1074_vm2, %v4346_v10, %v4340_v9 }
0x19c3   :  { %10086 = vmatmul.mubr.msk.f32.vlgmr.msra.gmra.mrb[32].mxu1 %vm2383_vm12, %v4257_v56 }
0x19c4   :  { %10096 = vmatprep.mubr.msk.f32.mxu1 %vm131_vm0, %v3366_v57  ;;  %10647 = vmatpush3.bf16.msra.mxu1 %v10644_v62  ;;  %v9227_v62 = vld [vmem:[%s12361_s23] ss:$0 sm:$0xff] }
0x19c5   :  { %10649 = vmatprep.subr.bf16.mxu1 %v10648_v55 }
0x19c8   :  { %10651 = vmatpush3.bf16.msra.mxu1 %v10648_v55  ;;  %v9228_v55 = vld [vmem:[%s12362_s26] ss:$0 sm:$0xff] }
0x1a96   :  { %v4330_v38 = vpop.f32.mrb[32].mxu1 }
0x1a97   :  { %4343 = vrot.lane.b32.xlu1 %v4330_v38, %s11198_s15  ;;  %v10087_v2 = vpop.f32.mrb[33].mxu1 }
0x1b09   :  { %v4344_v13 = vpop.permute.xlu1 %4343 }
0x1b0a   :  { %v4348_v15 = vsel %vm3365_vm13, %v4347_v12, %v4344_v13  ;;  %v4647_v13 = vld [vmem:[%s12363_s28] sm:$0xff] }
0x1b0b   :  { %10097 = vmatmul.mubr.msk.f32.vlgmr.msra.gmra.mrb[34].mxu1 %vm131_vm0, %v4348_v15  ;;  %v4648_v15 = vld [vmem:[%s12363_s28 + $0x8] sm:$0xff] }
0x1bde   :  { %v10098_v33 = vpop.f32.mrb[34].mxu1 }
0x1bdf   :  { %v4438_v37 = vadd.f32 %v10098_v33, %v9224_v16  ;;  %v4432_v20 = vpop.f32.mrb[35].mxu1  ;;  %v4649_v33 = vld [vmem:[%s12363_s28 + $0x10] sm:$0xff] }
0x1be0   :  { %v4433_v21 = vadd.f32 %v9224_v16, %v4432_v20  ;;  %v10660_v16 = vpack.c.bf16 %v4648_v15, %v4647_v13 }
0x1be1   :  { %v4442_v1 = vadd.f32 %v4438_v37, %v11409_v54  ;;  %v4650_v37 = vld [vmem:[%s12363_s28 + $0x18] sm:$0xff] }
0x1be2   :  { %v4441_v22 = vadd.f32 %v4433_v21, %v11405_v51  ;;  %10661 = vmatprep.subr.bf16.mxu1 %v10660_v16  ;;  %v10664_v20 = vpack.c.bf16 %v4650_v37, %v4649_v33  ;;  %v4651_v21 = vld [vmem:[%s12363_s28 + $0x20] sm:$0xff] }
0x1be3   :  { %v4448_v24 = vsel %vm131_vm0, %v4442_v1, 0.0  ;;  %10663 = vmatpush3.bf16.msra.mxu1 %v10660_v16 }
0x1be4   :  { %4449 = vadd.xlane.f32.xlu1 %v4448_v24  ;;  %v4445_v47 = vsel %vm131_vm0, %v4441_v22, 0.0  ;;  %10665 = vmatprep.subr.bf16.mxu1 %v10664_v20  ;;  %v4653_v24 = vld [vmem:[%s12363_s28 + $0x30] sm:$0xff] }
0x1be5   :  { %4446 = vadd.xlane.f32.xlu0 %v4445_v47  ;;  %v4654_v47 = vld [vmem:[%s12363_s28 + $0x38] sm:$0xff] }
0x1be7   :  { %10667 = vmatpush3.bf16.msra.mxu1 %v10664_v20  ;;  %v11199_v20 = vmov 1.0  }
0x1c71   :  { %v4450_v25 = vpop.xlane.xlu1 %4449 }
0x1c72   :  { %v4452_v26 = vmul.f32 0.03125, %v4450_v25  ;;  %v4447_v17 = vpop.xlane.xlu0 %4446  ;;  %v10672_v25 = vpack.c.bf16 %v4654_v47, %v4653_v24 }
0x1c73   :  { %v4451_v28 = vmul.f32 0.03125, %v4447_v17 }
0x1c74   :  { %v4454_v19 = vsub.f32 %v4442_v1, %v4452_v26  ;;  %v4652_v1 = vld [vmem:[%s12363_s28 + $0x28] sm:$0xff]  ;;  %v9229_v26 = vld [vmem:[%s12364_s1] ss:$0 sm:$0xff] }
0x1c75   :  { %v4453_v6 = vsub.f32 %v4441_v22, %v4451_v28  ;;  %v10668_v22 = vpack.c.bf16 %v4652_v1, %v4651_v21 }
0x1c76   :  { %v4456_v51 = vmul.f32 %v4454_v19, %v4454_v19 }
0x1c77   :  { %v4455_v29 = vmul.f32 %v4453_v6, %v4453_v6  ;;  %10669 = vmatprep.subr.bf16.mxu1 %v10668_v22 }
0x1c78   :  { %v4460_v30 = vsel %vm131_vm0, %v4456_v51, 0.0  ;;  %10671 = vmatpush3.bf16.msra.mxu1 %v10668_v22 }
0x1c79   :  { %v4457_v54 = vsel %vm131_vm0, %v4455_v29, 0.0  ;;  %10673 = vmatprep.subr.bf16.mxu1 %v10672_v25 }
0x1c7a   :  { %4458 = vadd.xlane.f32.xlu0 %v4457_v54 }
0x1c7c   :  { %10675 = vmatpush3.bf16.msra.mxu1 %v10672_v25 }
0x1c7e   :  { %4461 = vadd.xlane.f32.xlu0 %v4460_v30 }
0x1d07   :  { %v4459_v43 = vpop.xlane.xlu0 %4458 }
0x1d08   :  { %v4463_v45 = vmul.f32 0.03125, %v4459_v43 }
0x1d0a   :  { %v4465_v46 = vadd.f32 1e-05, %v4463_v45 }
0x1d0b   :  { %v4462_v40 = vpop.xlane.xlu0 %4461 }
0x1d0c   :  { %11025 = vrsqrt.f32 %v4465_v46  ;;  %v4464_v42 = vmul.f32 0.03125, %v4462_v40  ;;  %vm4469_vm14 = vcmp.eq.f32.partialorder %v4465_v46, inf  ;;  %v4472_v49 = vand.u32 2147483648, %v4465_v46 }
0x1d0d   :  { %vm4471_vm15 = vcmp.eq.f32.partialorder %v4465_v46, 0.0 }
0x1d0e   :  { %v4466_v3 = vadd.f32 1e-05, %v4464_v42 }
0x1d10   :  { %11027 = vrsqrt.f32 %v4466_v3  ;;  %vm4476_vm1 = vcmp.eq.f32.partialorder %v4466_v3, inf  ;;  %v4479_v57 = vand.u32 2147483648, %v4466_v3  ;;  %vm4478_vm3 = vcmp.eq.f32.partialorder %v4466_v3, 0.0 }
0x1d16   :  { %v11026_v52 = vpop.eup %11025 }
0x1d17   :  { %v4468_v48 = vmul.f32 %v11026_v52, %v4465_v46 }
0x1d19   :  { %v4470_v53 = vsel %vm4469_vm14, %v4465_v46, %v4468_v48 }
0x1d1a   :  { %v4473_v63 = vsel %vm4471_vm15, %v4472_v49, %v4470_v53  ;;  %v11028_v56 = vpop.eup %11027 }
0x1d1b   :  { %11029 = vrcp.f32 %v4473_v63  ;;  %v4475_v59 = vmul.f32 %v11028_v56, %v4466_v3 }
0x1d1d   :  { %v4477_v5 = vsel %vm4476_vm1, %v4466_v3, %v4475_v59 }
0x1d1e   :  { %v4480_v58 = vsel %vm4478_vm3, %v4479_v57, %v4477_v5 }
0x1d1f   :  { %11031 = vrcp.f32 %v4480_v58 }
0x1d25   :  { %v11030_v61 = vpop.eup %11029 }
0x1d26   :  { %v4482_v0 = vmul.f32 %v11030_v61, %v4453_v6 }
0x1d28   :  { %v4491_v38 = vmul.f32 %v9227_v62, %v4482_v0 }
0x1d29   :  { %v11032_v2 = vpop.eup %11031 }
0x1d2a   :  { %v11848_v7 = vadd.f32 %v9228_v55, %v4491_v38  ;;  %v4484_v9 = vmul.f32 %v11032_v2, %v4454_v19 }
0x1d2c   :  { %10107 = vmatprep.mubr.msk.f32.mxu0 %vm131_vm0, %v11848_v7  ;;  %v4492_v10 = vmul.f32 %v9227_v62, %v4484_v9 }
0x1d2e   :  { %v11852_v12 = vadd.f32 %v9228_v55, %v4492_v10 }
0x1d30   :  { %10108 = vmatmul.mubr.msk.f32.vlgmr.msra.gmra.mrb[34].mxu0 %vm131_vm0, %v11852_v12 }
0x1e03   :  { %v10109_v17 = vpop.f32.mrb[34].mxu0 }
0x1e04   :  { %v4590_v28 = vadd.f32 %v10109_v17, %v9229_v26  ;;  %v4584_v19 = vpop.f32.mrb[35].mxu0 }
0x1e05   :  { %v4585_v6 = vadd.f32 %v9229_v26, %v4584_v19 }
0x1e06   :  { %v4596_v29 = vmul.f32 0.70710677, %v4590_v28  ;;  %v4594_v19 = vmul.f32 0.5, %v4590_v28 }
0x1e07   :  { %v4595_v54 = vmul.f32 0.70710677, %v4585_v6  ;;  %v4593_v26 = vmul.f32 0.5, %v4585_v6 }
0x1e08   :  { %v4602_v51 = vand.u32 2147483647, %v4596_v29  ;;  %vm4598_vm4 = vcmp.lt.f32.partialorder %v4596_v29, 0.0 }
0x1e09   :  { %v4601_v30 = vand.u32 2147483647, %v4595_v54  ;;  %vm4597_vm5 = vcmp.lt.f32.partialorder %v4595_v54, 0.0  ;;  %v4600_v21 = vsel %vm4598_vm4, -1.0, %v11199_v20  ;;  %v9232_v54 = vld [vmem:[%s12365_s2] ss:$0 sm:$0xff] }
0x1e0a   :  { %v4604_v31 = vmul.f32 0.3275911, %v4602_v51  ;;  %v4630_v36 = vsub.f32 0.0, %v4602_v51  ;;  %v4599_v24 = vsel %vm4597_vm5, -1.0, %v11199_v20 }
0x1e0b   :  { %v4603_v32 = vmul.f32 0.3275911, %v4601_v30  ;;  %v4629_v41 = vsub.f32 0.0, %v4601_v30 }
0x1e0c   :  { %v4606_v34 = vadd.f32 1.0, %v4604_v31  ;;  %v4632_v45 = vmul.f32 %v4630_v36, %v4602_v51 }
0x1e0d   :  { %v4605_v35 = vadd.f32 1.0, %v4603_v32  ;;  %v4631_v42 = vmul.f32 %v4629_v41, %v4601_v30 }
0x1e0e   :  { %11033 = vrcp.f32 %v4606_v34  ;;  %v4635_v48 = vmul.f32 1.442695, %v4632_v45 }
0x1e0f   :  { %11035 = vrcp.f32 %v4605_v35  ;;  %v4633_v63 = vmul.f32 1.442695, %v4631_v42 }
0x1e10   :  { %11037 = vpow2.f32 %v4635_v48  ;;  %v9237_v48 = vld [vmem:[%s11265_s24 + $0x20] sm:$0xff] }
0x1e11   :  { %11039 = vpow2.f32 %v4633_v63 }
0x1e18   :  { %v11034_v43 = vpop.eup %11033 }
0x1e19   :  { %v11036_v46 = vpop.eup %11035  ;;  %v4612_v40 = vmul.f32 1.0614054, %v11034_v43 }
0x1e1a   :  { %v4611_v3 = vmul.f32 1.0614054, %v11036_v46  ;;  %v11038_v10 = vpop.eup %11037 }
0x1e1b   :  { %v4614_v52 = vadd.f32 -1.4531521, %v4612_v40  ;;  %v11040_v15 = vpop.eup %11039 }
0x1e1c   :  { %v4613_v49 = vadd.f32 -1.4531521, %v4611_v3 }
0x1e1d   :  { %v4616_v53 = vmul.f32 %v11034_v43, %v4614_v52 }
0x1e1e   :  { %v4615_v56 = vmul.f32 %v11036_v46, %v4613_v49  ;;  %v9238_v49 = vld [vmem:[%s11265_s24 + $0x28] sm:$0xff] }
0x1e1f   :  { %v4618_v59 = vadd.f32 1.4214138, %v4616_v53  ;;  %v9239_v53 = vld [vmem:[%s11265_s24 + $0x30] sm:$0xff]  ;;  %v10676_v63 = vpack.c.bf16 %v9238_v49, %v9237_v48  ;;  %v11121_v48 = vld [vmem:[%s11350_s27] sm:$0xff] }
0x1e20   :  { %v4617_v57 = vadd.f32 1.4214138, %v4615_v56  ;;  %v9240_v56 = vld [vmem:[%s11265_s24 + $0x38] sm:$0xff]  ;;  %s12366_s24 = sld [smem:[#allocation14_spill]] }
0x1e21   :  { %v4620_v5 = vmul.f32 %v11034_v43, %v4618_v59  ;;  %v10680_v59 = vpack.c.bf16 %v9240_v56, %v9239_v53  ;;  %10677 = vmatprep.subr.bf16.mxu0 %v10676_v63 }
0x1e22   :  { %v4619_v58 = vmul.f32 %v11036_v46, %v4617_v57  ;;  %10679 = vmatpush3.bf16.msra.mxu0 %v10676_v63  ;;  %v9245_v57 = vld [vmem:[%s11275_s6 + $0x20] sm:$0xff] }
0x1e23   :  { %v4622_v61 = vadd.f32 -0.28449672, %v4620_v5  ;;  %10681 = vmatprep.subr.bf16.mxu0 %v10680_v59  ;;  %v9246_v5 = vld [vmem:[%s11275_s6 + $0x28] sm:$0xff] }
0x1e24   :  { %v4621_v62 = vadd.f32 -0.28449672, %v4619_v58  ;;  %v10684_v58 = vpack.c.bf16 %v9246_v5, %v9245_v57 }
0x1e25   :  { %v4624_v0 = vmul.f32 %v11034_v43, %v4622_v61 }
0x1e26   :  { %v4623_v55 = vmul.f32 %v11036_v46, %v4621_v62  ;;  %10683 = vmatpush3.bf16.msra.mxu0 %v10680_v59  ;;  %10693 = vmatprep.subr.bf16.mxu1 %v10684_v58  ;;  %v11122_v59 = vld [vmem:[%s11350_s27 + $0x10] sm:$0xff] }
0x1e27   :  { %v4626_v38 = vadd.f32 0.2548296, %v4624_v0  ;;  %10685 = vmatprep.subr.bf16.mxu0 %v10684_v58 }
0x1e28   :  { %v4625_v2 = vadd.f32 0.2548296, %v4623_v55 }
0x1e29   :  { %v4628_v9 = vmul.f32 %v11034_v43, %v4626_v38 }
0x1e2a   :  { %v4627_v13 = vmul.f32 %v11036_v46, %v4625_v2 }
0x1e2b   :  { %v4638_v16 = vmul.f32 %v11038_v10, %v4628_v9 }
0x1e2c   :  { %v4637_v33 = vmul.f32 %v11040_v15, %v4627_v13 }
0x1e2d   :  { %v4640_v37 = vsub.f32 1.0, %v4638_v16 }
0x1e2e   :  { %v4639_v1 = vsub.f32 1.0, %v4637_v33 }
0x1e2f   :  { %v4642_v22 = vmul.f32 %v4640_v37, %v4600_v21 }
0x1e30   :  { %v4641_v47 = vmul.f32 %v4639_v1, %v4599_v24 }
0x1e31   :  { %v4644_v25 = vadd.f32 1.0, %v4642_v22 }
0x1e32   :  { %v4643_v17 = vadd.f32 1.0, %v4641_v47  ;;  %v9235_v47 = vld [vmem:[%s12366_s24] ss:$0 sm:$0xff] }
0x1e33   :  { %v4646_v29 = vmul.f32 %v4644_v25, %v4594_v19  ;;  %v9236_v19 = vld [vmem:[%s12367_s7] ss:$0 sm:$0xff] }
0x1e34   :  { %v4645_v51 = vmul.f32 %v4643_v17, %v4593_v26 }
0x1e36   :  { %10126 = vmatprep.mubr.msk.f32.mxu1 %vm4662_vm6, %v4645_v51 }
0x1e37   :  { %10127 = vmatmul.mubr.msk.f32.vlgmr.msra.gmra.mrb[36].mxu1 %vm4662_vm6, %v4646_v29 }
0x1e38   :  { %10695 = vmatpush3.bf16.msra.mxu1 %v10684_v58 }
0x1f0a   :  { %v10128_v30 = vpop.f32.mrb[36].mxu1 }
0x1f0b   :  { %v4741_v31 = vadd.f32 %v10128_v30, %v9232_v54  ;;  %v4735_v32 = vpop.f32.mrb[37].mxu1 }
0x1f0c   :  { %v4736_v34 = vadd.f32 %v9232_v54, %v4735_v32  ;;  %v9248_v32 = vld [vmem:[%s11275_s6 + $0x38] sm:$0xff] }
0x1f0d   :  { %v4745_v35 = vadd.f32 %v4741_v31, %v11852_v12  ;;  %v9247_v31 = vld [vmem:[%s11275_s6 + $0x30] sm:$0xff]  ;;  %s12369_s6 = sld [smem:[#allocation17_spill]] }
0x1f0e   :  { %v4744_v36 = vadd.f32 %v4736_v34, %v11848_v7  ;;  %v10688_v34 = vpack.c.bf16 %v9248_v32, %v9247_v31 }
0x1f0f   :  { %v4751_v6 = vsel %vm131_vm0, %v4745_v35, 0.0 }
0x1f10   :  { %4752 = vadd.xlane.f32.xlu1 %v4751_v6  ;;  %v4748_v28 = vsel %vm131_vm0, %v4744_v36, 0.0  ;;  %10697 = vmatprep.subr.bf16.mxu1 %v10688_v34 }
0x1f11   :  { %4749 = vadd.xlane.f32.xlu0 %v4748_v28  ;;  %10699 = vmatpush3.bf16.msra.mxu1 %v10688_v34 }
0x1f12   :  { %10709 = vmatprep.subr.bf16.mxu1 %v11417_v60 }
0x1f9d   :  { %v4753_v41 = vpop.xlane.xlu1 %4752 }
0x1f9e   :  { %v4755_v43 = vmul.f32 0.03125, %v4753_v41  ;;  %v4750_v45 = vpop.xlane.xlu0 %4749 }
0x1f9f   :  { %v4754_v46 = vmul.f32 0.03125, %v4750_v45 }
0x1fa0   :  { %v4757_v40 = vsub.f32 %v4745_v35, %v4755_v43  ;;  %v9242_v35 = vld [vmem:[%s11270_s30 + $0x1] ss:$0 sm:$0xff]  ;;  %s12368_s30 = sld [smem:[#allocation16_spill]] }
0x1fa1   :  { %v4756_v42 = vsub.f32 %v4744_v36, %v4754_v46  ;;  %v9250_v46 = vld [vmem:[%s12357_s5 + $0x1] ss:$0 sm:$0xff] }
0x1fa2   :  { %v4759_v3 = vmul.f32 %v4757_v40, %v4757_v40 }
0x1fa3   :  { %v4758_v12 = vmul.f32 %v4756_v42, %v4756_v42 }
0x1fa4   :  { %v4763_v7 = vsel %vm131_vm0, %v4759_v3, 0.0 }
0x1fa5   :  { %4764 = vadd.xlane.f32.xlu1 %v4763_v7  ;;  %v4760_v52 = vsel %vm131_vm0, %v4758_v12, 0.0 }
0x1fa6   :  { %4761 = vadd.xlane.f32.xlu0 %v4760_v52 }
0x2032   :  { %v4765_v61 = vpop.xlane.xlu1 %4764 }
0x2033   :  { %v4767_v62 = vmul.f32 0.03125, %v4765_v61  ;;  %v4762_v0 = vpop.xlane.xlu0 %4761 }
0x2034   :  { %v4766_v55 = vmul.f32 0.03125, %v4762_v0 }
0x2035   :  { %v4769_v38 = vadd.f32 1e-05, %v4767_v62 }
0x2036   :  { %v4768_v2 = vadd.f32 1e-05, %v4766_v55 }
0x2037   :  { %11041 = vrsqrt.f32 %v4769_v38  ;;  %vm4779_vm7 = vcmp.eq.f32.partialorder %v4769_v38, inf  ;;  %v4782_v15 = vand.u32 2147483648, %v4769_v38  ;;  %vm4781_vm8 = vcmp.eq.f32.partialorder %v4769_v38, 0.0 }
0x2038   :  { %11043 = vrsqrt.f32 %v4768_v2  ;;  %vm4772_vm9 = vcmp.eq.f32.partialorder %v4768_v2, inf  ;;  %v4775_v37 = vand.u32 2147483648, %v4768_v2  ;;  %vm4774_vm10 = vcmp.eq.f32.partialorder %v4768_v2, 0.0 }
0x2041   :  { %v11042_v9 = vpop.eup %11041 }
0x2042   :  { %v11044_v10 = vpop.eup %11043  ;;  %v4778_v13 = vmul.f32 %v11042_v9, %v4769_v38 }
0x2043   :  { %v4771_v16 = vmul.f32 %v11044_v10, %v4768_v2 }
0x2044   :  { %v4780_v33 = vsel %vm4779_vm7, %v4769_v38, %v4778_v13 }
0x2045   :  { %v4783_v21 = vsel %vm4781_vm8, %v4782_v15, %v4780_v33  ;;  %v4773_v1 = vsel %vm4772_vm9, %v4768_v2, %v4771_v16 }
0x2046   :  { %11045 = vrcp.f32 %v4783_v21  ;;  %v4776_v22 = vsel %vm4774_vm10, %v4775_v37, %v4773_v1 }
0x2047   :  { %11047 = vrcp.f32 %v4776_v22 }
0x2050   :  { %v11046_v24 = vpop.eup %11045 }
0x2051   :  { %v11048_v25 = vpop.eup %11047  ;;  %v4787_v26 = vmul.f32 %v11046_v24, %v4757_v40  ;;  %v11123_v24 = vld [vmem:[%s11350_s27 + $0x18] sm:$0xff] }
0x2052   :  { %v4785_v17 = vmul.f32 %v11048_v25, %v4756_v42 }
0x2053   :  { %v4795_v51 = vmul.f32 %v9235_v47, %v4787_v26 }
0x2054   :  { %v4794_v29 = vmul.f32 %v9235_v47, %v4785_v17  ;;  %v11124_v47 = vld [vmem:[%s11350_s27 + $0x8] sm:$0xff] }
0x2055   :  { %v11886_v30 = vadd.f32 %v9236_v19, %v4795_v51 }
0x2056   :  { %v11884_v54 = vadd.f32 %v9236_v19, %v4794_v29 }
0x2058   :  { %10137 = vmatprep.mubr.msk.f32.mxu0 %vm131_vm0, %v11884_v54 }
0x2059   :  { %10138 = vmatmul.mubr.msk.f32.vlgmr.msra.gmra.mrb[36].mxu0 %vm131_vm0, %v11886_v30 }
0x205a   :  { %10687 = vmatpush3.bf16.msra.mxu0 %v10684_v58 }
0x205b   :  { %10689 = vmatprep.subr.bf16.mxu0 %v10688_v34 }
0x205e   :  { %10691 = vmatpush3.bf16.msra.mxu0 %v10688_v34 }
0x205f   :  { %10701 = vmatprep.subr.bf16.mxu0 %v11417_v60 }
0x212c   :  { %v10139_v36 = vpop.f32.mrb[36].mxu0 }
0x212d   :  { %v11897_v6 = vadd.f32 %v10139_v36, %v9242_v35  ;;  %v4889_v28 = vpop.f32.mrb[37].mxu0 }
0x212e   :  { %v11899_v41 = vadd.f32 %v9242_v35, %v4889_v28 }
0x212f   :  { %4994 = vrot.lane.b32.xlu1 %v11897_v6, %s11183_s0 }
0x2130   :  { %4992 = vrot.lane.b32.xlu0 %v11899_v41, %s11183_s0  ;;  %10148 = vmatprep.mubr.msk.f32.mxu0 %vm131_vm0, %v11899_v41 }
0x2131   :  { %10149 = vmatmul.mubr.msk.f32.vlgmr.msra.gmra.mrb[38].mxu0 %vm131_vm0, %v11897_v6 }
0x2132   :  { %10703 = vmatpush3.bf16.msra.mxu0 %v11417_v60 }
0x2133   :  { %10705 = vmatprep.subr.bf16.mxu0 %v11439_v4 }
0x2134   :  { %6859 = vrot.lane.b32.xlu0 %v11899_v41, %s11184_s9 }
0x2136   :  { %10707 = vmatpush3.bf16.msra.mxu0 %v11439_v4 }
0x21a1   :  { %v11916_v45 = vpop.permute.xlu1 %4994 }
0x21a2   :  { %v11914_v43 = vpop.permute.xlu0 %4992 }
0x21a3   :  { %10159 = vmatprep.mubr.msk.f32.mxu1 %vm131_vm0, %v11914_v43 }
0x21a4   :  { %10160 = vmatmul.mubr.msk.f32.vlgmr.msra.gmra.mrb[38].mxu1 %vm131_vm0, %v11916_v45 }
0x21a5   :  { %10711 = vmatpush3.bf16.msra.mxu1 %v11417_v60 }
0x21a6   :  { %10713 = vmatprep.subr.bf16.mxu1 %v11439_v4 }
0x21a9   :  { %10715 = vmatpush3.bf16.msra.mxu1 %v11439_v4 }
0x2204   :  { %v10150_v40 = vpop.f32.mrb[38].mxu0 }
0x2205   :  { %v4989_v42 = vadd.f32 %v10150_v40, %v9250_v46  ;;  %v4983_v3 = vpop.f32.mrb[39].mxu0 }
0x2206   :  { %v4984_v12 = vadd.f32 %v9250_v46, %v4983_v3 }
0x2207   :  { %v5076_v52 = vmul.f32 %v4989_v42, %v4989_v42 }
0x2208   :  { %v5075_v7 = vmul.f32 %v4984_v12, %v4984_v12 }
0x220a   :  { %10170 = vmatprep.mubr.msk.f32.mxu0 %vm131_vm0, %v5075_v7 }
0x220b   :  { %10171 = vmatmul.mubr.msk.f32.vlgmr.msra.gmra.mrb[40].mxu0 %vm131_vm0, %v5076_v52 }
0x220c   :  { %10188 = vmatprep.mubr.msk.f32.mxu0 %vm1074_vm2, %v11121_v48 }
0x2277   :  { %v10161_v60 = vpop.f32.mrb[38].mxu1 }
0x2278   :  { %v11930_v49 = vadd.f32 %v10161_v60, %v9250_v46  ;;  %v5066_v53 = vpop.f32.mrb[39].mxu1 }
0x2279   :  { %v11932_v4 = vadd.f32 %v9250_v46, %v5066_v53 }
0x227a   :  { %v5179_v56 = vmul.f32 %v11930_v49, %v11930_v49 }
0x227b   :  { %v5178_v63 = vmul.f32 %v11932_v4, %v11932_v4 }
0x227d   :  { %10181 = vmatprep.mubr.msk.f32.mxu1 %vm131_vm0, %v5178_v63 }
0x227e   :  { %10182 = vmatmul.mubr.msk.f32.vlgmr.msra.gmra.mrb[40].mxu1 %vm131_vm0, %v5179_v56 }
0x227f   :  { %10202 = vmatprep.mubr.msk.f32.mxu1 %vm1074_vm2, %v11122_v59 }
0x22de   :  { %v10172_v57 = vpop.f32.mrb[40].mxu0 }
0x22df   :  { %11049 = vrsqrt.f32 %v10172_v57  ;;  %v5149_v5 = vpop.f32.mrb[41].mxu0  ;;  %vm5167_vm14 = vcmp.eq.f32.partialorder %v10172_v57, inf  ;;  %v5170_v0 = vand.u32 2147483648, %v10172_v57  ;;  %vm5169_vm15 = vcmp.eq.f32.partialorder %v10172_v57, 0.0 }
0x22e0   :  { %11051 = vrsqrt.f32 %v5149_v5  ;;  %vm5160_vm1 = vcmp.eq.f32.partialorder %v5149_v5, inf  ;;  %v5163_v2 = vand.u32 2147483648, %v5149_v5  ;;  %vm5162_vm3 = vcmp.eq.f32.partialorder %v5149_v5, 0.0 }
0x22e9   :  { %v11050_v58 = vpop.eup %11049 }
0x22ea   :  { %v11052_v61 = vpop.eup %11051  ;;  %v5166_v62 = vmul.f32 %v11050_v58, %v10172_v57 }
0x22eb   :  { %v5159_v55 = vmul.f32 %v11052_v61, %v5149_v5 }
0x22ec   :  { %v5168_v38 = vsel %vm5167_vm14, %v10172_v57, %v5166_v62  ;;  %v11127_v57 = vld [vmem:[%s11350_s27 + $0x30] sm:$0xff] }
0x22ed   :  { %v5171_v9 = vsel %vm5169_vm15, %v5170_v0, %v5168_v38  ;;  %v5161_v10 = vsel %vm5160_vm1, %v5149_v5, %v5159_v55 }
0x22ee   :  { %v5173_v13 = vmax.f32 %v5171_v9, 1e-12  ;;  %v5164_v15 = vsel %vm5162_vm3, %v5163_v2, %v5161_v10  ;;  %v12057_v9 = vmul.f32 0.17677669, %v11899_v41 }
0x22ef   :  { %v5172_v16 = vmax.f32 %v5164_v15, 1e-12 }
0x22f0   :  { %11053 = vrcp.f32 %v5173_v13  ;;  %v6860_v13 = vpop.permute.xlu0 %6859 }
0x22f1   :  { %11055 = vrcp.f32 %v5172_v16 }
0x22fa   :  { %v11054_v33 = vpop.eup %11053 }
0x22fb   :  { %v11056_v37 = vpop.eup %11055  ;;  %v5177_v21 = vmul.f32 %v11054_v33, %v4989_v42 }
0x22fc   :  { %v5175_v1 = vmul.f32 %v11056_v37, %v4984_v12 }
0x22fe   :  { %v11942_v22 = vpack.c.bf16 %v5177_v21, %v5175_v1 }
0x2300   :  { %10717 = vmatprep.subr.bf16.mxu0 %v11942_v22  ;;  %10725 = vmatprep.subr.bf16.mxu1 %v11942_v22 }
0x2301   :  { %10719 = vmatpush3.bf16.msra.mxu0 %v11942_v22  ;;  %10727 = vmatpush3.bf16.msra.mxu1 %v11942_v22 }
0x2304   :  { %10203 = vmatmul.mubr.msk.f32.vlgmr.msra.gmra.mrb[42].mxu1 %vm1074_vm2, %v11123_v24  ;;  %10189 = vmatmul.mubr.msk.f32.vlgmr.msra.gmra.mrb[42].mxu0 %vm1074_vm2, %v11124_v47 }
0x2305   :  { %10231 = vmatprep.mubr.msk.f32.mxu1 %vm1074_vm2, %v11122_v59  ;;  %10195 = vmatprep.mubr.msk.f32.mxu0 %vm1074_vm2, %v11121_v48 }
0x2351   :  { %v10183_v25 = vpop.f32.mrb[40].mxu1 }
0x2352   :  { %11057 = vrsqrt.f32 %v10183_v25  ;;  %v5252_v26 = vpop.f32.mrb[41].mxu1  ;;  %vm5270_vm4 = vcmp.eq.f32.partialorder %v10183_v25, inf  ;;  %v5273_v29 = vand.u32 2147483648, %v10183_v25  ;;  %vm5272_vm5 = vcmp.eq.f32.partialorder %v10183_v25, 0.0 }
0x2353   :  { %11059 = vrsqrt.f32 %v5252_v26  ;;  %vm5263_vm7 = vcmp.eq.f32.partialorder %v5252_v26, inf  ;;  %v5266_v34 = vand.u32 2147483648, %v5252_v26  ;;  %vm5265_vm8 = vcmp.eq.f32.partialorder %v5252_v26, 0.0 }
0x235c   :  { %v11058_v17 = vpop.eup %11057 }
0x235d   :  { %v11060_v19 = vpop.eup %11059  ;;  %v5269_v51 = vmul.f32 %v11058_v17, %v10183_v25 }
0x235e   :  { %v5262_v31 = vmul.f32 %v11060_v19, %v5252_v26 }
0x235f   :  { %v5271_v32 = vsel %vm5270_vm4, %v10183_v25, %v5269_v51 }
0x2360   :  { %v5274_v35 = vsel %vm5272_vm5, %v5273_v29, %v5271_v32  ;;  %v5264_v36 = vsel %vm5263_vm7, %v5252_v26, %v5262_v31 }
0x2361   :  { %v5276_v28 = vmax.f32 %v5274_v35, 1e-12  ;;  %v5267_v46 = vsel %vm5265_vm8, %v5266_v34, %v5264_v36 }
0x2362   :  { %v5275_v40 = vmax.f32 %v5267_v46, 1e-12 }
0x2363   :  { %11061 = vrcp.f32 %v5276_v28 }
0x2364   :  { %11063 = vrcp.f32 %v5275_v40 }
0x236d   :  { %v11062_v42 = vpop.eup %11061 }
0x236e   :  { %v11064_v3 = vpop.eup %11063  ;;  %v5280_v12 = vmul.f32 %v11062_v42, %v11930_v49 }
0x236f   :  { %v5278_v7 = vmul.f32 %v11064_v3, %v11932_v4 }
0x2371   :  { %v11956_v52 = vpack.c.bf16 %v5280_v12, %v5278_v7 }
0x2373   :  { %10721 = vmatprep.subr.bf16.mxu0 %v11956_v52  ;;  %10745 = vmatprep.subr.bf16.mxu1 %v11956_v52 }
0x2374   :  { %10723 = vmatpush3.bf16.msra.mxu0 %v11956_v52  ;;  %10747 = vmatpush3.bf16.msra.mxu1 %v11956_v52 }
0x2375   :  { %10729 = vmatprep.subr.bf16.mxu0 %v11489_v8  ;;  %10749 = vmatprep.subr.bf16.mxu1 %v11489_v8 }
0x2377   :  { %10232 = vmatmul.mubr.msk.f32.vlgmr.msra.gmra.mrb[44].mxu1 %vm1074_vm2, %v11123_v24  ;;  %10196 = vmatmul.mubr.msk.f32.vlgmr.msra.gmra.mrb[44].mxu0 %vm1074_vm2, %v11124_v47 }
0x2378   :  { %10731 = vmatpush3.bf16.msra.mxu0 %v11489_v8  ;;  %10751 = vmatpush3.bf16.msra.mxu1 %v11489_v8  ;;  %v11125_v8 = vld [vmem:[%s11350_s27 + $0x20] sm:$0xff] }
0x2379   :  { %10733 = vmatprep.subr.bf16.mxu0 %v11498_v11  ;;  %10753 = vmatprep.subr.bf16.mxu1 %v11498_v11 }
0x237c   :  { %10735 = vmatpush3.bf16.msra.mxu0 %v11498_v11  ;;  %10755 = vmatpush3.bf16.msra.mxu1 %v11498_v11  ;;  %v11126_v11 = vld [vmem:[%s11350_s27 + $0x28] sm:$0xff] }
0x237d   :  { %10737 = vmatprep.subr.bf16.mxu0 %v11508_v14  ;;  %10757 = vmatprep.subr.bf16.mxu1 %v11508_v14 }
0x23d7   :  { %v10204_v48 = vpop.f32.mrb[42].mxu1  ;;  %v10190_v60 = vpop.f32.mrb[42].mxu0 }
0x23d8   :  { %v5497_v49 = vpop.f32.mrb[43].mxu1  ;;  %v5347_v53 = vpop.f32.mrb[43].mxu0 }
0x23d9   :  { %10213 = vmatprep.mubr.msk.f32.mxu0 %vm131_vm0, %v5497_v49 }
0x23da   :  { %10214 = vmatmul.mubr.msk.f32.vlgmr.msra.gmra.mrb[46].mxu0 %vm131_vm0, %v10204_v48 }
0x23db   :  { %10739 = vmatpush3.bf16.msra.mxu0 %v11508_v14  ;;  %10224 = vmatprep.mubr.msk.f32.mxu0 %vm131_vm0, %v5347_v53 }
0x23dc   :  { %10741 = vmatprep.subr.bf16.mxu0 %v11517_v18 }
0x23df   :  { %10743 = vmatpush3.bf16.msra.mxu0 %v11517_v18 }
0x23e0   :  { %10765 = vmatprep.subr.bf16.mxu0 %v11942_v22 }
0x23e2   :  { %10225 = vmatmul.mubr.msk.f32.vlgmr.msra.gmra.mrb[46].mxu0 %vm131_vm0, %v10190_v60 }
0x23e3   :  { %10767 = vmatpush3.bf16.msra.mxu0 %v11942_v22  ;;  %10260 = vmatprep.mubr.msk.f32.mxu0 %vm1074_vm2, %v11125_v8 }
0x23e4   :  { %10769 = vmatprep.subr.bf16.mxu0 %v11529_v23 }
0x23e6   :  { %10261 = vmatmul.mubr.msk.f32.vlgmr.msra.gmra.mrb[48].mxu0 %vm1074_vm2, %v11126_v11 }
0x23e7   :  { %10771 = vmatpush3.bf16.msra.mxu0 %v11529_v23 }
0x23e8   :  { %10773 = vmatprep.subr.bf16.mxu0 %v11538_v27 }
0x23eb   :  { %10775 = vmatpush3.bf16.msra.mxu0 %v11538_v27 }
0x23ec   :  { %10789 = vmatprep.subr.bf16.mxu0 %v11942_v22 }
0x244a   :  { %v10233_v4 = vpop.f32.mrb[44].mxu1  ;;  %v10197_v63 = vpop.f32.mrb[44].mxu0 }
0x244b   :  { %v5734_v56 = vpop.f32.mrb[45].mxu1  ;;  %v5422_v59 = vpop.f32.mrb[45].mxu0 }
0x244c   :  { %10242 = vmatprep.mubr.msk.f32.mxu1 %vm131_vm0, %v5734_v56 }
0x244d   :  { %10243 = vmatmul.mubr.msk.f32.vlgmr.msra.gmra.mrb[46].mxu1 %vm131_vm0, %v10233_v4 }
0x244e   :  { %10759 = vmatpush3.bf16.msra.mxu1 %v11508_v14  ;;  %10253 = vmatprep.mubr.msk.f32.mxu1 %vm131_vm0, %v5422_v59 }
0x244f   :  { %10761 = vmatprep.subr.bf16.mxu1 %v11517_v18 }
0x2452   :  { %10763 = vmatpush3.bf16.msra.mxu1 %v11517_v18 }
0x2453   :  { %10777 = vmatprep.subr.bf16.mxu1 %v11956_v52 }
0x2455   :  { %10254 = vmatmul.mubr.msk.f32.vlgmr.msra.gmra.mrb[46].mxu1 %vm131_vm0, %v10197_v63 }
0x2456   :  { %10779 = vmatpush3.bf16.msra.mxu1 %v11956_v52  ;;  %10278 = vmatprep.mubr.msk.f32.mxu1 %vm1074_vm2, %v11125_v8 }
0x2457   :  { %10781 = vmatprep.subr.bf16.mxu1 %v11529_v23 }
0x2459   :  { %10279 = vmatmul.mubr.msk.f32.vlgmr.msra.gmra.mrb[48].mxu1 %vm1074_vm2, %v11126_v11 }
0x245a   :  { %10783 = vmatpush3.bf16.msra.mxu1 %v11529_v23  ;;  %v11128_v23 = vld [vmem:[%s11350_s27 + $0x38] sm:$0xff]  ;;  %s11200_s27 = smov [#allocation2]  }
0x245b   :  { %10785 = vmatprep.subr.bf16.mxu1 %v11538_v27  ;;  %s9068_s10 = sshll.u32 %s11200_s27, 4  ;;  %s9069_s10 = int_to_ptr.vmem [resolvable:$true] %s9068_s10 }
0x245c   :  { %s11129_s11 = scalar_lea.vmem %s9069_s10, 256  ;;  %p11134_p1 = scmp.lt.s32.totalorder %s9069_s10, %s9069_s10 }
0x245d   :  { %p11130_p0 = scmp.ne.s32.totalorder %s9069_s10, %s11129_s11  ;;  %p11135_p2 = scmp.lt.s32.totalorder %s11129_s11, %s11129_s11 }
0x245e   :  { %10787 = vmatpush3.bf16.msra.mxu1 %v11538_v27 }
0x245f   :  { %10801 = vmatprep.subr.bf16.mxu1 %v11956_v52  ;;  %p11136_p3 = por %p11135_p2, %p11134_p1 }
0x2461   :  { %p11137_p4 = pnand %p11136_p3, %p11130_p0 }
0x24b9   :  { %v10262_v14 = vpop.f32.mrb[48].mxu0 }
0x24ba   :  { %v5971_v18 = vpop.f32.mrb[49].mxu0 }
0x24bb   :  { %10271 = vmatprep.mubr.msk.f32.mxu0 %vm131_vm0, %v5971_v18 }
0x24bc   :  { %10272 = vmatmul.mubr.msk.f32.vlgmr.msra.gmra.mrb[46].mxu0 %vm131_vm0, %v10262_v14 }
0x24bd   :  { %10791 = vmatpush3.bf16.msra.mxu0 %v11942_v22  ;;  %10296 = vmatprep.mubr.msk.f32.mxu0 %vm1074_vm2, %v11127_v57 }
0x24be   :  { %10793 = vmatprep.subr.bf16.mxu0 %v11564_v39 }
0x24c0   :  { %10297 = vmatmul.mubr.msk.f32.vlgmr.msra.gmra.mrb[50].mxu0 %vm1074_vm2, %v11128_v23 }
0x24c1   :  { %10795 = vmatpush3.bf16.msra.mxu0 %v11564_v39 }
0x24c2   :  { %10797 = vmatprep.subr.bf16.mxu0 %v11574_v44 }
0x24c5   :  { %10799 = vmatpush3.bf16.msra.mxu0 %v11574_v44 }
0x24c6   :  { %10328 = vmatprep.subr.mxu0 %v11185_v50 }
0x252c   :  { %v10280_v27 = vpop.f32.mrb[48].mxu1 }
0x252d   :  { %v6129_v5 = vpop.f32.mrb[49].mxu1 }
0x252e   :  { %10289 = vmatprep.mubr.msk.f32.mxu1 %vm131_vm0, %v6129_v5 }
0x252f   :  { %10290 = vmatmul.mubr.msk.f32.vlgmr.msra.gmra.mrb[46].mxu1 %vm131_vm0, %v10280_v27 }
0x2530   :  { %10803 = vmatpush3.bf16.msra.mxu1 %v11956_v52  ;;  %10314 = vmatprep.mubr.msk.f32.mxu1 %vm1074_vm2, %v11127_v57 }
0x2531   :  { %10805 = vmatprep.subr.bf16.mxu1 %v11564_v39 }
0x2533   :  { %10315 = vmatmul.mubr.msk.f32.vlgmr.msra.gmra.mrb[50].mxu1 %vm1074_vm2, %v11128_v23 }
0x2534   :  { %10807 = vmatpush3.bf16.msra.mxu1 %v11564_v39 }
0x2535   :  { %10809 = vmatprep.subr.bf16.mxu1 %v11574_v44 }
0x2538   :  { %10811 = vmatpush3.bf16.msra.mxu1 %v11574_v44 }
0x2539   :  { %10338 = vmatprep.subr.mxu1 %v11185_v50 }
0x2593   :  { %v10298_v58 = vpop.f32.mrb[50].mxu0 }
0x2594   :  { %v6287_v61 = vpop.f32.mrb[51].mxu0 }
0x2595   :  { %10307 = vmatprep.mubr.msk.f32.mxu0 %vm131_vm0, %v6287_v61 }
0x2596   :  { %10308 = vmatmul.mubr.msk.f32.vlgmr.msra.gmra.mrb[46].mxu0 %vm131_vm0, %v10298_v58 }
0x2597   :  { %10330 = vmatprep.mubr.msk.f32.mxu0 %vm11186_vm11, %v11185_v50 }
0x2606   :  { %v10316_v62 = vpop.f32.mrb[50].mxu1 }
0x2607   :  { %v6445_v0 = vpop.f32.mrb[51].mxu1 }
0x2608   :  { %10325 = vmatprep.mubr.msk.f32.mxu1 %vm131_vm0, %v6445_v0 }
0x2609   :  { %10326 = vmatmul.mubr.msk.f32.vlgmr.msra.gmra.mrb[46].mxu1 %vm131_vm0, %v10316_v62 }
0x260a   :  { %10340 = vmatprep.mubr.msk.f32.mxu1 %vm11186_vm11, %v11185_v50 }
0x2669   :  { %v12038_v39 = vpop.f32.mrb[46].mxu0 }
0x266a   :  { %v6368_v44 = vpop.f32.mrb[47].mxu0 }
0x266b   :  { %v12044_v2 = vmul.f32 0.125, %v6368_v44 }
0x26dc   :  { %v12040_v55 = vpop.f32.mrb[46].mxu1 }
0x26dd   :  { %v6526_v38 = vpop.f32.mrb[47].mxu1 }
0x26de   :  { %6781 = vrot.lane.b32.xlu1 %v6526_v38, %s11187_s13  ;;  %10329 = vmatpush3.xpose.msk.msra.mxu0 %vm2383_vm12, %v6526_v38 }
0x26df   :  { %10333 = vmatprep.subr.mxu0 %v11185_v50 }
0x26e1   :  { %10331 = vmatmul.mubr.msk.f32.vlgmr.msra.gmra.mrb[52].mxu0 %vm2383_vm12, %v12044_v2 }
0x26e2   :  { %6779 = vrot.lane.b32.xlu1 %v12044_v2, %s11187_s13  ;;  %10334 = vmatpush3.xpose.msk.msra.mxu0 %vm2383_vm12, %v11914_v43 }
0x26e3   :  { %10335 = vmatprep.mubr.msk.f32.mxu0 %vm11186_vm11, %v11185_v50  ;;  %10343 = vmatprep.subr.mxu0 %v11185_v50 }
0x26e6   :  { %6857 = vrot.lane.b32.xlu1 %v12057_v9, %s11187_s13 }
0x26e9   :  { %10336 = vmatmul.mubr.msk.f32.vlgmr.msra.gmra.mrb[52].mxu0 %vm2383_vm12, %v12057_v9 }
0x26ea   :  { %10345 = vmatprep.mubr.msk.f32.mxu0 %vm11186_vm11, %v11185_v50 }
0x2750   :  { %v6782_v10 = vpop.permute.xlu1 %6781 }
0x2751   :  { %10344 = vmatpush3.xpose.msk.msra.mxu0 %vm2383_vm12, %v6782_v10 }
0x2752   :  { %10348 = vmatprep.subr.mxu0 %v11185_v50 }
0x2754   :  { %v6780_v43 = vpop.permute.xlu1 %6779 }
0x2755   :  { %10346 = vmatmul.mubr.msk.f32.vlgmr.msra.gmra.mrb[54].mxu0 %vm2383_vm12, %v6780_v43 }
0x2756   :  { %10349 = vmatpush3.xpose.msk.msra.mxu0 %vm2383_vm12, %v6860_v13  ;;  %10350 = vmatprep.mubr.msk.f32.mxu0 %vm11186_vm11, %v11185_v50 }
0x2757   :  { %10368 = vmatprep.subr.mxu0 %v11185_v50 }
0x2758   :  { %v6858_v15 = vpop.permute.xlu1 %6857 }
0x275d   :  { %10351 = vmatmul.mubr.msk.f32.vlgmr.msra.gmra.mrb[54].mxu0 %vm2383_vm12, %v6858_v15 }
0x275e   :  { %10370 = vmatprep.mubr.msk.f32.mxu0 %vm11186_vm11, %v11185_v50 }
0x27bc   :  { %v6688_v16 = vpop.f32.mrb[52].mxu0 }
0x27bd   :  { %v10337_v33 = vpop.f32.mrb[53].mxu0  ;;  %v6692_v37 = vsel %vm2383_vm12, %v6688_v16, -inf }
0x27be   :  { %6693 = vmax.xlane.f32.xlu0 %v6692_v37 }
0x2830   :  { %v6931_v21 = vpop.f32.mrb[54].mxu0 }
0x2831   :  { %v10352_v1 = vpop.f32.mrb[55].mxu0  ;;  %v6935_v22 = vsel %vm2383_vm12, %v6931_v21, -inf }
0x2832   :  { %6936 = vmax.xlane.f32.xlu1 %v6935_v22  ;;  %v12151_v1 = vmul.f32 0.17677669, %v11897_v6 }
0x2843   :  { %6946 = vrot.lane.b32.xlu1 %v11899_v41, %s11188_s17 }
0x2847   :  { %7024 = vrot.lane.b32.xlu1 %v6526_v38, %s11189_s21 }
0x284b   :  { %v6694_v24 = vpop.xlane.xlu0 %6693  ;;  %7022 = vrot.lane.b32.xlu1 %v12044_v2, %s11189_s21 }
0x284c   :  { %v6695_v47 = vsub.f32 %v6688_v16, %v6694_v24 }
0x284e   :  { %v6696_v25 = vmul.f32 1.442695, %v6695_v47 }
0x284f   :  { %7100 = vrot.lane.b32.xlu1 %v12057_v9, %s11189_s21 }
0x2850   :  { %11065 = vpow2.f32 %v6696_v25 }
0x2853   :  { %7267 = vrot.lane.b32.xlu1 %v6526_v38, %s11190_s25 }
0x285a   :  { %v11066_v26 = vpop.eup %11065 }
0x285b   :  { %v6698_v17 = vsel %vm2383_vm12, %v11066_v26, 0.0 }
0x285c   :  { %6699 = vadd.xlane.f32.xlu0 %v6698_v17 }
0x28bf   :  { %v6937_v19 = vpop.xlane.xlu1 %6936 }
0x28c0   :  { %v6938_v51 = vsub.f32 %v6931_v21, %v6937_v19  ;;  %v12146_v21 = vmul.f32 0.125, %v12038_v39 }
0x28c2   :  { %v6939_v29 = vmul.f32 1.442695, %v6938_v51 }
0x28c3   :  { %v6947_v40 = vpop.permute.xlu1 %6946 }
0x28c4   :  { %11067 = vpow2.f32 %v6939_v29 }
0x28c7   :  { %v7025_v3 = vpop.permute.xlu1 %7024 }
0x28cb   :  { %v7023_v7 = vpop.permute.xlu1 %7022 }
0x28ce   :  { %v11068_v31 = vpop.eup %11067 }
0x28cf   :  { %v6941_v32 = vsel %vm2383_vm12, %v11068_v31, 0.0  ;;  %v7101_v48 = vpop.permute.xlu1 %7100 }
0x28d0   :  { %6942 = vadd.xlane.f32.xlu0 %v6941_v32 }
0x28d3   :  { %v7268_v27 = vpop.permute.xlu1 %7267 }
0x28e6   :  { %6703 = vrot.lane.b32.xlu0 %v11899_v41, %s11191_s29 }
0x28e9   :  { %v6700_v34 = vpop.xlane.xlu0 %6699 }
0x28ea   :  { %7102 = vrot.lane.b32.xlu0 %v11899_v41, %s11192_s3  ;;  %11069 = vrcp.f32 %v6700_v34 }
0x28f4   :  { %v11070_v36 = vpop.eup %11069 }
0x28f5   :  { %v6702_v28 = vmul.f32 %v11070_v36, %v11066_v26 }
0x295d   :  { %v6943_v35 = vpop.xlane.xlu0 %6942 }
0x295e   :  { %11071 = vrcp.f32 %v6943_v35 }
0x2961   :  { %v6704_v46 = vpop.permute.xlu0 %6703 }
0x2962   :  { %10339 = vmatpush3.msra.mxu1 %v6704_v46 }
0x2963   :  { %10341 = vmatmul.mubr.msk.f32.vlgmr.msra.gmra.mrb[52].mxu1 %vm2383_vm12, %v6702_v28  ;;  %10353 = vmatprep.subr.mxu1 %v11185_v50 }
0x2964   :  { %10354 = vmatpush3.msra.mxu1 %v6947_v40  ;;  %10355 = vmatprep.mubr.msk.f32.mxu1 %vm11186_vm11, %v11185_v50 }
0x2965   :  { %10358 = vmatprep.subr.mxu1 %v11185_v50  ;;  %v7103_v52 = vpop.permute.xlu0 %7102 }
0x2968   :  { %v11072_v42 = vpop.eup %11071 }
0x2969   :  { %v6945_v12 = vmul.f32 %v11072_v42, %v11068_v31 }
0x296b   :  { %10356 = vmatmul.mubr.msk.f32.vlgmr.msra.gmra.mrb[54].mxu1 %vm2383_vm12, %v6945_v12 }
0x296c   :  { %10359 = vmatpush3.xpose.msk.msra.mxu1 %vm2383_vm12, %v7025_v3  ;;  %10360 = vmatprep.mubr.msk.f32.mxu1 %vm11186_vm11, %v11185_v50 }
0x296d   :  { %10363 = vmatprep.subr.mxu1 %v11185_v50 }
0x296f   :  { %10361 = vmatmul.mubr.msk.f32.vlgmr.msra.gmra.mrb[56].mxu1 %vm2383_vm12, %v7023_v7 }
0x2970   :  { %10364 = vmatpush3.xpose.msk.msra.mxu1 %vm2383_vm12, %v7103_v52  ;;  %10365 = vmatprep.mubr.msk.f32.mxu1 %vm11186_vm11, %v11185_v50 }
0x2971   :  { %10383 = vmatprep.subr.mxu1 %v11185_v50 }
0x2977   :  { %10366 = vmatmul.mubr.msk.f32.vlgmr.msra.gmra.mrb[56].mxu1 %vm2383_vm12, %v7101_v48 }
0x2978   :  { %10385 = vmatprep.mubr.msk.f32.mxu1 %vm11186_vm11, %v11185_v50 }
0x2a36   :  { %v12109_v60 = vpop.f32.mrb[52].mxu1 }
0x2a37   :  { %v10342_v49 = vpop.f32.mrb[53].mxu1 }
0x2a3e   :  { %v12111_v53 = vpop.f32.mrb[54].mxu1 }
0x2a3f   :  { %v10357_v8 = vpop.f32.mrb[55].mxu1 }
0x2a4a   :  { %v7174_v11 = vpop.f32.mrb[56].mxu1 }
0x2a4b   :  { %v10367_v4 = vpop.f32.mrb[57].mxu1  ;;  %v7178_v63 = vsel %vm2383_vm12, %v7174_v11, -inf }
0x2a4c   :  { %7179 = vmax.xlane.f32.xlu0 %v7178_v63 }
0x2a62   :  { %7189 = vrot.lane.b32.xlu0 %v11899_v41, %s11193_s8 }
0x2a66   :  { %7265 = vrot.lane.b32.xlu0 %v12044_v2, %s11190_s25 }
0x2a6a   :  { %7343 = vrot.lane.b32.xlu0 %v12057_v9, %s11190_s25 }
0x2ad9   :  { %v7180_v56 = vpop.xlane.xlu0 %7179 }
0x2ada   :  { %v7181_v59 = vsub.f32 %v7174_v11, %v7180_v56 }
0x2adc   :  { %v7182_v14 = vmul.f32 1.442695, %v7181_v59 }
0x2add   :  { %v7190_v18 = vpop.permute.xlu0 %7189 }
0x2ade   :  { %11073 = vpow2.f32 %v7182_v14  ;;  %10369 = vmatpush3.msra.mxu0 %v7190_v18 }
0x2adf   :  { %10373 = vmatprep.subr.mxu0 %v11185_v50 }
0x2ae1   :  { %v7266_v62 = vpop.permute.xlu0 %7265 }
0x2ae5   :  { %v7344_v44 = vpop.permute.xlu0 %7343 }
0x2ae8   :  { %v11074_v57 = vpop.eup %11073 }
0x2ae9   :  { %v7184_v23 = vsel %vm2383_vm12, %v11074_v57, 0.0 }
0x2aea   :  { %7185 = vadd.xlane.f32.xlu1 %v7184_v23 }
0x2afb   :  { %7345 = vrot.lane.b32.xlu1 %v11899_v41, %s11194_s14 }
0x2b77   :  { %v7186_v5 = vpop.xlane.xlu1 %7185 }
0x2b78   :  { %11075 = vrcp.f32 %v7186_v5 }
0x2b7b   :  { %v7346_v0 = vpop.permute.xlu1 %7345 }
0x2b82   :  { %v11076_v58 = vpop.eup %11075 }
0x2b83   :  { %v7188_v61 = vmul.f32 %v11076_v58, %v11074_v57 }
0x2b85   :  { %10371 = vmatmul.mubr.msk.f32.vlgmr.msra.gmra.mrb[56].mxu0 %vm2383_vm12, %v7188_v61 }
0x2b86   :  { %10374 = vmatpush3.xpose.msk.msra.mxu0 %vm2383_vm12, %v7268_v27  ;;  %10375 = vmatprep.mubr.msk.f32.mxu0 %vm11186_vm11, %v11185_v50 }
0x2b87   :  { %10378 = vmatprep.subr.mxu0 %v11185_v50 }
0x2b89   :  { %10376 = vmatmul.mubr.msk.f32.vlgmr.msra.gmra.mrb[58].mxu0 %vm2383_vm12, %v7266_v62 }
0x2b8a   :  { %10379 = vmatpush3.xpose.msk.msra.mxu0 %vm2383_vm12, %v7346_v0  ;;  %10380 = vmatprep.mubr.msk.f32.mxu0 %vm11186_vm11, %v11185_v50 }
0x2b8b   :  { %10398 = vmatprep.subr.mxu0 %v11185_v50 }
0x2b91   :  { %10381 = vmatmul.mubr.msk.f32.vlgmr.msra.gmra.mrb[58].mxu0 %vm2383_vm12, %v7344_v44 }
0x2b92   :  { %10400 = vmatprep.mubr.msk.f32.mxu0 %vm11186_vm11, %v11185_v50 }
0x2c58   :  { %v12137_v38 = vpop.f32.mrb[56].mxu0 }
0x2c59   :  { %v10372_v2 = vpop.f32.mrb[57].mxu0 }
0x2c64   :  { %v7417_v9 = vpop.f32.mrb[58].mxu0 }
0x2c65   :  { %v10382_v10 = vpop.f32.mrb[59].mxu0  ;;  %v7421_v43 = vsel %vm2383_vm12, %v7417_v9, -inf }
0x2c66   :  { %7422 = vmax.xlane.f32.xlu1 %v7421_v43 }
0x2cf3   :  { %v7423_v13 = vpop.xlane.xlu1 %7422 }
0x2cf4   :  { %v7424_v15 = vsub.f32 %v7417_v9, %v7423_v13 }
0x2cf6   :  { %v7425_v16 = vmul.f32 1.442695, %v7424_v15 }
0x2cf8   :  { %11077 = vpow2.f32 %v7425_v16 }
0x2d02   :  { %v11078_v33 = vpop.eup %11077 }
0x2d03   :  { %v7427_v37 = vsel %vm2383_vm12, %v11078_v33, 0.0 }
0x2d04   :  { %7428 = vadd.xlane.f32.xlu0 %v7427_v37 }
0x2d1a   :  { %7432 = vrot.lane.b32.xlu0 %v11899_v41, %s11195_s19 }
0x2d1e   :  { %7763 = vrot.lane.b32.xlu0 %v12040_v55, %s11187_s13 }
0x2d22   :  { %7761 = vrot.lane.b32.xlu0 %v12146_v21, %s11187_s13 }
0x2d26   :  { %7839 = vrot.lane.b32.xlu0 %v12151_v1, %s11187_s13 }
0x2d91   :  { %v7429_v22 = vpop.xlane.xlu0 %7428 }
0x2d92   :  { %11079 = vrcp.f32 %v7429_v22 }
0x2d95   :  { %v7433_v24 = vpop.permute.xlu0 %7432 }
0x2d96   :  { %10384 = vmatpush3.msra.mxu1 %v7433_v24 }
0x2d97   :  { %10388 = vmatprep.subr.mxu1 %v11185_v50 }
0x2d99   :  { %v7764_v28 = vpop.permute.xlu0 %7763 }
0x2d9c   :  { %v11080_v41 = vpop.eup %11079 }
0x2d9d   :  { %v7431_v47 = vmul.f32 %v11080_v41, %v11078_v33  ;;  %v7762_v40 = vpop.permute.xlu0 %7761 }
0x2d9f   :  { %10386 = vmatmul.mubr.msk.f32.vlgmr.msra.gmra.mrb[58].mxu1 %vm2383_vm12, %v7431_v47 }
0x2da0   :  { %10389 = vmatpush3.xpose.msk.msra.mxu1 %vm2383_vm12, %v12040_v55  ;;  %10390 = vmatprep.mubr.msk.f32.mxu1 %vm11186_vm11, %v11185_v50 }
0x2da1   :  { %10393 = vmatprep.subr.mxu1 %v11185_v50  ;;  %v7840_v3 = vpop.permute.xlu0 %7839 }
0x2da3   :  { %10391 = vmatmul.mubr.msk.f32.vlgmr.msra.gmra.mrb[60].mxu1 %vm2383_vm12, %v12146_v21 }
0x2da4   :  { %10394 = vmatpush3.xpose.msk.msra.mxu1 %vm2383_vm12, %v11916_v45  ;;  %10395 = vmatprep.mubr.msk.f32.mxu1 %vm11186_vm11, %v11185_v50 }
0x2da5   :  { %10413 = vmatprep.subr.mxu1 %v11185_v50 }
0x2dab   :  { %10396 = vmatmul.mubr.msk.f32.vlgmr.msra.gmra.mrb[60].mxu1 %vm2383_vm12, %v12151_v1 }
0x2dac   :  { %10415 = vmatprep.mubr.msk.f32.mxu1 %vm11186_vm11, %v11185_v50 }
0x2e72   :  { %v12173_v39 = vpop.f32.mrb[58].mxu1 }
0x2e73   :  { %v10387_v25 = vpop.f32.mrb[59].mxu1 }
0x2e7e   :  { %v7670_v26 = vpop.f32.mrb[60].mxu1 }
0x2e7f   :  { %v10397_v17 = vpop.f32.mrb[61].mxu1  ;;  %v7674_v19 = vsel %vm2383_vm12, %v7670_v26, -inf }
0x2e80   :  { %7675 = vmax.xlane.f32.xlu1 %v7674_v19 }
0x2e91   :  { %7685 = vrot.lane.b32.xlu1 %v11897_v6, %s11191_s29 }
0x2f0d   :  { %v7676_v45 = vpop.xlane.xlu1 %7675 }
0x2f0e   :  { %v7677_v51 = vsub.f32 %v7670_v26, %v7676_v45 }
0x2f10   :  { %v7678_v29 = vmul.f32 1.442695, %v7677_v51 }
0x2f11   :  { %v7686_v31 = vpop.permute.xlu1 %7685 }
0x2f12   :  { %11081 = vpow2.f32 %v7678_v29  ;;  %10399 = vmatpush3.msra.mxu0 %v7686_v31 }
0x2f13   :  { %10403 = vmatprep.subr.mxu0 %v11185_v50 }
0x2f1c   :  { %v11082_v32 = vpop.eup %11081 }
0x2f1d   :  { %v7680_v34 = vsel %vm2383_vm12, %v11082_v32, 0.0 }
0x2f1e   :  { %7681 = vadd.xlane.f32.xlu1 %v7680_v34 }
0x2f2f   :  { %7841 = vrot.lane.b32.xlu1 %v11897_v6, %s11184_s9 }
0x2fab   :  { %v7682_v35 = vpop.xlane.xlu1 %7681 }
0x2fac   :  { %11083 = vrcp.f32 %v7682_v35 }
0x2faf   :  { %v7842_v42 = vpop.permute.xlu1 %7841 }
0x2fb6   :  { %v11084_v36 = vpop.eup %11083 }
0x2fb7   :  { %v7684_v46 = vmul.f32 %v11084_v36, %v11082_v32 }
0x2fb9   :  { %10401 = vmatmul.mubr.msk.f32.vlgmr.msra.gmra.mrb[60].mxu0 %vm2383_vm12, %v7684_v46  ;;  %v9331_v46 = vld [vmem:[%s12358_s16 + $0x20] sm:$0xff] }
0x2fba   :  { %10404 = vmatpush3.xpose.msk.msra.mxu0 %vm2383_vm12, %v7764_v28  ;;  %10405 = vmatprep.mubr.msk.f32.mxu0 %vm11186_vm11, %v11185_v50 }
0x2fbb   :  { %10408 = vmatprep.subr.mxu0 %v11185_v50 }
0x2fbd   :  { %10406 = vmatmul.mubr.msk.f32.vlgmr.msra.gmra.mrb[62].mxu0 %vm2383_vm12, %v7762_v40  ;;  %v9332_v40 = vld [vmem:[%s12358_s16 + $0x28] sm:$0xff] }
0x2fbe   :  { %10409 = vmatpush3.xpose.msk.msra.mxu0 %vm2383_vm12, %v7842_v42  ;;  %10410 = vmatprep.mubr.msk.f32.mxu0 %vm11186_vm11, %v11185_v50  ;;  %v9333_v42 = vld [vmem:[%s12358_s16 + $0x30] sm:$0xff] }
0x2fbf   :  { %10428 = vmatprep.subr.mxu0 %v11185_v50 }
0x2fc5   :  { %10411 = vmatmul.mubr.msk.f32.vlgmr.msra.gmra.mrb[62].mxu0 %vm2383_vm12, %v7840_v3  ;;  %v10812_v3 = vpack.c.bf16 %v9332_v40, %v9331_v46 }
0x2fc6   :  { %10430 = vmatprep.mubr.msk.f32.mxu0 %vm11186_vm11, %v11185_v50 }
0x308c   :  { %v12195_v12 = vpop.f32.mrb[60].mxu0 }
0x308d   :  { %v10402_v7 = vpop.f32.mrb[61].mxu0 }
0x308e   :  { %v9334_v7 = vld [vmem:[%s12358_s16 + $0x38] sm:$0xff] }
0x3098   :  { %v7913_v52 = vpop.f32.mrb[62].mxu0 }
0x3099   :  { %v10412_v48 = vpop.f32.mrb[63].mxu0  ;;  %v7917_v49 = vsel %vm2383_vm12, %v7913_v52, -inf }
0x309a   :  { %7918 = vmax.xlane.f32.xlu1 %v7917_v49 }
0x30ab   :  { %8006 = vrot.lane.b32.xlu1 %v12040_v55, %s11189_s21 }
0x30af   :  { %8004 = vrot.lane.b32.xlu1 %v12146_v21, %s11189_s21 }
0x30b3   :  { %8082 = vrot.lane.b32.xlu1 %v12151_v1, %s11189_s21 }
0x30b7   :  { %8249 = vrot.lane.b32.xlu1 %v12040_v55, %s11190_s25 }
0x3127   :  { %v7919_v8 = vpop.xlane.xlu1 %7918 }
0x3128   :  { %v7920_v11 = vsub.f32 %v7913_v52, %v7919_v8  ;;  %v10816_v52 = vpack.c.bf16 %v9334_v7, %v9333_v42  ;;  %v9351_v42 = vld [vmem:[%s12363_s28 + $0x40] sm:$0xff] }
0x312a   :  { %v7921_v4 = vmul.f32 1.442695, %v7920_v11 }
0x312b   :  { %v8007_v18 = vpop.permute.xlu1 %8006 }
0x312c   :  { %11085 = vpow2.f32 %v7921_v4 }
0x312f   :  { %v8005_v23 = vpop.permute.xlu1 %8004 }
0x3133   :  { %v8083_v5 = vpop.permute.xlu1 %8082 }
0x3136   :  { %v11086_v63 = vpop.eup %11085 }
0x3137   :  { %v7923_v56 = vsel %vm2383_vm12, %v11086_v63, 0.0  ;;  %v8250_v16 = vpop.permute.xlu1 %8249 }
0x3138   :  { %7924 = vadd.xlane.f32.xlu0 %v7923_v56 }
0x314e   :  { %7928 = vrot.lane.b32.xlu0 %v11897_v6, %s11188_s17 }
0x3152   :  { %8084 = vrot.lane.b32.xlu0 %v11897_v6, %s11192_s3 }
0x31c5   :  { %v7925_v59 = vpop.xlane.xlu0 %7924 }
0x31c6   :  { %11087 = vrcp.f32 %v7925_v59  ;;  %v9336_v59 = vld [vmem:[%s12359_s18 + $0x1] ss:$0 sm:$0xff] }
0x31c9   :  { %v7929_v14 = vpop.permute.xlu0 %7928 }
0x31ca   :  { %10414 = vmatpush3.msra.mxu1 %v7929_v14 }
0x31cb   :  { %10418 = vmatprep.subr.mxu1 %v11185_v50 }
0x31cd   :  { %v8085_v27 = vpop.permute.xlu0 %8084 }
0x31d0   :  { %v11088_v55 = vpop.eup %11087 }
0x31d1   :  { %v7927_v57 = vmul.f32 %v11088_v55, %v11086_v63 }
0x31d3   :  { %10416 = vmatmul.mubr.msk.f32.vlgmr.msra.gmra.mrb[62].mxu1 %vm2383_vm12, %v7927_v57 }
0x31d4   :  { %10419 = vmatpush3.xpose.msk.msra.mxu1 %vm2383_vm12, %v8007_v18  ;;  %10420 = vmatprep.mubr.msk.f32.mxu1 %vm11186_vm11, %v11185_v50 }
0x31d5   :  { %10423 = vmatprep.subr.mxu1 %v11185_v50 }
0x31d7   :  { %10421 = vmatmul.mubr.msk.f32.vlgmr.msra.gmra.mrb[64].mxu1 %vm2383_vm12, %v8005_v23 }
0x31d8   :  { %10424 = vmatpush3.xpose.msk.msra.mxu1 %vm2383_vm12, %v8085_v27  ;;  %10425 = vmatprep.mubr.msk.f32.mxu1 %vm11186_vm11, %v11185_v50 }
0x31d9   :  { %10443 = vmatprep.subr.mxu1 %v11185_v50 }
0x31df   :  { %10426 = vmatmul.mubr.msk.f32.vlgmr.msra.gmra.mrb[64].mxu1 %vm2383_vm12, %v8083_v5 }
0x31e0   :  { %10445 = vmatprep.mubr.msk.f32.mxu1 %vm11186_vm11, %v11185_v50 }
0x32a6   :  { %v8000_v58 = vpop.f32.mrb[62].mxu1 }
0x32a7   :  { %v10417_v61 = vpop.f32.mrb[63].mxu1 }
0x32b2   :  { %v8156_v62 = vpop.f32.mrb[64].mxu1 }
0x32b3   :  { %v10427_v0 = vpop.f32.mrb[65].mxu1  ;;  %v8160_v44 = vsel %vm2383_vm12, %v8156_v62, -inf }
0x32b4   :  { %8161 = vmax.xlane.f32.xlu0 %v8160_v44 }
0x32ca   :  { %8171 = vrot.lane.b32.xlu0 %v11897_v6, %s11193_s8 }
0x32ce   :  { %8247 = vrot.lane.b32.xlu0 %v12146_v21, %s11190_s25 }
0x32d2   :  { %8325 = vrot.lane.b32.xlu0 %v12151_v1, %s11190_s25 }
0x3341   :  { %v8162_v2 = vpop.xlane.xlu0 %8161 }
0x3342   :  { %v8163_v9 = vsub.f32 %v8156_v62, %v8162_v2 }
0x3344   :  { %v8164_v10 = vmul.f32 1.442695, %v8163_v9 }
0x3345   :  { %v8172_v43 = vpop.permute.xlu0 %8171 }
0x3346   :  { %11089 = vpow2.f32 %v8164_v10  ;;  %10429 = vmatpush3.msra.mxu0 %v8172_v43  ;;  %v9343_v43 = vld [vmem:[%s12360_s22 + $0x20] sm:$0xff] }
0x3347   :  { %10433 = vmatprep.subr.mxu0 %v11185_v50 }
0x3349   :  { %v8248_v1 = vpop.permute.xlu0 %8247 }
0x334d   :  { %v8326_v24 = vpop.permute.xlu0 %8325 }
0x3350   :  { %v11090_v13 = vpop.eup %11089 }
0x3351   :  { %v8166_v15 = vsel %vm2383_vm12, %v11090_v13, 0.0 }
0x3352   :  { %8167 = vadd.xlane.f32.xlu1 %v8166_v15  ;;  %v9345_v15 = vld [vmem:[%s12360_s22 + $0x30] sm:$0xff] }
0x3363   :  { %8327 = vrot.lane.b32.xlu1 %v11897_v6, %s11194_s14 }
0x33df   :  { %v8168_v33 = vpop.xlane.xlu1 %8167 }
0x33e0   :  { %11091 = vrcp.f32 %v8168_v33  ;;  %v9346_v33 = vld [vmem:[%s12360_s22 + $0x38] sm:$0xff] }
0x33e3   :  { %v8328_v22 = vpop.permute.xlu1 %8327 }
0x33ea   :  { %v11092_v37 = vpop.eup %11091 }
0x33eb   :  { %v8170_v21 = vmul.f32 %v11092_v37, %v11090_v13  ;;  %v9344_v13 = vld [vmem:[%s12360_s22 + $0x28] sm:$0xff]  ;;  %v10824_v37 = vpack.c.bf16 %v9346_v33, %v9345_v15 }
0x33ed   :  { %10431 = vmatmul.mubr.msk.f32.vlgmr.msra.gmra.mrb[64].mxu0 %vm2383_vm12, %v8170_v21 }
0x33ee   :  { %10434 = vmatpush3.xpose.msk.msra.mxu0 %vm2383_vm12, %v8250_v16  ;;  %10435 = vmatprep.mubr.msk.f32.mxu0 %vm11186_vm11, %v11185_v50  ;;  %v10820_v16 = vpack.c.bf16 %v9344_v13, %v9343_v43 }
0x33ef   :  { %10438 = vmatprep.subr.mxu0 %v11185_v50 }
0x33f1   :  { %10436 = vmatmul.mubr.msk.f32.vlgmr.msra.gmra.mrb[66].mxu0 %vm2383_vm12, %v8248_v1 }
0x33f2   :  { %10439 = vmatpush3.xpose.msk.msra.mxu0 %vm2383_vm12, %v8328_v22  ;;  %10440 = vmatprep.mubr.msk.f32.mxu0 %vm11186_vm11, %v11185_v50 }
0x33f3   :  { %10821 = vmatprep.subr.bf16.mxu0 %v10820_v16 }
0x33f9   :  { %10441 = vmatmul.mubr.msk.f32.vlgmr.msra.gmra.mrb[66].mxu0 %vm2383_vm12, %v8326_v24 }
0x33fa   :  { %10823 = vmatpush3.bf16.msra.mxu0 %v10820_v16 }
0x33fb   :  { %10825 = vmatprep.subr.bf16.mxu0 %v10824_v37 }
0x33fe   :  { %10827 = vmatpush3.bf16.msra.mxu0 %v10824_v37 }
0x34c0   :  { %v8243_v41 = vpop.f32.mrb[64].mxu0 }
0x34c1   :  { %v10432_v47 = vpop.f32.mrb[65].mxu0 }
0x34cc   :  { %v8399_v25 = vpop.f32.mrb[66].mxu0 }
0x34cd   :  { %v10442_v26 = vpop.f32.mrb[67].mxu0  ;;  %v8403_v17 = vsel %vm2383_vm12, %v8399_v25, -inf }
0x34ce   :  { %8404 = vmax.xlane.f32.xlu1 %v8403_v17 }
0x34df   :  { %7509 = vrot.lane.b32.xlu1 %v12111_v53, %s11196_s20 }
0x34e3   :  { %7513 = vrot.lane.b32.xlu1 %v12137_v38, %s11197_s4 }
0x34e7   :  { %7517 = vrot.lane.b32.xlu1 %v12173_v39, %s11198_s15 }
0x355b   :  { %v8405_v50 = vpop.xlane.xlu1 %8404 }
0x355c   :  { %v8406_v19 = vsub.f32 %v8399_v25, %v8405_v50 }
0x355e   :  { %v8407_v45 = vmul.f32 1.442695, %v8406_v19 }
0x355f   :  { %v7510_v53 = vpop.permute.xlu1 %7509 }
0x3560   :  { %11093 = vpow2.f32 %v8407_v45  ;;  %v7520_v35 = vsel %vm2383_vm12, %v12109_v60, %v7510_v53 }
0x3563   :  { %v7514_v31 = vpop.permute.xlu1 %7513 }
0x3564   :  { %v7521_v36 = vsel %vm1074_vm2, %v7520_v35, %v7514_v31  ;;  %v9341_v31 = vld [vmem:[%s12361_s23 + $0x1] ss:$0 sm:$0xff] }
0x3567   :  { %v7518_v34 = vpop.permute.xlu1 %7517 }
0x3568   :  { %v7522_v28 = vsel %vm3365_vm13, %v7521_v36, %v7518_v34  ;;  %v9342_v34 = vld [vmem:[%s12362_s26 + $0x1] ss:$0 sm:$0xff] }
0x356a   :  { %v11094_v51 = vpop.eup %11093 }
0x356b   :  { %v8409_v29 = vsel %vm2383_vm12, %v11094_v51, 0.0 }
0x356c   :  { %8410 = vadd.xlane.f32.xlu0 %v8409_v29 }
0x3582   :  { %8414 = vrot.lane.b32.xlu0 %v11897_v6, %s11195_s19 }
0x3586   :  { %8491 = vrot.lane.b32.xlu0 %v8000_v58, %s11196_s20 }
0x358a   :  { %8495 = vrot.lane.b32.xlu0 %v8243_v41, %s11197_s4 }
0x35f9   :  { %v8411_v38 = vpop.xlane.xlu0 %8410 }
0x35fa   :  { %11095 = vrcp.f32 %v8411_v38 }
0x35fd   :  { %v8415_v39 = vpop.permute.xlu0 %8414 }
0x35fe   :  { %10444 = vmatpush3.msra.mxu1 %v8415_v39 }
0x35ff   :  { %10813 = vmatprep.subr.bf16.mxu1 %v10812_v3 }
0x3601   :  { %v8492_v49 = vpop.permute.xlu0 %8491 }
0x3602   :  { %v8502_v11 = vsel %vm2383_vm12, %v12195_v12, %v8492_v49  ;;  %v9355_v49 = vld [vmem:[%s12363_s28 + $0x60] sm:$0xff] }
0x3604   :  { %v11096_v32 = vpop.eup %11095 }
0x3605   :  { %v8413_v6 = vmul.f32 %v11096_v32, %v11094_v51  ;;  %v8496_v8 = vpop.permute.xlu0 %8495 }
0x3606   :  { %v8503_v4 = vsel %vm1074_vm2, %v8502_v11, %v8496_v8  ;;  %v9356_v8 = vld [vmem:[%s12363_s28 + $0x68] sm:$0xff] }
0x3607   :  { %10446 = vmatmul.mubr.msk.f32.vlgmr.msra.gmra.mrb[66].mxu1 %vm2383_vm12, %v8413_v6  ;;  %v10836_v11 = vpack.c.bf16 %v9356_v8, %v9355_v49  ;;  %v9360_v49 = vld [vmem:[%s12365_s2 + $0x1] ss:$0 sm:$0xff] }
0x3608   :  { %10456 = vmatprep.mubr.msk.f32.mxu1 %vm131_vm0, %v7522_v28  ;;  %10815 = vmatpush3.bf16.msra.mxu1 %v10812_v3  ;;  %v9352_v3 = vld [vmem:[%s12363_s28 + $0x48] sm:$0xff] }
0x3609   :  { %10817 = vmatprep.subr.bf16.mxu1 %v10816_v52  ;;  %v10828_v7 = vpack.c.bf16 %v9352_v3, %v9351_v42 }
0x360c   :  { %10819 = vmatpush3.bf16.msra.mxu1 %v10816_v52  ;;  %v9353_v52 = vld [vmem:[%s12363_s28 + $0x50] sm:$0xff] }
0x360d   :  { %10829 = vmatprep.subr.bf16.mxu1 %v10828_v7 }
0x36da   :  { %v8486_v60 = vpop.f32.mrb[66].mxu1 }
0x36db   :  { %8499 = vrot.lane.b32.xlu1 %v8486_v60, %s11198_s15  ;;  %v10447_v48 = vpop.f32.mrb[67].mxu1  ;;  %v9354_v60 = vld [vmem:[%s12363_s28 + $0x58] sm:$0xff] }
0x36dc   :  { %v10832_v48 = vpack.c.bf16 %v9354_v60, %v9353_v52 }
0x374d   :  { %v8500_v63 = vpop.permute.xlu1 %8499 }
0x374e   :  { %v8504_v56 = vsel %vm3365_vm13, %v8503_v4, %v8500_v63  ;;  %v9357_v4 = vld [vmem:[%s12363_s28 + $0x70] sm:$0xff]  ;;  %v9358_v63 = vld [vmem:[%s12363_s28 + $0x78] sm:$0xff] }
0x374f   :  { %10457 = vmatmul.mubr.msk.f32.vlgmr.msra.gmra.mrb[68].mxu1 %vm131_vm0, %v8504_v56  ;;  %v10840_v56 = vpack.c.bf16 %v9358_v63, %v9357_v4 }
0x3750   :  { %10831 = vmatpush3.bf16.msra.mxu1 %v10828_v7 }
0x3751   :  { %10833 = vmatprep.subr.bf16.mxu1 %v10832_v48 }
0x3754   :  { %10835 = vmatpush3.bf16.msra.mxu1 %v10832_v48 }
0x3755   :  { %10837 = vmatprep.subr.bf16.mxu1 %v10836_v11 }
0x3758   :  { %10839 = vmatpush3.bf16.msra.mxu1 %v10836_v11 }
0x3759   :  { %10841 = vmatprep.subr.bf16.mxu1 %v10840_v56 }
0x375c   :  { %10843 = vmatpush3.bf16.msra.mxu1 %v10840_v56 }
0x3822   :  { %v10458_v14 = vpop.f32.mrb[68].mxu1 }
0x3823   :  { %v8596_v55 = vadd.f32 %v10458_v14, %v9336_v59  ;;  %v8590_v18 = vpop.f32.mrb[69].mxu1 }
0x3824   :  { %v8591_v57 = vadd.f32 %v9336_v59, %v8590_v18  ;;  %v9348_v59 = vld [vmem:[%s12364_s1 + $0x1] ss:$0 sm:$0xff] }
0x3825   :  { %v8600_v23 = vadd.f32 %v8596_v55, %v11886_v30 }
0x3826   :  { %v8599_v27 = vadd.f32 %v8591_v57, %v11884_v54 }
0x3827   :  { %v8608_v5 = vsel %vm131_vm0, %v8600_v23, 0.0 }
0x3828   :  { %8609 = vadd.xlane.f32.xlu1 %v8608_v5  ;;  %v8605_v12 = vsel %vm131_vm0, %v8599_v27, 0.0 }
0x3829   :  { %8606 = vadd.xlane.f32.xlu0 %v8605_v12 }
0x38b5   :  { %v8610_v58 = vpop.xlane.xlu1 %8609 }
0x38b6   :  { %v8612_v61 = vmul.f32 0.03125, %v8610_v58  ;;  %v8607_v62 = vpop.xlane.xlu0 %8606 }
0x38b7   :  { %v8611_v0 = vmul.f32 0.03125, %v8607_v62 }
0x38b8   :  { %v8614_v44 = vsub.f32 %v8600_v23, %v8612_v61 }
0x38b9   :  { %v8613_v2 = vsub.f32 %v8599_v27, %v8611_v0 }
0x38ba   :  { %v8616_v54 = vmul.f32 %v8614_v44, %v8614_v44 }
0x38bb   :  { %v8615_v9 = vmul.f32 %v8613_v2, %v8613_v2 }
0x38bc   :  { %v8620_v10 = vsel %vm131_vm0, %v8616_v54, 0.0 }
0x38bd   :  { %v8617_v30 = vsel %vm131_vm0, %v8615_v9, 0.0 }
0x38be   :  { %8618 = vadd.xlane.f32.xlu0 %v8617_v30 }
0x38c2   :  { %8621 = vadd.xlane.f32.xlu0 %v8620_v10 }
0x394b   :  { %v8619_v21 = vpop.xlane.xlu0 %8618 }
0x394c   :  { %v8623_v1 = vmul.f32 0.03125, %v8619_v21 }
0x394e   :  { %v8625_v22 = vadd.f32 1e-05, %v8623_v1 }
0x394f   :  { %v8622_v24 = vpop.xlane.xlu0 %8621 }
0x3950   :  { %11097 = vrsqrt.f32 %v8625_v22  ;;  %v8624_v41 = vmul.f32 0.03125, %v8622_v24  ;;  %vm8629_vm2 = vcmp.eq.f32.partialorder %v8625_v22, inf  ;;  %v8632_v17 = vand.u32 2147483648, %v8625_v22 }
0x3951   :  { %vm8631_vm11 = vcmp.eq.f32.partialorder %v8625_v22, 0.0 }
0x3952   :  { %v8626_v47 = vadd.f32 1e-05, %v8624_v41 }
0x3954   :  { %11099 = vrsqrt.f32 %v8626_v47  ;;  %vm8636_vm12 = vcmp.eq.f32.partialorder %v8626_v47, inf  ;;  %v8639_v29 = vand.u32 2147483648, %v8626_v47  ;;  %vm8638_vm13 = vcmp.eq.f32.partialorder %v8626_v47, 0.0 }
0x395a   :  { %v11098_v25 = vpop.eup %11097 }
0x395b   :  { %v8628_v26 = vmul.f32 %v11098_v25, %v8625_v22 }
0x395d   :  { %v8630_v50 = vsel %vm8629_vm2, %v8625_v22, %v8628_v26 }
0x395e   :  { %v8633_v19 = vsel %vm8631_vm11, %v8632_v17, %v8630_v50  ;;  %v11100_v45 = vpop.eup %11099 }
0x395f   :  { %11101 = vrcp.f32 %v8633_v19  ;;  %v8635_v51 = vmul.f32 %v11100_v45, %v8626_v47 }
0x3961   :  { %v8637_v53 = vsel %vm8636_vm12, %v8626_v47, %v8635_v51 }
0x3962   :  { %v8640_v38 = vsel %vm8638_vm13, %v8639_v29, %v8637_v53 }
0x3963   :  { %11103 = vrcp.f32 %v8640_v38 }
0x3969   :  { %v11102_v39 = vpop.eup %11101 }
0x396a   :  { %v8642_v32 = vmul.f32 %v11102_v39, %v8613_v2 }
0x396c   :  { %v8651_v35 = vmul.f32 %v9341_v31, %v8642_v32 }
0x396d   :  { %v11104_v6 = vpop.eup %11103 }
0x396e   :  { %v12287_v36 = vadd.f32 %v9342_v34, %v8651_v35  ;;  %v8644_v28 = vmul.f32 %v11104_v6, %v8614_v44 }
0x3970   :  { %10467 = vmatprep.mubr.msk.f32.mxu0 %vm131_vm0, %v12287_v36  ;;  %v8652_v46 = vmul.f32 %v9341_v31, %v8644_v28 }
0x3972   :  { %v12291_v40 = vadd.f32 %v9342_v34, %v8652_v46 }
0x3974   :  { %10468 = vmatmul.mubr.msk.f32.vlgmr.msra.gmra.mrb[68].mxu0 %vm131_vm0, %v12291_v40 }
0x3a47   :  { %v10469_v14 = vpop.f32.mrb[68].mxu0 }
0x3a48   :  { %v8752_v55 = vadd.f32 %v10469_v14, %v9348_v59  ;;  %v8746_v18 = vpop.f32.mrb[69].mxu0 }
0x3a49   :  { %v8747_v57 = vadd.f32 %v9348_v59, %v8746_v18 }
0x3a4a   :  { %v8758_v23 = vmul.f32 0.70710677, %v8752_v55  ;;  %v8756_v52 = vmul.f32 0.5, %v8752_v55 }
0x3a4b   :  { %v8757_v27 = vmul.f32 0.70710677, %v8747_v57  ;;  %v8755_v3 = vmul.f32 0.5, %v8747_v57 }
0x3a4c   :  { %v8764_v5 = vand.u32 2147483647, %v8758_v23  ;;  %vm8760_vm9 = vcmp.lt.f32.partialorder %v8758_v23, 0.0 }
0x3a4d   :  { %v8763_v12 = vand.u32 2147483647, %v8757_v27  ;;  %vm8759_vm10 = vcmp.lt.f32.partialorder %v8757_v27, 0.0  ;;  %v8762_v34 = vsel %vm8760_vm9, -1.0, %v11199_v20 }
0x3a4e   :  { %v8766_v58 = vmul.f32 0.3275911, %v8764_v5  ;;  %v8792_v44 = vsub.f32 0.0, %v8764_v5  ;;  %v8761_v28 = vsel %vm8759_vm10, -1.0, %v11199_v20 }
0x3a4f   :  { %v8765_v61 = vmul.f32 0.3275911, %v8763_v12  ;;  %v8791_v2 = vsub.f32 0.0, %v8763_v12 }
0x3a50   :  { %v8768_v62 = vadd.f32 1.0, %v8766_v58  ;;  %v8794_v30 = vmul.f32 %v8792_v44, %v8764_v5 }
0x3a51   :  { %v8767_v0 = vadd.f32 1.0, %v8765_v61  ;;  %v8793_v43 = vmul.f32 %v8791_v2, %v8763_v12  ;;  %v8969_v61 = vld [vmem:[%s12368_s30] sm:$0xff]  ;;  %v8972_v2 = vld [vmem:[%s12368_s30 + $0x18] sm:$0xff] }
0x3a52   :  { %11105 = vrcp.f32 %v8768_v62  ;;  %v8797_v16 = vmul.f32 1.442695, %v8794_v30  ;;  %v8970_v62 = vld [vmem:[%s12368_s30 + $0x8] sm:$0xff] }
0x3a53   :  { %11107 = vrcp.f32 %v8767_v0  ;;  %v8795_v21 = vmul.f32 1.442695, %v8793_v43  ;;  %v8971_v0 = vld [vmem:[%s12368_s30 + $0x10] sm:$0xff]  ;;  %v10844_v44 = vpack.c.bf16 %v8970_v62, %v8969_v61 }
0x3a54   :  { %11109 = vpow2.f32 %v8797_v16 }
0x3a55   :  { %11111 = vpow2.f32 %v8795_v21  ;;  %10845 = vmatprep.subr.bf16.mxu0 %v10844_v44 }
0x3a56   :  { %10847 = vmatpush3.bf16.msra.mxu0 %v10844_v44 }
0x3a5c   :  { %v11106_v9 = vpop.eup %11105 }
0x3a5d   :  { %v11108_v54 = vpop.eup %11107  ;;  %v8774_v10 = vmul.f32 1.0614054, %v11106_v9 }
0x3a5e   :  { %v8773_v13 = vmul.f32 1.0614054, %v11108_v54  ;;  %v11110_v29 = vpop.eup %11109 }
0x3a5f   :  { %v8776_v15 = vadd.f32 -1.4531521, %v8774_v10  ;;  %v11112_v38 = vpop.eup %11111 }
0x3a60   :  { %v8775_v33 = vadd.f32 -1.4531521, %v8773_v13 }
0x3a61   :  { %v8778_v37 = vmul.f32 %v11106_v9, %v8776_v15 }
0x3a62   :  { %v8777_v1 = vmul.f32 %v11108_v54, %v8775_v33 }
0x3a63   :  { %v8780_v22 = vadd.f32 1.4214138, %v8778_v37 }
0x3a64   :  { %v8779_v24 = vadd.f32 1.4214138, %v8777_v1 }
0x3a65   :  { %v8782_v41 = vmul.f32 %v11106_v9, %v8780_v22 }
0x3a66   :  { %v8781_v47 = vmul.f32 %v11108_v54, %v8779_v24 }
0x3a67   :  { %v8784_v25 = vadd.f32 -0.28449672, %v8782_v41 }
0x3a68   :  { %v8783_v26 = vadd.f32 -0.28449672, %v8781_v47 }
0x3a69   :  { %v8786_v17 = vmul.f32 %v11106_v9, %v8784_v25 }
0x3a6a   :  { %v8785_v50 = vmul.f32 %v11108_v54, %v8783_v26 }
0x3a6b   :  { %v8788_v19 = vadd.f32 0.2548296, %v8786_v17  ;;  %v9365_v17 = vld [vmem:[%s12366_s24 + $0x1] ss:$0 sm:$0xff] }
0x3a6c   :  { %v8787_v45 = vadd.f32 0.2548296, %v8785_v50 }
0x3a6d   :  { %v8790_v51 = vmul.f32 %v11106_v9, %v8788_v19  ;;  %v10848_v9 = vpack.c.bf16 %v8972_v2, %v8971_v0 }
0x3a6e   :  { %v8789_v53 = vmul.f32 %v11108_v54, %v8787_v45 }
0x3a6f   :  { %v8800_v39 = vmul.f32 %v11110_v29, %v8790_v51  ;;  %10849 = vmatprep.subr.bf16.mxu0 %v10848_v9  ;;  %v9366_v51 = vld [vmem:[%s12367_s7 + $0x1] ss:$0 sm:$0xff] }
0x3a70   :  { %v8799_v31 = vmul.f32 %v11112_v38, %v8789_v53  ;;  %10851 = vmatpush3.bf16.msra.mxu0 %v10848_v9 }
0x3a71   :  { %v8802_v32 = vsub.f32 1.0, %v8800_v39 }
0x3a72   :  { %v8801_v35 = vsub.f32 1.0, %v8799_v31  ;;  %v9367_v31 = vld [vmem:[%s12369_s6] ss:$0 sm:$0xff] }
0x3a73   :  { %v8804_v6 = vmul.f32 %v8802_v32, %v8762_v34 }
0x3a74   :  { %v8803_v46 = vmul.f32 %v8801_v35, %v8761_v28 }
0x3a75   :  { %v8806_v42 = vadd.f32 1.0, %v8804_v6 }
0x3a76   :  { %v8805_v7 = vadd.f32 1.0, %v8803_v46 }
0x3a77   :  { %v8808_v48 = vmul.f32 %v8806_v42, %v8756_v52 }
0x3a78   :  { %v8807_v60 = vmul.f32 %v8805_v7, %v8755_v3 }
0x3a7a   :  { %10486 = vmatprep.mubr.msk.f32.mxu1 %vm4662_vm6, %v8807_v60 }
0x3a7b   :  { %10487 = vmatmul.mubr.msk.f32.vlgmr.msra.gmra.mrb[70].mxu1 %vm4662_vm6, %v8808_v48 }
0x3b4e   :  { %v10488_v8 = vpop.f32.mrb[70].mxu1 }
0x3b4f   :  { %v8904_v11 = vadd.f32 %v10488_v8, %v9360_v49  ;;  %v8898_v4 = vpop.f32.mrb[71].mxu1 }
0x3b50   :  { %v8899_v63 = vadd.f32 %v9360_v49, %v8898_v4 }
0x3b51   :  { %v8908_v56 = vadd.f32 %v8904_v11, %v12291_v40 }
0x3b52   :  { %v8907_v20 = vadd.f32 %v8899_v63, %v12287_v36 }
0x3b53   :  { %v8916_v59 = vsel %vm131_vm0, %v8908_v56, 0.0 }
0x3b54   :  { %8917 = vadd.xlane.f32.xlu1 %v8916_v59  ;;  %v8913_v14 = vsel %vm131_vm0, %v8907_v20, 0.0 }
0x3b55   :  { %8914 = vadd.xlane.f32.xlu0 %v8913_v14 }
0x3be1   :  { %v8918_v55 = vpop.xlane.xlu1 %8917 }
0x3be2   :  { %v8920_v18 = vmul.f32 0.03125, %v8918_v55  ;;  %v8915_v57 = vpop.xlane.xlu0 %8914 }
0x3be3   :  { %v8919_v23 = vmul.f32 0.03125, %v8915_v57 }
0x3be4   :  { %v8922_v27 = vsub.f32 %v8908_v56, %v8920_v18 }
0x3be5   :  { %v8921_v5 = vsub.f32 %v8907_v20, %v8919_v23 }
0x3be6   :  { %v8924_v12 = vmul.f32 %v8922_v27, %v8922_v27 }
0x3be7   :  { %v8923_v40 = vmul.f32 %v8921_v5, %v8921_v5 }
0x3be8   :  { %v8928_v36 = vsel %vm131_vm0, %v8924_v12, 0.0 }
0x3be9   :  { %8929 = vadd.xlane.f32.xlu1 %v8928_v36  ;;  %v8925_v58 = vsel %vm131_vm0, %v8923_v40, 0.0 }
0x3bea   :  { %8926 = vadd.xlane.f32.xlu0 %v8925_v58 }
0x3c76   :  { %v8930_v30 = vpop.xlane.xlu1 %8929 }
0x3c77   :  { %v8932_v54 = vmul.f32 0.03125, %v8930_v30  ;;  %v8927_v10 = vpop.xlane.xlu0 %8926 }
0x3c78   :  { %v8931_v43 = vmul.f32 0.03125, %v8927_v10 }
0x3c79   :  { %v8934_v13 = vadd.f32 1e-05, %v8932_v54 }
0x3c7a   :  { %v8933_v15 = vadd.f32 1e-05, %v8931_v43 }
0x3c7b   :  { %11113 = vrsqrt.f32 %v8934_v13  ;;  %vm8944_vm14 = vcmp.eq.f32.partialorder %v8934_v13, inf  ;;  %v8947_v21 = vand.u32 2147483648, %v8934_v13  ;;  %vm8946_vm15 = vcmp.eq.f32.partialorder %v8934_v13, 0.0 }
0x3c7c   :  { %11115 = vrsqrt.f32 %v8933_v15  ;;  %vm8937_vm1 = vcmp.eq.f32.partialorder %v8933_v15, inf  ;;  %v8940_v24 = vand.u32 2147483648, %v8933_v15  ;;  %vm8939_vm3 = vcmp.eq.f32.partialorder %v8933_v15, 0.0 }
0x3c85   :  { %v11114_v16 = vpop.eup %11113 }
0x3c86   :  { %v11116_v33 = vpop.eup %11115  ;;  %v8943_v37 = vmul.f32 %v11114_v16, %v8934_v13 }
0x3c87   :  { %v8936_v1 = vmul.f32 %v11116_v33, %v8933_v15 }
0x3c88   :  { %v8945_v22 = vsel %vm8944_vm14, %v8934_v13, %v8943_v37 }
0x3c89   :  { %v8948_v41 = vsel %vm8946_vm15, %v8947_v21, %v8945_v22  ;;  %v8938_v47 = vsel %vm8937_vm1, %v8933_v15, %v8936_v1 }
0x3c8a   :  { %11117 = vrcp.f32 %v8948_v41  ;;  %v8941_v25 = vsel %vm8939_vm3, %v8940_v24, %v8938_v47 }
0x3c8b   :  { %11119 = vrcp.f32 %v8941_v25 }
0x3c94   :  { %v11118_v26 = vpop.eup %11117 }
0x3c95   :  { %v11120_v50 = vpop.eup %11119  ;;  %v8952_v19 = vmul.f32 %v11118_v26, %v8922_v27 }
0x3c96   :  { %v8950_v45 = vmul.f32 %v11120_v50, %v8921_v5 }
0x3c97   :  { %v8960_v29 = vmul.f32 %v9365_v17, %v8952_v19 }
0x3c98   :  { %v8959_v53 = vmul.f32 %v9365_v17, %v8950_v45 }
0x3c99   :  { %v8968_v39 = vadd.f32 %v9366_v51, %v8960_v29 }
0x3c9a   :  { %v8967_v38 = vadd.f32 %v9366_v51, %v8959_v53 }
0x3c9c   :  { %10497 = vmatprep.mubr.msk.f32.mxu0 %vm131_vm0, %v8967_v38 }
0x3c9d   :  { %10498 = vmatmul.mubr.msk.f32.vlgmr.msra.gmra.mrb[70].mxu0 %vm131_vm0, %v8968_v39 }
0x3d70   :  { %v10499_v32 = vpop.f32.mrb[70].mxu0 }
0x3d71   :  { %v9058_v34 = vadd.f32 %v10499_v32, %v9367_v31  ;;  %v9052_v35 = vpop.f32.mrb[71].mxu0 }
0x3d72   :  { %v9053_v6 = vadd.f32 %v9367_v31, %v9052_v35 }
0x3d73   :  { %9062 = vst.msk [vmem:[#allocation2 + $0x8] sm:$0xff] %vm4662_vm6, %v9058_v34 }
0x3d74   :  { %9061 = vst.msk [vmem:[#allocation2] sm:$0xff] %vm4662_vm6, %v9053_v6 }
0x3d75   :  { %11140 = shalt.err (!%p11137_p4)
}
0x3d76   :  { %s11141_s0 = scalar_lea.hbm %s11360_s12, 256 }
0x3d77   :  { %p11142_p5 = scmp.ne.s32.totalorder %s11360_s12, %s11141_s0  ;;  %p11145_p6 = scmp.lt.u32.totalorder %s11141_s0, %s11360_s12 }
0x3d79   :  { %p11147_p7 = pnand %p11145_p6, %p11142_p5 }
0x3d7b   :  { %11150 = shalt.err (!%p11147_p7)
}
0x3d7c   :  { %s11201_s5 = smov 128  }
0x3d7d   :  { %9074 = dma.vmem_to_hbm [thread:$0]  %s9069_s10, 256, %s11360_s12, [#allocation3], %s11201_s5, %s11201_s5, %s11196_s20  }
0x3d7e   :  { %11151 = dma.done.wait [#allocation3], 256  }
0x3d7f   :  { %11152 = vsyncadd [#allocation3], 4294967040 }
0x3d80   :  { %9078 = vsyncpa [#allocation3], 1 }

</bundles_post_ra>
